<compile_context>
chip_gen: v7x
topology: tpu7x:2x2x1
jax: 0.10.0
libtpu: 0.0.40
codegen_flags: <defaults>
</compile_context>

<pallas_src>
import jax
import jax.numpy as jnp
from jax.experimental import pallas as pl
from jax.experimental.pallas import tpu as pltpu

IN_DIM = 3 * 28 * 28       # 2352 -- streamed ragged (block == full array dim)
HID = 512
OUT_DIM = 10
OUT_PAD = 128              # lane-dense output slab; sliced to 10 in the wrapper
NEG_BIG = -1e30            # bias on padded logit lanes -> softmax prob exactly 0


def _round_up(x, m):
    return (x + m - 1) // m * m


def _choose_tile_b(batch):
    """Rows per grid step.

    - 16-row floor (bf16 vreg tile is (16,128) for the in-kernel bf16 stream
      and the bf16 output slab).
    - For batch > 32, guarantee >= 2 grid steps so the "parallel" batch axis
      can shard across both TensorCores on v7x.
    - Cap at 512 rows/tile.  (v6e could take 1024 to amortize per-step
      overhead, but that would re-merge the grid into one step for
      batch <= 1024 and idle a v7x TensorCore.)
    """
    b16 = _round_up(max(batch, 1), 16)
    if b16 <= 32:
        return b16
    return min(512, _round_up(pl.cdiv(b16, 2), 16))


def mlp_softmax_kernel(x_ref, w1_ref, b1_ref, w2_ref, b2_ref, w3_ref, b3_ref,
                       o_ref):
    # x_ref: (TB, 2352) f32 tile streamed from HBM; cast to bf16 on the VPU so
    # all three matmuls hit the bf16 MXU path with f32 accumulation.
    x = x_ref[...].astype(jnp.bfloat16)

    h1 = jnp.dot(x, w1_ref[...], preferred_element_type=jnp.float32)
    h1 = jnp.maximum(h1 + b1_ref[...], 0.0)

    h2 = jnp.dot(h1.astype(jnp.bfloat16), w2_ref[...],
                 preferred_element_type=jnp.float32)
    h2 = jnp.maximum(h2 + b2_ref[...], 0.0)

    logits = jnp.dot(h2.astype(jnp.bfloat16), w3_ref[...],
                     preferred_element_type=jnp.float32)
    logits = logits + b3_ref[...]        # padded lanes get ~-1e30 -> prob 0

    # Stable softmax over the 128-lane slab (== Softmax(dim=1) on real 10 cols).
    m = jnp.max(logits, axis=-1, keepdims=True)
    e = jnp.exp(logits - m)
    denom = jnp.sum(e, axis=-1, keepdims=True)
    o_ref[...] = (e * pl.reciprocal(denom, approx=True)).astype(o_ref.dtype)


def my_network_forward(x_nchw, packed_params):
    """x_nchw: (B, 3, 28, 28) float32 -> (B, 10) softmax probabilities."""
    w1, b1, w2, b2, w3, b3 = packed_params
    B = x_nchw.shape[0]

    # Flatten(-3,-1): free row-major metadata reshape (same order as torch).
    # No cast / lane-pad here -- the kernel streams f32 and casts in VMEM.
    x2d = x_nchw.reshape(B, IN_DIM)

    TB = _choose_tile_b(B)
    B_pad = _round_up(B, TB)
    if B_pad != B:
        x2d = jnp.pad(x2d, ((0, B_pad - B), (0, 0)))
    grid = (B_pad // TB,)

    out = pl.pallas_call(
        mlp_softmax_kernel,
        out_shape=jax.ShapeDtypeStruct((B_pad, OUT_PAD), jnp.bfloat16),
        grid=grid,
        in_specs=[
            pl.BlockSpec((TB, IN_DIM), lambda i: (i, 0)),    # x: streamed f32
            pl.BlockSpec((IN_DIM, HID), lambda i: (0, 0)),   # w1: VMEM-resident
            pl.BlockSpec((1, HID), lambda i: (0, 0)),        # b1
            pl.BlockSpec((HID, HID), lambda i: (0, 0)),      # w2
            pl.BlockSpec((1, HID), lambda i: (0, 0)),        # b2
            pl.BlockSpec((HID, OUT_PAD), lambda i: (0, 0)),  # w3
            pl.BlockSpec((1, OUT_PAD), lambda i: (0, 0)),    # b3
        ],
        out_specs=pl.BlockSpec((TB, OUT_PAD), lambda i: (i, 0)),
        compiler_params=pltpu.CompilerParams(
            dimension_semantics=("parallel",),  # shard batch tiles across TCs
            vmem_limit_bytes=48 << 20,          # headroom on v7x's 64 MiB VMEM
        ),
    )(x2d, w1, b1, w2, b2, w3, b3)

    return out[:B, :OUT_DIM].astype(jnp.float32)


def init_params(key):
    """PyTorch-layout f32 params; Linear default init U(-1/sqrt(fan_in), +)."""
    ks = jax.random.split(key, 6)

    def lin(kw, kb, fan_in, fan_out):
        bound = 1.0 / jnp.sqrt(fan_in)
        w = jax.random.uniform(kw, (fan_in, fan_out), jnp.float32, -bound, bound)
        b = jax.random.uniform(kb, (1, fan_out), jnp.float32, -bound, bound)
        return w, b

    w1, b1 = lin(ks[0], ks[1], IN_DIM, HID)
    w2, b2 = lin(ks[2], ks[3], HID, HID)
    w3, b3 = lin(ks[4], ks[5], HID, OUT_DIM)
    return (w1, b1, w2, b2, w3, b3)


def prepare_params(params_f32):
    """Cast/pad params for the kernel.

    Weights (in, out) -> bf16; w1 kept at K=2352 (no pad); w3/b3 lane-padded
    10 -> 128 (extra b3 lanes = -1e30 so their softmax probability is exactly
    0).  Biases stay f32 and are added to the f32 MXU accumulators.
    """
    w1, b1, w2, b2, w3, b3 = params_f32
    w1p = w1.astype(jnp.bfloat16)
    w2p = w2.astype(jnp.bfloat16)
    w3p = jnp.pad(w3, ((0, 0), (0, OUT_PAD - OUT_DIM))).astype(jnp.bfloat16)
    b3p = jnp.pad(b3, ((0, 0), (0, OUT_PAD - OUT_DIM)),
                  constant_values=NEG_BIG).astype(jnp.float32)
    return (w1p, b1.astype(jnp.float32), w2p, b2.astype(jnp.float32), w3p, b3p)


if __name__ == "__main__":
    key = jax.random.PRNGKey(0)
    k_x, k_p = jax.random.split(key)

    B = 2
    x = jax.random.normal(k_x, (B, 3, 28, 28), dtype=jnp.float32)
    params = init_params(k_p)
    packed = prepare_params(params)

    fwd = jax.jit(my_network_forward)
    out = jax.block_until_ready(fwd(x, packed))

    # Sanity: correct shape, finite, softmax rows sum to ~1 (loose tol covers
    # bf16 weights/output + approx reciprocal).
    assert out.shape == (B, OUT_DIM)
    assert bool(jnp.all(jnp.isfinite(out)))
    assert jnp.allclose(jnp.sum(out, axis=1), 1.0, atol=2e-2)

    print("KERNEL_OK")
</pallas_src>

<mosaic_0001>
module attributes {stable_mosaic.version = 11 : i64} {
  func.func @mlp_softmax_kernel(%arg0: i32, %arg1: memref<16x2352xf32, #tpu.memory_space<vmem>>, %arg2: memref<2352x512xbf16, #tpu.memory_space<vmem>>, %arg3: memref<1x512xf32, #tpu.memory_space<vmem>>, %arg4: memref<512x512xbf16, #tpu.memory_space<vmem>>, %arg5: memref<1x512xf32, #tpu.memory_space<vmem>>, %arg6: memref<512x128xbf16, #tpu.memory_space<vmem>>, %arg7: memref<1x128xf32, #tpu.memory_space<vmem>>, %arg8: memref<16x128xbf16, #tpu.memory_space<vmem>>) attributes {dimension_semantics = [#tpu.dimension_semantics<parallel>], iteration_bounds = array<i64: 1>, scalar_prefetch = 0 : i64, scratch_operands = 0 : i64, tpu.core_type = #tpu.core_type<tc>, window_params = [{transform_indices = @transform_0, window_bounds = array<i64: 16, 2352>}, {pipeline_mode = #tpu.pipeline_mode<synchronous>, transform_indices = @transform_1, window_bounds = array<i64: 2352, 512>}, {pipeline_mode = #tpu.pipeline_mode<synchronous>, transform_indices = @transform_2, window_bounds = array<i64: 1, 512>}, {pipeline_mode = #tpu.pipeline_mode<synchronous>, transform_indices = @transform_3, window_bounds = array<i64: 512, 512>}, {pipeline_mode = #tpu.pipeline_mode<synchronous>, transform_indices = @transform_4, window_bounds = array<i64: 1, 512>}, {pipeline_mode = #tpu.pipeline_mode<synchronous>, transform_indices = @transform_5, window_bounds = array<i64: 512, 128>}, {pipeline_mode = #tpu.pipeline_mode<synchronous>, transform_indices = @transform_6, window_bounds = array<i64: 1, 128>}, {transform_indices = @transform_7, window_bounds = array<i64: 16, 128>}]} {
    %c0 = arith.constant 0 : index
    %c0_0 = arith.constant 0 : index
    %0 = vector.load %arg1[%c0, %c0_0] : memref<16x2352xf32, #tpu.memory_space<vmem>>, vector<16x2352xf32>
    %1 = arith.truncf %0 : vector<16x2352xf32> to vector<16x2352xbf16>
    %c0_1 = arith.constant 0 : index
    %c0_2 = arith.constant 0 : index
    %2 = vector.load %arg2[%c0_1, %c0_2] : memref<2352x512xbf16, #tpu.memory_space<vmem>>, vector<2352x512xbf16>
    %cst = arith.constant dense<0.000000e+00> : vector<16x512xf32>
    %3 = tpu.matmul %1, %2, %cst {dimension_numbers = #tpu.dot_dimension_numbers<[1], [0], [0], [1], [0, 0, 1, 1], [], []>} : vector<16x2352xbf16>, vector<2352x512xbf16>, vector<16x512xf32> -> vector<16x512xf32>
    %c0_3 = arith.constant 0 : index
    %c0_4 = arith.constant 0 : index
    %4 = vector.load %arg3[%c0_3, %c0_4] : memref<1x512xf32, #tpu.memory_space<vmem>>, vector<1x512xf32>
    %5 = vector.broadcast %4 : vector<1x512xf32> to vector<16x512xf32>
    %6 = arith.addf %3, %5 : vector<16x512xf32>
    %cst_5 = arith.constant 0.000000e+00 : f32
    %7 = vector.broadcast %cst_5 : f32 to vector<16x512xf32>
    %8 = arith.maximumf %6, %7 : vector<16x512xf32>
    %9 = arith.truncf %8 : vector<16x512xf32> to vector<16x512xbf16>
    %c0_6 = arith.constant 0 : index
    %c0_7 = arith.constant 0 : index
    %10 = vector.load %arg4[%c0_6, %c0_7] : memref<512x512xbf16, #tpu.memory_space<vmem>>, vector<512x512xbf16>
    %cst_8 = arith.constant dense<0.000000e+00> : vector<16x512xf32>
    %11 = tpu.matmul %9, %10, %cst_8 {dimension_numbers = #tpu.dot_dimension_numbers<[1], [0], [0], [1], [0, 0, 1, 1], [], []>} : vector<16x512xbf16>, vector<512x512xbf16>, vector<16x512xf32> -> vector<16x512xf32>
    %c0_9 = arith.constant 0 : index
    %c0_10 = arith.constant 0 : index
    %12 = vector.load %arg5[%c0_9, %c0_10] : memref<1x512xf32, #tpu.memory_space<vmem>>, vector<1x512xf32>
    %13 = vector.broadcast %12 : vector<1x512xf32> to vector<16x512xf32>
    %14 = arith.addf %11, %13 : vector<16x512xf32>
    %cst_11 = arith.constant 0.000000e+00 : f32
    %15 = vector.broadcast %cst_11 : f32 to vector<16x512xf32>
    %16 = arith.maximumf %14, %15 : vector<16x512xf32>
    %17 = arith.truncf %16 : vector<16x512xf32> to vector<16x512xbf16>
    %c0_12 = arith.constant 0 : index
    %c0_13 = arith.constant 0 : index
    %18 = vector.load %arg6[%c0_12, %c0_13] : memref<512x128xbf16, #tpu.memory_space<vmem>>, vector<512x128xbf16>
    %cst_14 = arith.constant dense<0.000000e+00> : vector<16x128xf32>
    %19 = tpu.matmul %17, %18, %cst_14 {dimension_numbers = #tpu.dot_dimension_numbers<[1], [0], [0], [1], [0, 0, 1, 1], [], []>} : vector<16x512xbf16>, vector<512x128xbf16>, vector<16x128xf32> -> vector<16x128xf32>
    %c0_15 = arith.constant 0 : index
    %c0_16 = arith.constant 0 : index
    %20 = vector.load %arg7[%c0_15, %c0_16] : memref<1x128xf32, #tpu.memory_space<vmem>>, vector<1x128xf32>
    %21 = vector.broadcast %20 : vector<1x128xf32> to vector<16x128xf32>
    %22 = arith.addf %19, %21 : vector<16x128xf32>
    %cst_17 = arith.constant dense<0xFF800000> : vector<16xf32>
    %23 = vector.multi_reduction <maximumf>, %22, %cst_17 [1] : vector<16x128xf32> to vector<16xf32>
    %24 = vector.shape_cast %23 : vector<16xf32> to vector<16x1xf32>
    %25 = vector.broadcast %24 : vector<16x1xf32> to vector<16x128xf32>
    %26 = arith.subf %22, %25 : vector<16x128xf32>
    %27 = math.exp %26 : vector<16x128xf32>
    %cst_18 = arith.constant dense<0.000000e+00> : vector<16xf32>
    %28 = vector.multi_reduction <add>, %27, %cst_18 [1] : vector<16x128xf32> to vector<16xf32>
    %29 = vector.shape_cast %28 : vector<16xf32> to vector<16x1xf32>
    %30 = tpu.reciprocal %29 {approx = true} : vector<16x1xf32> -> vector<16x1xf32>
    %31 = vector.broadcast %30 : vector<16x1xf32> to vector<16x128xf32>
    %32 = arith.mulf %27, %31 : vector<16x128xf32>
    %33 = arith.truncf %32 : vector<16x128xf32> to vector<16x128xbf16>
    %c0_19 = arith.constant 0 : index
    %c0_20 = arith.constant 0 : index
    %34 = vector.load %arg8[%c0_19, %c0_20] : memref<16x128xbf16, #tpu.memory_space<vmem>>, vector<16x128xbf16>
    tpu.vector_store %arg8[%c0_19, %c0_20], %33 {strides = array<i32>} : memref<16x128xbf16, #tpu.memory_space<vmem>>, vector<16x128xbf16>,
    return
  }
  func.func @transform_0(%arg0: i32) -> (i32, i32) {
    %c0_i32 = arith.constant 0 : i32
    %c0_i32_0 = arith.constant 0 : i32
    return %arg0, %c0_i32 : i32, i32
  }
  func.func @transform_1(%arg0: i32) -> (i32, i32) {
    %c0_i32 = arith.constant 0 : i32
    %c0_i32_0 = arith.constant 0 : i32
    %c0_i32_1 = arith.constant 0 : i32
    return %c0_i32, %c0_i32_0 : i32, i32
  }
  func.func @transform_2(%arg0: i32) -> (i32, i32) {
    %c0_i32 = arith.constant 0 : i32
    %c0_i32_0 = arith.constant 0 : i32
    %c0_i32_1 = arith.constant 0 : i32
    return %c0_i32, %c0_i32_0 : i32, i32
  }
  func.func @transform_3(%arg0: i32) -> (i32, i32) {
    %c0_i32 = arith.constant 0 : i32
    %c0_i32_0 = arith.constant 0 : i32
    %c0_i32_1 = arith.constant 0 : i32
    return %c0_i32, %c0_i32_0 : i32, i32
  }
  func.func @transform_4(%arg0: i32) -> (i32, i32) {
    %c0_i32 = arith.constant 0 : i32
    %c0_i32_0 = arith.constant 0 : i32
    %c0_i32_1 = arith.constant 0 : i32
    return %c0_i32, %c0_i32_0 : i32, i32
  }
  func.func @transform_5(%arg0: i32) -> (i32, i32) {
    %c0_i32 = arith.constant 0 : i32
    %c0_i32_0 = arith.constant 0 : i32
    %c0_i32_1 = arith.constant 0 : i32
    return %c0_i32, %c0_i32_0 : i32, i32
  }
  func.func @transform_6(%arg0: i32) -> (i32, i32) {
    %c0_i32 = arith.constant 0 : i32
    %c0_i32_0 = arith.constant 0 : i32
    %c0_i32_1 = arith.constant 0 : i32
    return %c0_i32, %c0_i32_0 : i32, i32
  }
  func.func @transform_7(%arg0: i32) -> (i32, i32) {
    %c0_i32 = arith.constant 0 : i32
    %c0_i32_0 = arith.constant 0 : i32
    return %arg0, %c0_i32 : i32, i32
  }
}

</mosaic_0001>

<bundles_post_ra>
// kernel: my_network_forward.1
= control target key start
LH: loop header
LB: loop body
LE: loop exit
PB: predicated region body
PF: predicated region fallthrough
CT: control target
= control target key end

     0   :  { %12 = vsyncpa [#allocation3], 0  ;;  %s8372_s0 = inlined_call_operand.vmem [shape: f32[16,2352], index: 0, kind: input, shape index: {}]   ;;  %s8373_s1 = inlined_call_operand.hbm [shape: bf16[2352,512], index: 1, kind: input, shape index: {}]   ;;  %s8374_s2 = inlined_call_operand.hbm [shape: f32[1,512], index: 2, kind: input, shape index: {}]   ;;  %s8375_s3 = inlined_call_operand.hbm [shape: bf16[512,512], index: 3, kind: input, shape index: {}]   ;;  %s8376_s4 = inlined_call_operand.hbm [shape: f32[1,512], index: 4, kind: input, shape index: {}]   ;;  %s8377_s5 = inlined_call_operand.hbm [shape: bf16[512,128], index: 5, kind: input, shape index: {}]   ;;  %s8378_s6 = inlined_call_operand.hbm [shape: f32[1,128], index: 6, kind: input, shape index: {}]   ;;  %s8379_s7 = inlined_call_operand.vmem [shape: bf16[16,128], index: 7, kind: output, shape index: {}]  }
   0x1   :  { %13 = vsyncpa [#allocation5], 0 }
   0x2   :  { %14 = vsyncpa [#allocation8], 0 }
   0x3   :  { %15 = vsyncpa [#allocation11], 0  ;;  %s8106_s24 = smov [#allocation4]   ;;  %s8107_s26 = smov [#allocation7]  }
   0x4   :  { %s36_s25 = sshll.u32 %s8106_s24, 4  ;;  %s58_s27 = sshll.u32 %s8107_s26, 4  ;;  %s37_s25 = int_to_ptr.vmem [resolvable:$true] %s36_s25  ;;  %s59_s27 = int_to_ptr.vmem [resolvable:$true] %s58_s27 }
   0x5   :  { %s7966_s30 = scalar_lea.hbm %s8374_s2, 64 }
   0x6   :  { %p7967_p0 = scmp.ne.s32.totalorder %s8374_s2, %s7966_s30  ;;  %p7970_p1 = scmp.lt.u32.totalorder %s7966_s30, %s8374_s2 }
   0x8   :  { %p7972_p2 = pnand %p7970_p1, %p7967_p0 }
   0xa   :  { %7975 = shalt.err (!%p7972_p2)
}
   0xb   :  { %s7976_s12 = scalar_lea.vmem %s37_s25, 64  ;;  %p7981_p4 = scmp.lt.s32.totalorder %s37_s25, %s37_s25 }
   0xc   :  { %p7977_p3 = scmp.ne.s32.totalorder %s37_s25, %s7976_s12  ;;  %p7982_p5 = scmp.lt.s32.totalorder %s7976_s12, %s7976_s12 }
   0xe   :  { %p7983_p6 = por %p7982_p5, %p7981_p4 }
  0x10   :  { %p7984_p7 = pnand %p7983_p6, %p7977_p3 }
  0x12   :  { %7987 = shalt.err (!%p7984_p7)
}
  0x13   :  { %39 = dma.hbm_to_vmem [thread:$0]  %s8374_s2, 64, %s37_s25, [#allocation5]  }
  0x14   :  { %s7988_s17 = scalar_lea.hbm %s8376_s4, 64 }
  0x15   :  { %p7989_p8 = scmp.ne.s32.totalorder %s8376_s4, %s7988_s17  ;;  %p7992_p9 = scmp.lt.u32.totalorder %s7988_s17, %s8376_s4 }
  0x17   :  { %p7994_p10 = pnand %p7992_p9, %p7989_p8 }
  0x19   :  { %7997 = shalt.err (!%p7994_p10)
}
  0x1a   :  { %s7998_s22 = scalar_lea.vmem %s59_s27, 64  ;;  %p8003_p12 = scmp.lt.s32.totalorder %s59_s27, %s59_s27 }
  0x1b   :  { %p7999_p11 = scmp.ne.s32.totalorder %s59_s27, %s7998_s22  ;;  %p8004_p13 = scmp.lt.s32.totalorder %s7998_s22, %s7998_s22 }
  0x1d   :  { %p8005_p0 = por %p8004_p13, %p8003_p12 }
  0x1f   :  { %p8006_p1 = pnand %p8005_p0, %p7999_p11 }
  0x21   :  { %8009 = shalt.err (!%p8006_p1)
}
  0x22   :  { %61 = dma.hbm_to_vmem [thread:$0]  %s8376_s4, 64, %s59_s27, [#allocation8]  }
  0x23   :  { %s8108_s24 = smov [#allocation2]   ;;  %s8010_s29 = scalar_lea.hbm %s8373_s1, 75264 }
  0x24   :  { %s23_s25 = sshll.u32 %s8108_s24, 4  ;;  %p8011_p2 = scmp.ne.s32.totalorder %s8373_s1, %s8010_s29  ;;  %s24_s25 = int_to_ptr.vmem [resolvable:$true] %s23_s25 }
  0x25   :  { %p8014_p3 = scmp.lt.u32.totalorder %s8010_s29, %s8373_s1 }
  0x27   :  { %p8016_p4 = pnand %p8014_p3, %p8011_p2 }
  0x29   :  { %8019 = shalt.err (!%p8016_p4)
}
  0x2a   :  { %s8020_s11 = scalar_lea.vmem %s24_s25, 75264  ;;  %p8025_p6 = scmp.lt.s32.totalorder %s24_s25, %s24_s25 }
  0x2b   :  { %p8021_p5 = scmp.ne.s32.totalorder %s24_s25, %s8020_s11  ;;  %p8026_p7 = scmp.lt.s32.totalorder %s8020_s11, %s8020_s11 }
  0x2d   :  { %p8027_p8 = por %p8026_p7, %p8025_p6 }
  0x2f   :  { %p8028_p9 = pnand %p8027_p8, %p8021_p5 }
  0x31   :  { %8031 = shalt.err (!%p8028_p9)
}
  0x32   :  { %s8109_s4 = smov 256   ;;  %s8110_s27 = smov 16  }
  0x33   :  { %29 = dma.hbm_to_vmem [thread:$0]  %s8373_s1, 75264, %s24_s25, [#allocation3], %s8109_s4, %s8109_s4, %s8110_s27  }
  0x34   :  { %s8111_s14 = smov [#allocation6]   ;;  %s8112_s16 = smov [#allocation9]  }
  0x35   :  { %s45_s15 = sshll.u32 %s8111_s14, 4  ;;  %s67_s17 = sshll.u32 %s8112_s16, 4  ;;  %s46_s15 = int_to_ptr.vmem [resolvable:$true] %s45_s15  ;;  %s68_s17 = int_to_ptr.vmem [resolvable:$true] %s67_s17 }
  0x36   :  { %s8032_s20 = scalar_lea.hbm %s8375_s3, 16384 }
  0x37   :  { %p8033_p10 = scmp.ne.s32.totalorder %s8375_s3, %s8032_s20  ;;  %p8036_p11 = scmp.lt.u32.totalorder %s8032_s20, %s8375_s3 }
  0x39   :  { %p8038_p12 = pnand %p8036_p11, %p8033_p10 }
  0x3b   :  { %8041 = shalt.err (!%p8038_p12)
}
  0x3c   :  { %s8042_s1 = scalar_lea.vmem %s46_s15, 16384  ;;  %p8047_p0 = scmp.lt.s32.totalorder %s46_s15, %s46_s15 }
  0x3d   :  { %p8043_p13 = scmp.ne.s32.totalorder %s46_s15, %s8042_s1  ;;  %p8048_p1 = scmp.lt.s32.totalorder %s8042_s1, %s8042_s1 }
  0x3f   :  { %p8049_p2 = por %p8048_p1, %p8047_p0 }
  0x41   :  { %p8050_p3 = pnand %p8049_p2, %p8043_p13 }
  0x43   :  { %8053 = shalt.err (!%p8050_p3)
}
  0x44   :  { %51 = dma.hbm_to_vmem [thread:$0]  %s8375_s3, 16384, %s46_s15, [#allocation5], %s8109_s4, %s8109_s4, %s8110_s27  }
  0x45   :  { %s8054_s29 = scalar_lea.hbm %s8377_s5, 4096 }
  0x46   :  { %p8055_p4 = scmp.ne.s32.totalorder %s8377_s5, %s8054_s29  ;;  %p8058_p5 = scmp.lt.u32.totalorder %s8054_s29, %s8377_s5 }
  0x48   :  { %p8060_p6 = pnand %p8058_p5, %p8055_p4 }
  0x4a   :  { %8063 = shalt.err (!%p8060_p6)
}
  0x4b   :  { %s8064_s11 = scalar_lea.vmem %s68_s17, 4096  ;;  %p8069_p8 = scmp.lt.s32.totalorder %s68_s17, %s68_s17 }
  0x4c   :  { %p8065_p7 = scmp.ne.s32.totalorder %s68_s17, %s8064_s11  ;;  %p8070_p9 = scmp.lt.s32.totalorder %s8064_s11, %s8064_s11 }
  0x4e   :  { %p8071_p10 = por %p8070_p9, %p8069_p8 }
  0x50   :  { %p8072_p11 = pnand %p8071_p10, %p8065_p7 }
  0x52   :  { %8075 = shalt.err (!%p8072_p11)
}
  0x53   :  { %s8113_s3 = smov 64   ;;  %s8114_s4 = smov 4  }
  0x54   :  { %73 = dma.hbm_to_vmem [thread:$0]  %s8377_s5, 4096, %s68_s17, [#allocation8], %s8113_s3, %s8113_s3, %s8114_s4  }
  0x55   :  { %s8115_s13 = smov [#allocation10]   ;;  %s8076_s18 = scalar_lea.hbm %s8378_s6, 16 }
  0x56   :  { %s80_s14 = sshll.u32 %s8115_s13, 4  ;;  %p8077_p12 = scmp.ne.s32.totalorder %s8378_s6, %s8076_s18  ;;  %s81_s14 = int_to_ptr.vmem [resolvable:$true] %s80_s14 }
  0x57   :  { %p8080_p13 = scmp.lt.u32.totalorder %s8076_s18, %s8378_s6 }
  0x59   :  { %p8082_p0 = pnand %p8080_p13, %p8077_p12 }
  0x5b   :  { %8085 = shalt.err (!%p8082_p0)
}
  0x5c   :  { %s8086_s2 = scalar_lea.vmem %s81_s14, 16  ;;  %s8090_s5 = scalar_lea.vmem %s81_s14, 32 }
  0x5d   :  { %p8087_p1 = scmp.ne.s32.totalorder %s81_s14, %s8086_s2  ;;  %p8091_p2 = scmp.lt.s32.totalorder %s81_s14, %s81_s14 }
  0x5e   :  { %p8092_p3 = scmp.lt.s32.totalorder %s8090_s5, %s8086_s2 }
  0x60   :  { %p8093_p4 = por %p8092_p3, %p8091_p2 }
  0x62   :  { %p8094_p5 = pnand %p8093_p4, %p8087_p1 }
  0x64   :  { %8097 = shalt.err (!%p8094_p5)
}
  0x65   :  { %83 = dma.hbm_to_vmem [thread:$0]  %s8378_s6, 16, %s81_s14, [#allocation11]  }
  0x66   :  { %8098 = dma.done.wait [#allocation3], 75264  }
  0x67   :  { %8099 = vsyncadd [#allocation3], 4294892032 }
  0x68   :  { %8100 = dma.done.wait [#allocation5], 16448  }
  0x69   :  { %8101 = vsyncadd [#allocation5], 4294950848 }
  0x6a   :  { %8102 = dma.done.wait [#allocation8], 4160  }
  0x6b   :  { %8103 = vsyncadd [#allocation8], 4294963136 }
  0x6c   :  { %8104 = dma.done.wait [#allocation11], 16  }
  0x6d   :  { %8105 = vsyncadd [#allocation11], 4294967280  ;;  %v6852_v0 = vld [vmem:[#allocation2 + $0x4] ss:$16 sps:$4 sm:$0xff]   ;;  %v6854_v1 = vld [vmem:[#allocation2 + $0xc] ss:$16 sps:$4 sm:$0xff]  }
  0x6e   :  { %3714 = vmatprep.subr.bf16.mxu0 %v6852_v0  ;;  %v6856_v2 = vld [vmem:[#allocation2] ss:$16 sps:$4 sm:$0xff]   ;;  %v6857_v3 = vld [vmem:[#allocation2 + $0x8] ss:$16 sps:$4 sm:$0xff]   ;;  %4144 = vmatprep.subr.bf16.mxu1 %v6854_v1  ;;  %v6858_v4 = vld [vmem:[#allocation2 + $0x24] ss:$16 sps:$4 sm:$0xff]  }
  0x6f   :  { %3715 = vmatpush1.bf16.msra.mxu0 %v6856_v2  ;;  %4145 = vmatpush1.bf16.msra.mxu1 %v6857_v3  ;;  %v6860_v5 = vld [vmem:[#allocation2 + $0x2c] ss:$16 sps:$4 sm:$0xff]   ;;  %v6862_v6 = vld [vmem:[#allocation2 + $0x20] ss:$16 sps:$4 sm:$0xff]   ;;  %v6863_v7 = vld [vmem:[#allocation2 + $0x28] ss:$16 sps:$4 sm:$0xff]  }
  0x70   :  { %3716 = vmatprep.subr.bf16.mxu0 %v6858_v4  ;;  %4146 = vmatprep.subr.bf16.mxu1 %v6860_v5  ;;  %v6864_v8 = vld [vmem:[#allocation2 + $0x44] ss:$16 sps:$4 sm:$0xff]   ;;  %v6866_v9 = vld [vmem:[#allocation2 + $0x4c] ss:$16 sps:$4 sm:$0xff]   ;;  %v6868_v10 = vld [vmem:[#allocation2 + $0x40] ss:$16 sps:$4 sm:$0xff]  }
  0x71   :  { %v6869_v11 = vld [vmem:[#allocation2 + $0x48] ss:$16 sps:$4 sm:$0xff]   ;;  %v6870_v12 = vld [vmem:[#allocation2 + $0x64] ss:$16 sps:$4 sm:$0xff]   ;;  %v6872_v13 = vld [vmem:[#allocation2 + $0x6c] ss:$16 sps:$4 sm:$0xff]  }
  0x72   :  { %v6874_v14 = vld [vmem:[#allocation2 + $0x60] ss:$16 sps:$4 sm:$0xff]   ;;  %v6875_v15 = vld [vmem:[#allocation2 + $0x68] ss:$16 sps:$4 sm:$0xff]   ;;  %v6876_v16 = vld [vmem:[#allocation2 + $0x84] ss:$16 sps:$4 sm:$0xff]  }
  0x73   :  { %3717 = vmatpush1.bf16.msra.mxu0 %v6862_v6  ;;  %4147 = vmatpush1.bf16.msra.mxu1 %v6863_v7  ;;  %v6878_v17 = vld [vmem:[#allocation2 + $0x8c] ss:$16 sps:$4 sm:$0xff]   ;;  %v6880_v18 = vld [vmem:[#allocation2 + $0x80] ss:$16 sps:$4 sm:$0xff]   ;;  %v6881_v19 = vld [vmem:[#allocation2 + $0x88] ss:$16 sps:$4 sm:$0xff]  }
  0x74   :  { %3718 = vmatprep.subr.bf16.mxu0 %v6864_v8  ;;  %4148 = vmatprep.subr.bf16.mxu1 %v6866_v9  ;;  %v6882_v20 = vld [vmem:[#allocation2 + $0xa4] ss:$16 sps:$4 sm:$0xff]   ;;  %v6884_v21 = vld [vmem:[#allocation2 + $0xac] ss:$16 sps:$4 sm:$0xff]   ;;  %v6886_v22 = vld [vmem:[#allocation2 + $0xa0] ss:$16 sps:$4 sm:$0xff]  }
  0x75   :  { %v6887_v23 = vld [vmem:[#allocation2 + $0xa8] ss:$16 sps:$4 sm:$0xff]   ;;  %v6888_v24 = vld [vmem:[#allocation2 + $0xc4] ss:$16 sps:$4 sm:$0xff]   ;;  %v6890_v25 = vld [vmem:[#allocation2 + $0xcc] ss:$16 sps:$4 sm:$0xff]  }
  0x76   :  { %v6892_v26 = vld [vmem:[#allocation2 + $0xc0] ss:$16 sps:$4 sm:$0xff]   ;;  %v6893_v27 = vld [vmem:[#allocation2 + $0xc8] ss:$16 sps:$4 sm:$0xff]   ;;  %v6894_v28 = vld [vmem:[#allocation2 + $0xe4] ss:$16 sps:$4 sm:$0xff]  }
  0x77   :  { %3719 = vmatpush1.bf16.msra.mxu0 %v6868_v10  ;;  %4149 = vmatpush1.bf16.msra.mxu1 %v6869_v11  ;;  %v6896_v29 = vld [vmem:[#allocation2 + $0xec] ss:$16 sps:$4 sm:$0xff]   ;;  %v6898_v30 = vld [vmem:[#allocation2 + $0xe0] ss:$16 sps:$4 sm:$0xff]   ;;  %v6899_v31 = vld [vmem:[#allocation2 + $0xe8] ss:$16 sps:$4 sm:$0xff]  }
  0x78   :  { %3720 = vmatprep.subr.bf16.mxu0 %v6870_v12  ;;  %4150 = vmatprep.subr.bf16.mxu1 %v6872_v13  ;;  %v6900_v32 = vld [vmem:[#allocation2 + $0x104] ss:$16 sps:$4 sm:$0xff]   ;;  %v6902_v33 = vld [vmem:[#allocation2 + $0x10c] ss:$16 sps:$4 sm:$0xff]   ;;  %v6904_v34 = vld [vmem:[#allocation2 + $0x100] ss:$16 sps:$4 sm:$0xff]  }
  0x79   :  { %v6905_v35 = vld [vmem:[#allocation2 + $0x108] ss:$16 sps:$4 sm:$0xff]   ;;  %v6906_v36 = vld [vmem:[#allocation2 + $0x124] ss:$16 sps:$4 sm:$0xff]   ;;  %v6908_v37 = vld [vmem:[#allocation2 + $0x12c] ss:$16 sps:$4 sm:$0xff]  }
  0x7a   :  { %v6910_v38 = vld [vmem:[#allocation2 + $0x120] ss:$16 sps:$4 sm:$0xff]   ;;  %v6911_v39 = vld [vmem:[#allocation2 + $0x128] ss:$16 sps:$4 sm:$0xff]   ;;  %v6912_v40 = vld [vmem:[#allocation2 + $0x144] ss:$16 sps:$4 sm:$0xff]  }
  0x7b   :  { %3721 = vmatpush1.bf16.msra.mxu0 %v6874_v14  ;;  %4151 = vmatpush1.bf16.msra.mxu1 %v6875_v15  ;;  %v6914_v41 = vld [vmem:[#allocation2 + $0x14c] ss:$16 sps:$4 sm:$0xff]   ;;  %v6916_v42 = vld [vmem:[#allocation2 + $0x140] ss:$16 sps:$4 sm:$0xff]   ;;  %v6917_v43 = vld [vmem:[#allocation2 + $0x148] ss:$16 sps:$4 sm:$0xff]  }
  0x7c   :  { %3722 = vmatprep.subr.bf16.mxu0 %v6876_v16  ;;  %4152 = vmatprep.subr.bf16.mxu1 %v6878_v17  ;;  %v6918_v44 = vld [vmem:[#allocation2 + $0x164] ss:$16 sps:$4 sm:$0xff]   ;;  %v6920_v45 = vld [vmem:[#allocation2 + $0x16c] ss:$16 sps:$4 sm:$0xff]   ;;  %v6922_v48 = vld [vmem:[#allocation2 + $0x160] ss:$16 sps:$4 sm:$0xff]  }
  0x7d   :  { %v104_v46 = vld [vmem:[%s8372_s0 + $0x8] sm:$0xff]  ;;  %v123_v47 = vld [vmem:[%s8372_s0 + $0xa0] sm:$0xff]  ;;  %v122_v5 = vld [vmem:[%s8372_s0 + $0x98] sm:$0xff]  ;;  %vm3710_vm0 = vcmask 392192  }
  0x7e   :  { %v6923_v49 = vld [vmem:[#allocation2 + $0x168] ss:$16 sps:$4 sm:$0xff]   ;;  %v142_v50 = vpack.c.bf16 %v123_v47, %v104_v46  ;;  %v6924_v51 = vld [vmem:[#allocation2 + $0x184] ss:$16 sps:$4 sm:$0xff]   ;;  %v6926_v52 = vld [vmem:[#allocation2 + $0x18c] ss:$16 sps:$4 sm:$0xff]  }
  0x7f   :  { %3723 = vmatpush1.bf16.msra.mxu0 %v6880_v18  ;;  %4153 = vmatpush1.bf16.msra.mxu1 %v6881_v19  ;;  %v6928_v53 = vld [vmem:[#allocation2 + $0x180] ss:$16 sps:$4 sm:$0xff]   ;;  %v6929_v54 = vld [vmem:[#allocation2 + $0x188] ss:$16 sps:$4 sm:$0xff]   ;;  %v6930_v55 = vld [vmem:[#allocation2 + $0x1a4] ss:$16 sps:$4 sm:$0xff]  }
  0x80   :  { %3724 = vmatprep.subr.bf16.mxu0 %v6882_v20  ;;  %4154 = vmatprep.subr.bf16.mxu1 %v6884_v21  ;;  %v6932_v56 = vld [vmem:[#allocation2 + $0x1ac] ss:$16 sps:$4 sm:$0xff]   ;;  %v6934_v57 = vld [vmem:[#allocation2 + $0x1a0] ss:$16 sps:$4 sm:$0xff]   ;;  %v6935_v58 = vld [vmem:[#allocation2 + $0x1a8] ss:$16 sps:$4 sm:$0xff]  }
  0x81   :  { %3746 = vmatprep.mubr.bf16.mxu0 %v142_v50  ;;  %4176 = vmatprep.mubr.bf16.mxu1 %v142_v50  ;;  %v6936_v59 = vld [vmem:[#allocation2 + $0x1c4] ss:$16 sps:$4 sm:$0xff]   ;;  %v6938_v60 = vld [vmem:[#allocation2 + $0x1cc] ss:$16 sps:$4 sm:$0xff]   ;;  %v6940_v61 = vld [vmem:[#allocation2 + $0x1c0] ss:$16 sps:$4 sm:$0xff]  }
  0x82   :  { %v6941_v62 = vld [vmem:[#allocation2 + $0x1c8] ss:$16 sps:$4 sm:$0xff]   ;;  %v6942_v63 = vld [vmem:[#allocation2 + $0x1e4] ss:$16 sps:$4 sm:$0xff]   ;;  %v6944_v0 = vld [vmem:[#allocation2 + $0x1ec] ss:$16 sps:$4 sm:$0xff]  }
  0x83   :  { %3725 = vmatpush1.bf16.msra.mxu0 %v6886_v22  ;;  %4155 = vmatpush1.bf16.msra.mxu1 %v6887_v23  ;;  %v6946_v1 = vld [vmem:[#allocation2 + $0x1e0] ss:$16 sps:$4 sm:$0xff]   ;;  %v6947_v2 = vld [vmem:[#allocation2 + $0x1e8] ss:$16 sps:$4 sm:$0xff]   ;;  %v6950_v3 = vld [vmem:[#allocation2 + $0x204] ss:$16 sps:$4 sm:$0xff]  }
  0x84   :  { %3726 = vmatprep.subr.bf16.mxu0 %v6888_v24  ;;  %4156 = vmatprep.subr.bf16.mxu1 %v6890_v25  ;;  %v103_v4 = vld [vmem:[%s8372_s0] sm:$0xff]  ;;  %v6953_v6 = vld [vmem:[#allocation2 + $0x20c] ss:$16 sps:$4 sm:$0xff]   ;;  %v6951_v8 = vld [vmem:[#allocation2 + $0x208] ss:$16 sps:$4 sm:$0xff]  }
  0x85   :  { %v6948_v7 = vld [vmem:[#allocation2 + $0x200] ss:$16 sps:$4 sm:$0xff]   ;;  %v141_v9 = vpack.c.bf16 %v122_v5, %v103_v4  ;;  %v6956_v10 = vld [vmem:[#allocation2 + $0x224] ss:$16 sps:$4 sm:$0xff]   ;;  %v6959_v11 = vld [vmem:[#allocation2 + $0x22c] ss:$16 sps:$4 sm:$0xff]  }
  0x86   :  { %v6954_v12 = vld [vmem:[#allocation2 + $0x220] ss:$16 sps:$4 sm:$0xff]   ;;  %v6957_v13 = vld [vmem:[#allocation2 + $0x228] ss:$16 sps:$4 sm:$0xff]   ;;  %v6962_v14 = vld [vmem:[#allocation2 + $0x244] ss:$16 sps:$4 sm:$0xff]  }
  0x87   :  { %3727 = vmatpush1.bf16.msra.mxu0 %v6892_v26  ;;  %4157 = vmatpush1.bf16.msra.mxu1 %v6893_v27  ;;  %v6965_v15 = vld [vmem:[#allocation2 + $0x24c] ss:$16 sps:$4 sm:$0xff]   ;;  %v6960_v16 = vld [vmem:[#allocation2 + $0x240] ss:$16 sps:$4 sm:$0xff]   ;;  %v6963_v17 = vld [vmem:[#allocation2 + $0x248] ss:$16 sps:$4 sm:$0xff]  }
  0x88   :  { %3728 = vmatprep.subr.bf16.mxu0 %v6894_v28  ;;  %4158 = vmatprep.subr.bf16.mxu1 %v6896_v29  ;;  %v6968_v18 = vld [vmem:[#allocation2 + $0x264] ss:$16 sps:$4 sm:$0xff]   ;;  %v6971_v19 = vld [vmem:[#allocation2 + $0x26c] ss:$16 sps:$4 sm:$0xff]   ;;  %v6966_v20 = vld [vmem:[#allocation2 + $0x260] ss:$16 sps:$4 sm:$0xff]  }
  0x89   :  { %v6969_v21 = vld [vmem:[#allocation2 + $0x268] ss:$16 sps:$4 sm:$0xff]   ;;  %v6974_v22 = vld [vmem:[#allocation2 + $0x284] ss:$16 sps:$4 sm:$0xff]   ;;  %v6977_v23 = vld [vmem:[#allocation2 + $0x28c] ss:$16 sps:$4 sm:$0xff]  }
  0x8a   :  { %v6972_v24 = vld [vmem:[#allocation2 + $0x280] ss:$16 sps:$4 sm:$0xff]   ;;  %v6975_v25 = vld [vmem:[#allocation2 + $0x288] ss:$16 sps:$4 sm:$0xff]   ;;  %v6980_v26 = vld [vmem:[#allocation2 + $0x2a4] ss:$16 sps:$4 sm:$0xff]  }
  0x8b   :  { %3729 = vmatpush1.bf16.msra.mxu0 %v6898_v30  ;;  %4159 = vmatpush1.bf16.msra.mxu1 %v6899_v31  ;;  %v6983_v27 = vld [vmem:[#allocation2 + $0x2ac] ss:$16 sps:$4 sm:$0xff]   ;;  %v6978_v28 = vld [vmem:[#allocation2 + $0x2a0] ss:$16 sps:$4 sm:$0xff]   ;;  %v6981_v29 = vld [vmem:[#allocation2 + $0x2a8] ss:$16 sps:$4 sm:$0xff]  }
  0x8c   :  { %3730 = vmatprep.subr.bf16.mxu0 %v6900_v32  ;;  %4160 = vmatprep.subr.bf16.mxu1 %v6902_v33  ;;  %v6986_v30 = vld [vmem:[#allocation2 + $0x2c4] ss:$16 sps:$4 sm:$0xff]   ;;  %v6989_v31 = vld [vmem:[#allocation2 + $0x2cc] ss:$16 sps:$4 sm:$0xff]   ;;  %v7002_v47 = vld [vmem:[#allocation2 + $0x320] ss:$16 sps:$4 sm:$0xff]  }
  0x8d   :  { %v106_v32 = vld [vmem:[%s8372_s0 + $0x18] sm:$0xff]  ;;  %v125_v33 = vld [vmem:[%s8372_s0 + $0xb0] sm:$0xff] }
  0x8e   :  { %v7007_v46 = vld [vmem:[#allocation2 + $0x32c] ss:$16 sps:$4 sm:$0xff]   ;;  %v7035_v4 = vld [vmem:[#allocation2 + $0x3c8] ss:$16 sps:$4 sm:$0xff]   ;;  %v7040_v5 = vld [vmem:[#allocation2 + $0x3e4] ss:$16 sps:$4 sm:$0xff]  }
  0x8f   :  { %3731 = vmatpush1.bf16.msra.mxu0 %v6904_v34  ;;  %4161 = vmatpush1.bf16.msra.mxu1 %v6905_v35  ;;  %v6984_v34 = vld [vmem:[#allocation2 + $0x2c0] ss:$16 sps:$4 sm:$0xff]   ;;  %v6987_v35 = vld [vmem:[#allocation2 + $0x2c8] ss:$16 sps:$4 sm:$0xff]   ;;  %v7013_v50 = vld [vmem:[#allocation2 + $0x34c] ss:$16 sps:$4 sm:$0xff]  }
  0x90   :  { %3732 = vmatprep.subr.bf16.mxu0 %v6906_v36  ;;  %4162 = vmatprep.subr.bf16.mxu1 %v6908_v37  ;;  %v144_v36 = vpack.c.bf16 %v125_v33, %v106_v32  ;;  %v6992_v37 = vld [vmem:[#allocation2 + $0x2e4] ss:$16 sps:$4 sm:$0xff]   ;;  %v7073_v32 = vld [vmem:[#allocation2 + $0x48c] ss:$16 sps:$4 sm:$0xff]   ;;  %v7068_v33 = vld [vmem:[#allocation2 + $0x480] ss:$16 sps:$4 sm:$0xff]  }
  0x93   :  { %3733 = vmatpush1.bf16.msra.mxu0 %v6910_v38  ;;  %4163 = vmatpush1.bf16.msra.mxu1 %v6911_v39  ;;  %v6995_v38 = vld [vmem:[#allocation2 + $0x2ec] ss:$16 sps:$4 sm:$0xff]   ;;  %v6990_v39 = vld [vmem:[#allocation2 + $0x2e0] ss:$16 sps:$4 sm:$0xff]  }
  0x94   :  { %3734 = vmatprep.subr.bf16.mxu0 %v6912_v40  ;;  %4164 = vmatprep.subr.bf16.mxu1 %v6914_v41  ;;  %v6993_v40 = vld [vmem:[#allocation2 + $0x2e8] ss:$16 sps:$4 sm:$0xff]   ;;  %v6998_v41 = vld [vmem:[#allocation2 + $0x304] ss:$16 sps:$4 sm:$0xff]  }
  0x97   :  { %3735 = vmatpush1.bf16.msra.mxu0 %v6916_v42  ;;  %4165 = vmatpush1.bf16.msra.mxu1 %v6917_v43  ;;  %v7001_v42 = vld [vmem:[#allocation2 + $0x30c] ss:$16 sps:$4 sm:$0xff]   ;;  %v6996_v43 = vld [vmem:[#allocation2 + $0x300] ss:$16 sps:$4 sm:$0xff]  }
  0x98   :  { %3736 = vmatprep.subr.bf16.mxu0 %v6918_v44  ;;  %4166 = vmatprep.subr.bf16.mxu1 %v6920_v45  ;;  %v6999_v44 = vld [vmem:[#allocation2 + $0x308] ss:$16 sps:$4 sm:$0xff]   ;;  %v7004_v45 = vld [vmem:[#allocation2 + $0x324] ss:$16 sps:$4 sm:$0xff]  }
  0x9b   :  { %3737 = vmatpush1.bf16.msra.mxu0 %v6922_v48  ;;  %4167 = vmatpush1.bf16.msra.mxu1 %v6923_v49  ;;  %v7005_v48 = vld [vmem:[#allocation2 + $0x328] ss:$16 sps:$4 sm:$0xff]   ;;  %v7010_v49 = vld [vmem:[#allocation2 + $0x344] ss:$16 sps:$4 sm:$0xff]  }
  0x9c   :  { %3738 = vmatprep.subr.bf16.mxu0 %v6924_v51  ;;  %4168 = vmatprep.subr.bf16.mxu1 %v6926_v52  ;;  %v7008_v51 = vld [vmem:[#allocation2 + $0x340] ss:$16 sps:$4 sm:$0xff]   ;;  %v7011_v52 = vld [vmem:[#allocation2 + $0x348] ss:$16 sps:$4 sm:$0xff]  }
  0x9f   :  { %3739 = vmatpush1.bf16.msra.mxu0 %v6928_v53  ;;  %4169 = vmatpush1.bf16.msra.mxu1 %v6929_v54  ;;  %v7016_v53 = vld [vmem:[#allocation2 + $0x364] ss:$16 sps:$4 sm:$0xff]   ;;  %v7019_v54 = vld [vmem:[#allocation2 + $0x36c] ss:$16 sps:$4 sm:$0xff]  }
  0xa0   :  { %3740 = vmatprep.subr.bf16.mxu0 %v6930_v55  ;;  %4170 = vmatprep.subr.bf16.mxu1 %v6932_v56  ;;  %v7014_v55 = vld [vmem:[#allocation2 + $0x360] ss:$16 sps:$4 sm:$0xff]   ;;  %v7017_v56 = vld [vmem:[#allocation2 + $0x368] ss:$16 sps:$4 sm:$0xff]  }
  0xa3   :  { %3741 = vmatpush1.bf16.msra.mxu0 %v6934_v57  ;;  %4171 = vmatpush1.bf16.msra.mxu1 %v6935_v58  ;;  %v7022_v57 = vld [vmem:[#allocation2 + $0x384] ss:$16 sps:$4 sm:$0xff]   ;;  %v7025_v58 = vld [vmem:[#allocation2 + $0x38c] ss:$16 sps:$4 sm:$0xff]  }
  0xa4   :  { %3742 = vmatprep.subr.bf16.mxu0 %v6936_v59  ;;  %4172 = vmatprep.subr.bf16.mxu1 %v6938_v60  ;;  %v7020_v59 = vld [vmem:[#allocation2 + $0x380] ss:$16 sps:$4 sm:$0xff]   ;;  %v7023_v60 = vld [vmem:[#allocation2 + $0x388] ss:$16 sps:$4 sm:$0xff]  }
  0xa7   :  { %3743 = vmatpush1.bf16.msra.mxu0 %v6940_v61  ;;  %4173 = vmatpush1.bf16.msra.mxu1 %v6941_v62  ;;  %v7028_v61 = vld [vmem:[#allocation2 + $0x3a4] ss:$16 sps:$4 sm:$0xff]   ;;  %v7031_v62 = vld [vmem:[#allocation2 + $0x3ac] ss:$16 sps:$4 sm:$0xff]  }
  0xa8   :  { %3744 = vmatprep.subr.bf16.mxu0 %v6942_v63  ;;  %4174 = vmatprep.subr.bf16.mxu1 %v6944_v0  ;;  %v7026_v63 = vld [vmem:[#allocation2 + $0x3a0] ss:$16 sps:$4 sm:$0xff]   ;;  %v7029_v0 = vld [vmem:[#allocation2 + $0x3a8] ss:$16 sps:$4 sm:$0xff]  }
  0xab   :  { %3745 = vmatpush1.bf16.msra.mxu0 %v6946_v1  ;;  %4175 = vmatpush1.bf16.msra.mxu1 %v6947_v2  ;;  %v7034_v1 = vld [vmem:[#allocation2 + $0x3c4] ss:$16 sps:$4 sm:$0xff]   ;;  %v7037_v2 = vld [vmem:[#allocation2 + $0x3cc] ss:$16 sps:$4 sm:$0xff]  }
  0xac   :  { %3757 = vmatprep.subr.bf16.mxu0 %v6950_v3  ;;  %4187 = vmatprep.subr.bf16.mxu1 %v6953_v6  ;;  %v7032_v3 = vld [vmem:[#allocation2 + $0x3c0] ss:$16 sps:$4 sm:$0xff]   ;;  %v7043_v6 = vld [vmem:[#allocation2 + $0x3ec] ss:$16 sps:$4 sm:$0xff]  }
  0xae   :  { %3747 = vmatmul.mubr.bf16.vlgmr.msra.gmra.mrb[0].mxu0 %v141_v9  ;;  %4177 = vmatmul.mubr.bf16.vlgmr.msra.gmra.mrb[0].mxu1 %v141_v9  ;;  %v7046_v9 = vld [vmem:[#allocation2 + $0x404] ss:$16 sps:$4 sm:$0xff]  }
  0xaf   :  { %3758 = vmatpush1.bf16.msra.mxu0 %v6948_v7  ;;  %4188 = vmatpush1.bf16.msra.mxu1 %v6951_v8  ;;  %v7038_v7 = vld [vmem:[#allocation2 + $0x3e0] ss:$16 sps:$4 sm:$0xff]   ;;  %v7041_v8 = vld [vmem:[#allocation2 + $0x3e8] ss:$16 sps:$4 sm:$0xff]  }
  0xb0   :  { %3759 = vmatprep.subr.bf16.mxu0 %v6956_v10  ;;  %4189 = vmatprep.subr.bf16.mxu1 %v6959_v11  ;;  %v105_v10 = vld [vmem:[%s8372_s0 + $0x10] sm:$0xff]  ;;  %v124_v11 = vld [vmem:[%s8372_s0 + $0xa8] sm:$0xff] }
  0xb1   :  { %3789 = vmatprep.mubr.bf16.mxu0 %v144_v36  ;;  %4219 = vmatprep.mubr.bf16.mxu1 %v144_v36  ;;  %v7079_v36 = vld [vmem:[#allocation2 + $0x4ac] ss:$16 sps:$4 sm:$0xff]  }
  0xb3   :  { %3760 = vmatpush1.bf16.msra.mxu0 %v6954_v12  ;;  %4190 = vmatpush1.bf16.msra.mxu1 %v6957_v13  ;;  %v7049_v12 = vld [vmem:[#allocation2 + $0x40c] ss:$16 sps:$4 sm:$0xff]   ;;  %v7044_v13 = vld [vmem:[#allocation2 + $0x400] ss:$16 sps:$4 sm:$0xff]  }
  0xb4   :  { %3761 = vmatprep.subr.bf16.mxu0 %v6962_v14  ;;  %4191 = vmatprep.subr.bf16.mxu1 %v6965_v15  ;;  %v7047_v14 = vld [vmem:[#allocation2 + $0x408] ss:$16 sps:$4 sm:$0xff]   ;;  %v143_v15 = vpack.c.bf16 %v124_v11, %v105_v10  ;;  %v7136_v11 = vld [vmem:[#allocation2 + $0x5e4] ss:$16 sps:$4 sm:$0xff]  }
  0xb5   :  { %v7131_v10 = vld [vmem:[#allocation2 + $0x5c8] ss:$16 sps:$4 sm:$0xff]  }
  0xb7   :  { %3762 = vmatpush1.bf16.msra.mxu0 %v6960_v16  ;;  %4192 = vmatpush1.bf16.msra.mxu1 %v6963_v17  ;;  %v7052_v16 = vld [vmem:[#allocation2 + $0x424] ss:$16 sps:$4 sm:$0xff]   ;;  %v7055_v17 = vld [vmem:[#allocation2 + $0x42c] ss:$16 sps:$4 sm:$0xff]  }
  0xb8   :  { %3763 = vmatprep.subr.bf16.mxu0 %v6968_v18  ;;  %4193 = vmatprep.subr.bf16.mxu1 %v6971_v19  ;;  %v108_v18 = vld [vmem:[%s8372_s0 + $0x28] sm:$0xff]  ;;  %v127_v19 = vld [vmem:[%s8372_s0 + $0xc0] sm:$0xff] }
  0xbb   :  { %3764 = vmatpush1.bf16.msra.mxu0 %v6966_v20  ;;  %4194 = vmatpush1.bf16.msra.mxu1 %v6969_v21  ;;  %v7050_v20 = vld [vmem:[#allocation2 + $0x420] ss:$16 sps:$4 sm:$0xff]   ;;  %v7053_v21 = vld [vmem:[#allocation2 + $0x428] ss:$16 sps:$4 sm:$0xff]  }
  0xbc   :  { %3765 = vmatprep.subr.bf16.mxu0 %v6974_v22  ;;  %4195 = vmatprep.subr.bf16.mxu1 %v6977_v23  ;;  %v146_v22 = vpack.c.bf16 %v127_v19, %v108_v18  ;;  %v7058_v23 = vld [vmem:[#allocation2 + $0x444] ss:$16 sps:$4 sm:$0xff]   ;;  %v7145_v18 = vld [vmem:[#allocation2 + $0x60c] ss:$16 sps:$4 sm:$0xff]   ;;  %v7140_v19 = vld [vmem:[#allocation2 + $0x600] ss:$16 sps:$4 sm:$0xff]  }
  0xbf   :  { %3766 = vmatpush1.bf16.msra.mxu0 %v6972_v24  ;;  %4196 = vmatpush1.bf16.msra.mxu1 %v6975_v25  ;;  %v7061_v24 = vld [vmem:[#allocation2 + $0x44c] ss:$16 sps:$4 sm:$0xff]   ;;  %v7056_v25 = vld [vmem:[#allocation2 + $0x440] ss:$16 sps:$4 sm:$0xff]  }
  0xc0   :  { %3767 = vmatprep.subr.bf16.mxu0 %v6980_v26  ;;  %4197 = vmatprep.subr.bf16.mxu1 %v6983_v27  ;;  %v7059_v26 = vld [vmem:[#allocation2 + $0x448] ss:$16 sps:$4 sm:$0xff]   ;;  %v7064_v27 = vld [vmem:[#allocation2 + $0x464] ss:$16 sps:$4 sm:$0xff]  }
  0xc3   :  { %3768 = vmatpush1.bf16.msra.mxu0 %v6978_v28  ;;  %4198 = vmatpush1.bf16.msra.mxu1 %v6981_v29  ;;  %v7067_v28 = vld [vmem:[#allocation2 + $0x46c] ss:$16 sps:$4 sm:$0xff]   ;;  %v7062_v29 = vld [vmem:[#allocation2 + $0x460] ss:$16 sps:$4 sm:$0xff]  }
  0xc4   :  { %3769 = vmatprep.subr.bf16.mxu0 %v6986_v30  ;;  %4199 = vmatprep.subr.bf16.mxu1 %v6989_v31  ;;  %v7065_v30 = vld [vmem:[#allocation2 + $0x468] ss:$16 sps:$4 sm:$0xff]   ;;  %v7070_v31 = vld [vmem:[#allocation2 + $0x484] ss:$16 sps:$4 sm:$0xff]  }
  0xc7   :  { %3770 = vmatpush1.bf16.msra.mxu0 %v6984_v34  ;;  %4200 = vmatpush1.bf16.msra.mxu1 %v6987_v35  ;;  %v7071_v34 = vld [vmem:[#allocation2 + $0x488] ss:$16 sps:$4 sm:$0xff]   ;;  %v7076_v35 = vld [vmem:[#allocation2 + $0x4a4] ss:$16 sps:$4 sm:$0xff]  }
  0xc8   :  { %3771 = vmatprep.subr.bf16.mxu0 %v6992_v37  ;;  %4201 = vmatprep.subr.bf16.mxu1 %v6995_v38  ;;  %v7074_v37 = vld [vmem:[#allocation2 + $0x4a0] ss:$16 sps:$4 sm:$0xff]   ;;  %v7077_v38 = vld [vmem:[#allocation2 + $0x4a8] ss:$16 sps:$4 sm:$0xff]  }
  0xcb   :  { %3772 = vmatpush1.bf16.msra.mxu0 %v6990_v39  ;;  %4202 = vmatpush1.bf16.msra.mxu1 %v6993_v40  ;;  %v7082_v39 = vld [vmem:[#allocation2 + $0x4c4] ss:$16 sps:$4 sm:$0xff]   ;;  %v7085_v40 = vld [vmem:[#allocation2 + $0x4cc] ss:$16 sps:$4 sm:$0xff]  }
  0xcc   :  { %3773 = vmatprep.subr.bf16.mxu0 %v6998_v41  ;;  %4203 = vmatprep.subr.bf16.mxu1 %v7001_v42  ;;  %v7080_v41 = vld [vmem:[#allocation2 + $0x4c0] ss:$16 sps:$4 sm:$0xff]   ;;  %v7083_v42 = vld [vmem:[#allocation2 + $0x4c8] ss:$16 sps:$4 sm:$0xff]  }
  0xcf   :  { %3774 = vmatpush1.bf16.msra.mxu0 %v6996_v43  ;;  %4204 = vmatpush1.bf16.msra.mxu1 %v6999_v44  ;;  %v7088_v43 = vld [vmem:[#allocation2 + $0x4e4] ss:$16 sps:$4 sm:$0xff]   ;;  %v7091_v44 = vld [vmem:[#allocation2 + $0x4ec] ss:$16 sps:$4 sm:$0xff]  }
  0xd0   :  { %3775 = vmatprep.subr.bf16.mxu0 %v7004_v45  ;;  %4205 = vmatprep.subr.bf16.mxu1 %v7007_v46  ;;  %v7086_v45 = vld [vmem:[#allocation2 + $0x4e0] ss:$16 sps:$4 sm:$0xff]   ;;  %v7089_v46 = vld [vmem:[#allocation2 + $0x4e8] ss:$16 sps:$4 sm:$0xff]  }
  0xd3   :  { %3776 = vmatpush1.bf16.msra.mxu0 %v7002_v47  ;;  %4206 = vmatpush1.bf16.msra.mxu1 %v7005_v48  ;;  %v7094_v47 = vld [vmem:[#allocation2 + $0x504] ss:$16 sps:$4 sm:$0xff]   ;;  %v7097_v48 = vld [vmem:[#allocation2 + $0x50c] ss:$16 sps:$4 sm:$0xff]  }
  0xd4   :  { %3777 = vmatprep.subr.bf16.mxu0 %v7010_v49  ;;  %4207 = vmatprep.subr.bf16.mxu1 %v7013_v50  ;;  %v7092_v49 = vld [vmem:[#allocation2 + $0x500] ss:$16 sps:$4 sm:$0xff]   ;;  %v7095_v50 = vld [vmem:[#allocation2 + $0x508] ss:$16 sps:$4 sm:$0xff]  }
  0xd7   :  { %3778 = vmatpush1.bf16.msra.mxu0 %v7008_v51  ;;  %4208 = vmatpush1.bf16.msra.mxu1 %v7011_v52  ;;  %v7100_v51 = vld [vmem:[#allocation2 + $0x524] ss:$16 sps:$4 sm:$0xff]   ;;  %v7103_v52 = vld [vmem:[#allocation2 + $0x52c] ss:$16 sps:$4 sm:$0xff]  }
  0xd8   :  { %3779 = vmatprep.subr.bf16.mxu0 %v7016_v53  ;;  %4209 = vmatprep.subr.bf16.mxu1 %v7019_v54  ;;  %v7098_v53 = vld [vmem:[#allocation2 + $0x520] ss:$16 sps:$4 sm:$0xff]   ;;  %v7101_v54 = vld [vmem:[#allocation2 + $0x528] ss:$16 sps:$4 sm:$0xff]  }
  0xdb   :  { %3780 = vmatpush1.bf16.msra.mxu0 %v7014_v55  ;;  %4210 = vmatpush1.bf16.msra.mxu1 %v7017_v56  ;;  %v7106_v55 = vld [vmem:[#allocation2 + $0x544] ss:$16 sps:$4 sm:$0xff]   ;;  %v7109_v56 = vld [vmem:[#allocation2 + $0x54c] ss:$16 sps:$4 sm:$0xff]  }
  0xdc   :  { %3781 = vmatprep.subr.bf16.mxu0 %v7022_v57  ;;  %4211 = vmatprep.subr.bf16.mxu1 %v7025_v58  ;;  %v7104_v57 = vld [vmem:[#allocation2 + $0x540] ss:$16 sps:$4 sm:$0xff]   ;;  %v7107_v58 = vld [vmem:[#allocation2 + $0x548] ss:$16 sps:$4 sm:$0xff]  }
  0xdf   :  { %3782 = vmatpush1.bf16.msra.mxu0 %v7020_v59  ;;  %4212 = vmatpush1.bf16.msra.mxu1 %v7023_v60  ;;  %v7112_v59 = vld [vmem:[#allocation2 + $0x564] ss:$16 sps:$4 sm:$0xff]   ;;  %v7115_v60 = vld [vmem:[#allocation2 + $0x56c] ss:$16 sps:$4 sm:$0xff]  }
  0xe0   :  { %3783 = vmatprep.subr.bf16.mxu0 %v7028_v61  ;;  %4213 = vmatprep.subr.bf16.mxu1 %v7031_v62  ;;  %v7110_v61 = vld [vmem:[#allocation2 + $0x560] ss:$16 sps:$4 sm:$0xff]   ;;  %v7113_v62 = vld [vmem:[#allocation2 + $0x568] ss:$16 sps:$4 sm:$0xff]  }
  0xe3   :  { %3784 = vmatpush1.bf16.msra.mxu0 %v7026_v63  ;;  %4214 = vmatpush1.bf16.msra.mxu1 %v7029_v0  ;;  %v7118_v63 = vld [vmem:[#allocation2 + $0x584] ss:$16 sps:$4 sm:$0xff]   ;;  %v7121_v0 = vld [vmem:[#allocation2 + $0x58c] ss:$16 sps:$4 sm:$0xff]  }
  0xe4   :  { %3785 = vmatprep.subr.bf16.mxu0 %v7034_v1  ;;  %4215 = vmatprep.subr.bf16.mxu1 %v7037_v2  ;;  %v7116_v1 = vld [vmem:[#allocation2 + $0x580] ss:$16 sps:$4 sm:$0xff]   ;;  %v7119_v2 = vld [vmem:[#allocation2 + $0x588] ss:$16 sps:$4 sm:$0xff]  }
  0xe7   :  { %3786 = vmatpush1.bf16.msra.mxu0 %v7032_v3  ;;  %4216 = vmatpush1.bf16.msra.mxu1 %v7035_v4  ;;  %v7124_v3 = vld [vmem:[#allocation2 + $0x5a4] ss:$16 sps:$4 sm:$0xff]   ;;  %v7127_v4 = vld [vmem:[#allocation2 + $0x5ac] ss:$16 sps:$4 sm:$0xff]  }
  0xe8   :  { %3787 = vmatprep.subr.bf16.mxu0 %v7040_v5  ;;  %4217 = vmatprep.subr.bf16.mxu1 %v7043_v6  ;;  %v7122_v5 = vld [vmem:[#allocation2 + $0x5a0] ss:$16 sps:$4 sm:$0xff]   ;;  %v7125_v6 = vld [vmem:[#allocation2 + $0x5a8] ss:$16 sps:$4 sm:$0xff]  }
  0xeb   :  { %3788 = vmatpush1.bf16.msra.mxu0 %v7038_v7  ;;  %4218 = vmatpush1.bf16.msra.mxu1 %v7041_v8  ;;  %v7130_v7 = vld [vmem:[#allocation2 + $0x5c4] ss:$16 sps:$4 sm:$0xff]   ;;  %v7133_v8 = vld [vmem:[#allocation2 + $0x5cc] ss:$16 sps:$4 sm:$0xff]  }
  0xec   :  { %3800 = vmatprep.subr.bf16.mxu0 %v7046_v9  ;;  %4230 = vmatprep.subr.bf16.mxu1 %v7049_v12  ;;  %v7128_v9 = vld [vmem:[#allocation2 + $0x5c0] ss:$16 sps:$4 sm:$0xff]   ;;  %v7139_v12 = vld [vmem:[#allocation2 + $0x5ec] ss:$16 sps:$4 sm:$0xff]  }
  0xee   :  { %3790 = vmatmul.mubr.bf16.vlgmr.msra.gmra.mrb[0].mxu0 %v143_v15  ;;  %4220 = vmatmul.mubr.bf16.vlgmr.msra.gmra.mrb[0].mxu1 %v143_v15  ;;  %v7142_v15 = vld [vmem:[#allocation2 + $0x604] ss:$16 sps:$4 sm:$0xff]  }
  0xef   :  { %3801 = vmatpush1.bf16.msra.mxu0 %v7044_v13  ;;  %4231 = vmatpush1.bf16.msra.mxu1 %v7047_v14  ;;  %v7134_v13 = vld [vmem:[#allocation2 + $0x5e0] ss:$16 sps:$4 sm:$0xff]   ;;  %v7137_v14 = vld [vmem:[#allocation2 + $0x5e8] ss:$16 sps:$4 sm:$0xff]  }
  0xf0   :  { %3802 = vmatprep.subr.bf16.mxu0 %v7052_v16  ;;  %4232 = vmatprep.subr.bf16.mxu1 %v7055_v17  ;;  %v107_v16 = vld [vmem:[%s8372_s0 + $0x20] sm:$0xff]  ;;  %v126_v17 = vld [vmem:[%s8372_s0 + $0xb8] sm:$0xff] }
  0xf1   :  { %3832 = vmatprep.mubr.bf16.mxu0 %v146_v22  ;;  %4262 = vmatprep.mubr.bf16.mxu1 %v146_v22  ;;  %v110_v22 = vld [vmem:[%s8372_s0 + $0x38] sm:$0xff] }
  0xf3   :  { %3803 = vmatpush1.bf16.msra.mxu0 %v7050_v20  ;;  %4233 = vmatpush1.bf16.msra.mxu1 %v7053_v21  ;;  %v7143_v20 = vld [vmem:[#allocation2 + $0x608] ss:$16 sps:$4 sm:$0xff]   ;;  %v145_v21 = vpack.c.bf16 %v126_v17, %v107_v16  ;;  %v7232_v17 = vld [vmem:[#allocation2 + $0x7e4] ss:$16 sps:$4 sm:$0xff]  }
  0xf4   :  { %3804 = vmatprep.subr.bf16.mxu0 %v7058_v23  ;;  %4234 = vmatprep.subr.bf16.mxu1 %v7061_v24  ;;  %v129_v23 = vld [vmem:[%s8372_s0 + $0xd0] sm:$0xff]  ;;  %v7227_v16 = vld [vmem:[#allocation2 + $0x7c8] ss:$16 sps:$4 sm:$0xff]  }
  0xf5   :  { %v7148_v24 = vld [vmem:[#allocation2 + $0x624] ss:$16 sps:$4 sm:$0xff]  }
  0xf7   :  { %3805 = vmatpush1.bf16.msra.mxu0 %v7056_v25  ;;  %4235 = vmatpush1.bf16.msra.mxu1 %v7059_v26  ;;  %v7151_v25 = vld [vmem:[#allocation2 + $0x62c] ss:$16 sps:$4 sm:$0xff]   ;;  %v148_v26 = vpack.c.bf16 %v129_v23, %v110_v22  ;;  %v109_v22 = vld [vmem:[%s8372_s0 + $0x30] sm:$0xff] }
  0xf8   :  { %3806 = vmatprep.subr.bf16.mxu0 %v7064_v27  ;;  %4236 = vmatprep.subr.bf16.mxu1 %v7067_v28  ;;  %v7146_v27 = vld [vmem:[#allocation2 + $0x620] ss:$16 sps:$4 sm:$0xff]   ;;  %v7149_v28 = vld [vmem:[#allocation2 + $0x628] ss:$16 sps:$4 sm:$0xff]  }
  0xf9   :  { %v128_v23 = vld [vmem:[%s8372_s0 + $0xc8] sm:$0xff] }
  0xfb   :  { %3807 = vmatpush1.bf16.msra.mxu0 %v7062_v29  ;;  %4237 = vmatpush1.bf16.msra.mxu1 %v7065_v30  ;;  %v7154_v29 = vld [vmem:[#allocation2 + $0x644] ss:$16 sps:$4 sm:$0xff]   ;;  %v7157_v30 = vld [vmem:[#allocation2 + $0x64c] ss:$16 sps:$4 sm:$0xff]  }
  0xfc   :  { %3808 = vmatprep.subr.bf16.mxu0 %v7070_v31  ;;  %4238 = vmatprep.subr.bf16.mxu1 %v7073_v32  ;;  %v7152_v31 = vld [vmem:[#allocation2 + $0x640] ss:$16 sps:$4 sm:$0xff]   ;;  %v7155_v32 = vld [vmem:[#allocation2 + $0x648] ss:$16 sps:$4 sm:$0xff]  }
  0xff   :  { %3809 = vmatpush1.bf16.msra.mxu0 %v7068_v33  ;;  %4239 = vmatpush1.bf16.msra.mxu1 %v7071_v34  ;;  %v7160_v33 = vld [vmem:[#allocation2 + $0x664] ss:$16 sps:$4 sm:$0xff]   ;;  %v7163_v34 = vld [vmem:[#allocation2 + $0x66c] ss:$16 sps:$4 sm:$0xff]  }
 0x100   :  { %3810 = vmatprep.subr.bf16.mxu0 %v7076_v35  ;;  %4240 = vmatprep.subr.bf16.mxu1 %v7079_v36  ;;  %v7158_v35 = vld [vmem:[#allocation2 + $0x660] ss:$16 sps:$4 sm:$0xff]   ;;  %v7161_v36 = vld [vmem:[#allocation2 + $0x668] ss:$16 sps:$4 sm:$0xff]  }
 0x103   :  { %3811 = vmatpush1.bf16.msra.mxu0 %v7074_v37  ;;  %4241 = vmatpush1.bf16.msra.mxu1 %v7077_v38  ;;  %v7166_v37 = vld [vmem:[#allocation2 + $0x684] ss:$16 sps:$4 sm:$0xff]   ;;  %v7169_v38 = vld [vmem:[#allocation2 + $0x68c] ss:$16 sps:$4 sm:$0xff]  }
 0x104   :  { %3812 = vmatprep.subr.bf16.mxu0 %v7082_v39  ;;  %4242 = vmatprep.subr.bf16.mxu1 %v7085_v40  ;;  %v7164_v39 = vld [vmem:[#allocation2 + $0x680] ss:$16 sps:$4 sm:$0xff]   ;;  %v7167_v40 = vld [vmem:[#allocation2 + $0x688] ss:$16 sps:$4 sm:$0xff]  }
 0x107   :  { %3813 = vmatpush1.bf16.msra.mxu0 %v7080_v41  ;;  %4243 = vmatpush1.bf16.msra.mxu1 %v7083_v42  ;;  %v7172_v41 = vld [vmem:[#allocation2 + $0x6a4] ss:$16 sps:$4 sm:$0xff]   ;;  %v7175_v42 = vld [vmem:[#allocation2 + $0x6ac] ss:$16 sps:$4 sm:$0xff]  }
 0x108   :  { %3814 = vmatprep.subr.bf16.mxu0 %v7088_v43  ;;  %4244 = vmatprep.subr.bf16.mxu1 %v7091_v44  ;;  %v7170_v43 = vld [vmem:[#allocation2 + $0x6a0] ss:$16 sps:$4 sm:$0xff]   ;;  %v7173_v44 = vld [vmem:[#allocation2 + $0x6a8] ss:$16 sps:$4 sm:$0xff]  }
 0x10b   :  { %3815 = vmatpush1.bf16.msra.mxu0 %v7086_v45  ;;  %4245 = vmatpush1.bf16.msra.mxu1 %v7089_v46  ;;  %v7178_v45 = vld [vmem:[#allocation2 + $0x6c4] ss:$16 sps:$4 sm:$0xff]   ;;  %v7181_v46 = vld [vmem:[#allocation2 + $0x6cc] ss:$16 sps:$4 sm:$0xff]  }
 0x10c   :  { %3816 = vmatprep.subr.bf16.mxu0 %v7094_v47  ;;  %4246 = vmatprep.subr.bf16.mxu1 %v7097_v48  ;;  %v7176_v47 = vld [vmem:[#allocation2 + $0x6c0] ss:$16 sps:$4 sm:$0xff]   ;;  %v7179_v48 = vld [vmem:[#allocation2 + $0x6c8] ss:$16 sps:$4 sm:$0xff]  }
 0x10f   :  { %3817 = vmatpush1.bf16.msra.mxu0 %v7092_v49  ;;  %4247 = vmatpush1.bf16.msra.mxu1 %v7095_v50  ;;  %v7184_v49 = vld [vmem:[#allocation2 + $0x6e4] ss:$16 sps:$4 sm:$0xff]   ;;  %v7187_v50 = vld [vmem:[#allocation2 + $0x6ec] ss:$16 sps:$4 sm:$0xff]  }
 0x110   :  { %3818 = vmatprep.subr.bf16.mxu0 %v7100_v51  ;;  %4248 = vmatprep.subr.bf16.mxu1 %v7103_v52  ;;  %v7182_v51 = vld [vmem:[#allocation2 + $0x6e0] ss:$16 sps:$4 sm:$0xff]   ;;  %v7185_v52 = vld [vmem:[#allocation2 + $0x6e8] ss:$16 sps:$4 sm:$0xff]  }
 0x113   :  { %3819 = vmatpush1.bf16.msra.mxu0 %v7098_v53  ;;  %4249 = vmatpush1.bf16.msra.mxu1 %v7101_v54  ;;  %v7190_v53 = vld [vmem:[#allocation2 + $0x704] ss:$16 sps:$4 sm:$0xff]   ;;  %v7193_v54 = vld [vmem:[#allocation2 + $0x70c] ss:$16 sps:$4 sm:$0xff]  }
 0x114   :  { %3820 = vmatprep.subr.bf16.mxu0 %v7106_v55  ;;  %4250 = vmatprep.subr.bf16.mxu1 %v7109_v56  ;;  %v7188_v55 = vld [vmem:[#allocation2 + $0x700] ss:$16 sps:$4 sm:$0xff]   ;;  %v7191_v56 = vld [vmem:[#allocation2 + $0x708] ss:$16 sps:$4 sm:$0xff]  }
 0x117   :  { %3821 = vmatpush1.bf16.msra.mxu0 %v7104_v57  ;;  %4251 = vmatpush1.bf16.msra.mxu1 %v7107_v58  ;;  %v7196_v57 = vld [vmem:[#allocation2 + $0x724] ss:$16 sps:$4 sm:$0xff]   ;;  %v7199_v58 = vld [vmem:[#allocation2 + $0x72c] ss:$16 sps:$4 sm:$0xff]  }
 0x118   :  { %3822 = vmatprep.subr.bf16.mxu0 %v7112_v59  ;;  %4252 = vmatprep.subr.bf16.mxu1 %v7115_v60  ;;  %v7194_v59 = vld [vmem:[#allocation2 + $0x720] ss:$16 sps:$4 sm:$0xff]   ;;  %v7197_v60 = vld [vmem:[#allocation2 + $0x728] ss:$16 sps:$4 sm:$0xff]  }
 0x11b   :  { %3823 = vmatpush1.bf16.msra.mxu0 %v7110_v61  ;;  %4253 = vmatpush1.bf16.msra.mxu1 %v7113_v62  ;;  %v7202_v61 = vld [vmem:[#allocation2 + $0x744] ss:$16 sps:$4 sm:$0xff]   ;;  %v7205_v62 = vld [vmem:[#allocation2 + $0x74c] ss:$16 sps:$4 sm:$0xff]  }
 0x11c   :  { %3824 = vmatprep.subr.bf16.mxu0 %v7118_v63  ;;  %4254 = vmatprep.subr.bf16.mxu1 %v7121_v0  ;;  %v7200_v63 = vld [vmem:[#allocation2 + $0x740] ss:$16 sps:$4 sm:$0xff]   ;;  %v7203_v0 = vld [vmem:[#allocation2 + $0x748] ss:$16 sps:$4 sm:$0xff]  }
 0x11f   :  { %3825 = vmatpush1.bf16.msra.mxu0 %v7116_v1  ;;  %4255 = vmatpush1.bf16.msra.mxu1 %v7119_v2  ;;  %v7208_v1 = vld [vmem:[#allocation2 + $0x764] ss:$16 sps:$4 sm:$0xff]   ;;  %v7211_v2 = vld [vmem:[#allocation2 + $0x76c] ss:$16 sps:$4 sm:$0xff]  }
 0x120   :  { %3826 = vmatprep.subr.bf16.mxu0 %v7124_v3  ;;  %4256 = vmatprep.subr.bf16.mxu1 %v7127_v4  ;;  %v7206_v3 = vld [vmem:[#allocation2 + $0x760] ss:$16 sps:$4 sm:$0xff]   ;;  %v7209_v4 = vld [vmem:[#allocation2 + $0x768] ss:$16 sps:$4 sm:$0xff]  }
 0x123   :  { %3827 = vmatpush1.bf16.msra.mxu0 %v7122_v5  ;;  %4257 = vmatpush1.bf16.msra.mxu1 %v7125_v6  ;;  %v7214_v5 = vld [vmem:[#allocation2 + $0x784] ss:$16 sps:$4 sm:$0xff]   ;;  %v7217_v6 = vld [vmem:[#allocation2 + $0x78c] ss:$16 sps:$4 sm:$0xff]  }
 0x124   :  { %3828 = vmatprep.subr.bf16.mxu0 %v7130_v7  ;;  %4258 = vmatprep.subr.bf16.mxu1 %v7133_v8  ;;  %v7212_v7 = vld [vmem:[#allocation2 + $0x780] ss:$16 sps:$4 sm:$0xff]   ;;  %v7215_v8 = vld [vmem:[#allocation2 + $0x788] ss:$16 sps:$4 sm:$0xff]  }
 0x127   :  { %3829 = vmatpush1.bf16.msra.mxu0 %v7128_v9  ;;  %4259 = vmatpush1.bf16.msra.mxu1 %v7131_v10  ;;  %v7220_v9 = vld [vmem:[#allocation2 + $0x7a4] ss:$16 sps:$4 sm:$0xff]   ;;  %v7223_v10 = vld [vmem:[#allocation2 + $0x7ac] ss:$16 sps:$4 sm:$0xff]  }
 0x128   :  { %3830 = vmatprep.subr.bf16.mxu0 %v7136_v11  ;;  %4260 = vmatprep.subr.bf16.mxu1 %v7139_v12  ;;  %v7218_v11 = vld [vmem:[#allocation2 + $0x7a0] ss:$16 sps:$4 sm:$0xff]   ;;  %v7221_v12 = vld [vmem:[#allocation2 + $0x7a8] ss:$16 sps:$4 sm:$0xff]  }
 0x12b   :  { %3831 = vmatpush1.bf16.msra.mxu0 %v7134_v13  ;;  %4261 = vmatpush1.bf16.msra.mxu1 %v7137_v14  ;;  %v7226_v13 = vld [vmem:[#allocation2 + $0x7c4] ss:$16 sps:$4 sm:$0xff]   ;;  %v7229_v14 = vld [vmem:[#allocation2 + $0x7cc] ss:$16 sps:$4 sm:$0xff]  }
 0x12c   :  { %3843 = vmatprep.subr.bf16.mxu0 %v7142_v15  ;;  %4273 = vmatprep.subr.bf16.mxu1 %v7145_v18  ;;  %v7224_v15 = vld [vmem:[#allocation2 + $0x7c0] ss:$16 sps:$4 sm:$0xff]   ;;  %v7235_v18 = vld [vmem:[#allocation2 + $0x7ec] ss:$16 sps:$4 sm:$0xff]  }
 0x12e   :  { %3833 = vmatmul.mubr.bf16.vlgmr.msra.gmra.mrb[0].mxu0 %v145_v21  ;;  %4263 = vmatmul.mubr.bf16.vlgmr.msra.gmra.mrb[0].mxu1 %v145_v21  ;;  %v7238_v21 = vld [vmem:[#allocation2 + $0x804] ss:$16 sps:$4 sm:$0xff]  }
 0x12f   :  { %3844 = vmatpush1.bf16.msra.mxu0 %v7140_v19  ;;  %4274 = vmatpush1.bf16.msra.mxu1 %v7143_v20  ;;  %v7230_v19 = vld [vmem:[#allocation2 + $0x7e0] ss:$16 sps:$4 sm:$0xff]   ;;  %v7233_v20 = vld [vmem:[#allocation2 + $0x7e8] ss:$16 sps:$4 sm:$0xff]  }
 0x130   :  { %3845 = vmatprep.subr.bf16.mxu0 %v7148_v24  ;;  %4275 = vmatprep.subr.bf16.mxu1 %v7151_v25  ;;  %v7241_v24 = vld [vmem:[#allocation2 + $0x80c] ss:$16 sps:$4 sm:$0xff]   ;;  %v7236_v25 = vld [vmem:[#allocation2 + $0x800] ss:$16 sps:$4 sm:$0xff]  }
 0x131   :  { %3875 = vmatprep.mubr.bf16.mxu0 %v148_v26  ;;  %4305 = vmatprep.mubr.bf16.mxu1 %v148_v26  ;;  %v7239_v26 = vld [vmem:[#allocation2 + $0x808] ss:$16 sps:$4 sm:$0xff]  }
 0x133   :  { %3846 = vmatpush1.bf16.msra.mxu0 %v7146_v27  ;;  %4276 = vmatpush1.bf16.msra.mxu1 %v7149_v28  ;;  %v147_v27 = vpack.c.bf16 %v128_v23, %v109_v22  ;;  %v112_v28 = vld [vmem:[%s8372_s0 + $0x48] sm:$0xff]  ;;  %v7328_v23 = vld [vmem:[#allocation2 + $0x9e4] ss:$16 sps:$4 sm:$0xff]  }
 0x134   :  { %3847 = vmatprep.subr.bf16.mxu0 %v7154_v29  ;;  %4277 = vmatprep.subr.bf16.mxu1 %v7157_v30  ;;  %v131_v29 = vld [vmem:[%s8372_s0 + $0xe0] sm:$0xff]  ;;  %v7323_v22 = vld [vmem:[#allocation2 + $0x9c8] ss:$16 sps:$4 sm:$0xff]  }
 0x135   :  { %v7244_v30 = vld [vmem:[#allocation2 + $0x824] ss:$16 sps:$4 sm:$0xff]  }
 0x137   :  { %3848 = vmatpush1.bf16.msra.mxu0 %v7152_v31  ;;  %4278 = vmatpush1.bf16.msra.mxu1 %v7155_v32  ;;  %v7247_v31 = vld [vmem:[#allocation2 + $0x82c] ss:$16 sps:$4 sm:$0xff]   ;;  %v150_v32 = vpack.c.bf16 %v131_v29, %v112_v28  ;;  %v111_v29 = vld [vmem:[%s8372_s0 + $0x40] sm:$0xff] }
 0x138   :  { %3849 = vmatprep.subr.bf16.mxu0 %v7160_v33  ;;  %4279 = vmatprep.subr.bf16.mxu1 %v7163_v34  ;;  %v7242_v33 = vld [vmem:[#allocation2 + $0x820] ss:$16 sps:$4 sm:$0xff]   ;;  %v7245_v34 = vld [vmem:[#allocation2 + $0x828] ss:$16 sps:$4 sm:$0xff]   ;;  %v7337_v28 = vld [vmem:[#allocation2 + $0xa0c] ss:$16 sps:$4 sm:$0xff]  }
 0x13b   :  { %3850 = vmatpush1.bf16.msra.mxu0 %v7158_v35  ;;  %4280 = vmatpush1.bf16.msra.mxu1 %v7161_v36  ;;  %v7250_v35 = vld [vmem:[#allocation2 + $0x844] ss:$16 sps:$4 sm:$0xff]   ;;  %v7253_v36 = vld [vmem:[#allocation2 + $0x84c] ss:$16 sps:$4 sm:$0xff]  }
 0x13c   :  { %3851 = vmatprep.subr.bf16.mxu0 %v7166_v37  ;;  %4281 = vmatprep.subr.bf16.mxu1 %v7169_v38  ;;  %v7248_v37 = vld [vmem:[#allocation2 + $0x840] ss:$16 sps:$4 sm:$0xff]   ;;  %v7251_v38 = vld [vmem:[#allocation2 + $0x848] ss:$16 sps:$4 sm:$0xff]  }
 0x13f   :  { %3852 = vmatpush1.bf16.msra.mxu0 %v7164_v39  ;;  %4282 = vmatpush1.bf16.msra.mxu1 %v7167_v40  ;;  %v7256_v39 = vld [vmem:[#allocation2 + $0x864] ss:$16 sps:$4 sm:$0xff]   ;;  %v7259_v40 = vld [vmem:[#allocation2 + $0x86c] ss:$16 sps:$4 sm:$0xff]  }
 0x140   :  { %3853 = vmatprep.subr.bf16.mxu0 %v7172_v41  ;;  %4283 = vmatprep.subr.bf16.mxu1 %v7175_v42  ;;  %v7254_v41 = vld [vmem:[#allocation2 + $0x860] ss:$16 sps:$4 sm:$0xff]   ;;  %v7257_v42 = vld [vmem:[#allocation2 + $0x868] ss:$16 sps:$4 sm:$0xff]  }
 0x143   :  { %3854 = vmatpush1.bf16.msra.mxu0 %v7170_v43  ;;  %4284 = vmatpush1.bf16.msra.mxu1 %v7173_v44  ;;  %v7262_v43 = vld [vmem:[#allocation2 + $0x884] ss:$16 sps:$4 sm:$0xff]   ;;  %v7265_v44 = vld [vmem:[#allocation2 + $0x88c] ss:$16 sps:$4 sm:$0xff]  }
 0x144   :  { %3855 = vmatprep.subr.bf16.mxu0 %v7178_v45  ;;  %4285 = vmatprep.subr.bf16.mxu1 %v7181_v46  ;;  %v7260_v45 = vld [vmem:[#allocation2 + $0x880] ss:$16 sps:$4 sm:$0xff]   ;;  %v7263_v46 = vld [vmem:[#allocation2 + $0x888] ss:$16 sps:$4 sm:$0xff]  }
 0x147   :  { %3856 = vmatpush1.bf16.msra.mxu0 %v7176_v47  ;;  %4286 = vmatpush1.bf16.msra.mxu1 %v7179_v48  ;;  %v7268_v47 = vld [vmem:[#allocation2 + $0x8a4] ss:$16 sps:$4 sm:$0xff]   ;;  %v7271_v48 = vld [vmem:[#allocation2 + $0x8ac] ss:$16 sps:$4 sm:$0xff]  }
 0x148   :  { %3857 = vmatprep.subr.bf16.mxu0 %v7184_v49  ;;  %4287 = vmatprep.subr.bf16.mxu1 %v7187_v50  ;;  %v7266_v49 = vld [vmem:[#allocation2 + $0x8a0] ss:$16 sps:$4 sm:$0xff]   ;;  %v7269_v50 = vld [vmem:[#allocation2 + $0x8a8] ss:$16 sps:$4 sm:$0xff]  }
 0x14b   :  { %3858 = vmatpush1.bf16.msra.mxu0 %v7182_v51  ;;  %4288 = vmatpush1.bf16.msra.mxu1 %v7185_v52  ;;  %v7274_v51 = vld [vmem:[#allocation2 + $0x8c4] ss:$16 sps:$4 sm:$0xff]   ;;  %v7277_v52 = vld [vmem:[#allocation2 + $0x8cc] ss:$16 sps:$4 sm:$0xff]  }
 0x14c   :  { %3859 = vmatprep.subr.bf16.mxu0 %v7190_v53  ;;  %4289 = vmatprep.subr.bf16.mxu1 %v7193_v54  ;;  %v7272_v53 = vld [vmem:[#allocation2 + $0x8c0] ss:$16 sps:$4 sm:$0xff]   ;;  %v7275_v54 = vld [vmem:[#allocation2 + $0x8c8] ss:$16 sps:$4 sm:$0xff]  }
 0x14f   :  { %3860 = vmatpush1.bf16.msra.mxu0 %v7188_v55  ;;  %4290 = vmatpush1.bf16.msra.mxu1 %v7191_v56  ;;  %v7280_v55 = vld [vmem:[#allocation2 + $0x8e4] ss:$16 sps:$4 sm:$0xff]   ;;  %v7283_v56 = vld [vmem:[#allocation2 + $0x8ec] ss:$16 sps:$4 sm:$0xff]  }
 0x150   :  { %3861 = vmatprep.subr.bf16.mxu0 %v7196_v57  ;;  %4291 = vmatprep.subr.bf16.mxu1 %v7199_v58  ;;  %v7278_v57 = vld [vmem:[#allocation2 + $0x8e0] ss:$16 sps:$4 sm:$0xff]   ;;  %v7281_v58 = vld [vmem:[#allocation2 + $0x8e8] ss:$16 sps:$4 sm:$0xff]  }
 0x153   :  { %3862 = vmatpush1.bf16.msra.mxu0 %v7194_v59  ;;  %4292 = vmatpush1.bf16.msra.mxu1 %v7197_v60  ;;  %v7286_v59 = vld [vmem:[#allocation2 + $0x904] ss:$16 sps:$4 sm:$0xff]   ;;  %v7289_v60 = vld [vmem:[#allocation2 + $0x90c] ss:$16 sps:$4 sm:$0xff]  }
 0x154   :  { %3863 = vmatprep.subr.bf16.mxu0 %v7202_v61  ;;  %4293 = vmatprep.subr.bf16.mxu1 %v7205_v62  ;;  %v7284_v61 = vld [vmem:[#allocation2 + $0x900] ss:$16 sps:$4 sm:$0xff]   ;;  %v7287_v62 = vld [vmem:[#allocation2 + $0x908] ss:$16 sps:$4 sm:$0xff]  }
 0x157   :  { %3864 = vmatpush1.bf16.msra.mxu0 %v7200_v63  ;;  %4294 = vmatpush1.bf16.msra.mxu1 %v7203_v0  ;;  %v7292_v63 = vld [vmem:[#allocation2 + $0x924] ss:$16 sps:$4 sm:$0xff]   ;;  %v7295_v0 = vld [vmem:[#allocation2 + $0x92c] ss:$16 sps:$4 sm:$0xff]  }
 0x158   :  { %3865 = vmatprep.subr.bf16.mxu0 %v7208_v1  ;;  %4295 = vmatprep.subr.bf16.mxu1 %v7211_v2  ;;  %v7290_v1 = vld [vmem:[#allocation2 + $0x920] ss:$16 sps:$4 sm:$0xff]   ;;  %v7293_v2 = vld [vmem:[#allocation2 + $0x928] ss:$16 sps:$4 sm:$0xff]  }
 0x15b   :  { %3866 = vmatpush1.bf16.msra.mxu0 %v7206_v3  ;;  %4296 = vmatpush1.bf16.msra.mxu1 %v7209_v4  ;;  %v7298_v3 = vld [vmem:[#allocation2 + $0x944] ss:$16 sps:$4 sm:$0xff]   ;;  %v7301_v4 = vld [vmem:[#allocation2 + $0x94c] ss:$16 sps:$4 sm:$0xff]  }
 0x15c   :  { %3867 = vmatprep.subr.bf16.mxu0 %v7214_v5  ;;  %4297 = vmatprep.subr.bf16.mxu1 %v7217_v6  ;;  %v7296_v5 = vld [vmem:[#allocation2 + $0x940] ss:$16 sps:$4 sm:$0xff]   ;;  %v7299_v6 = vld [vmem:[#allocation2 + $0x948] ss:$16 sps:$4 sm:$0xff]  }
 0x15f   :  { %3868 = vmatpush1.bf16.msra.mxu0 %v7212_v7  ;;  %4298 = vmatpush1.bf16.msra.mxu1 %v7215_v8  ;;  %v7304_v7 = vld [vmem:[#allocation2 + $0x964] ss:$16 sps:$4 sm:$0xff]   ;;  %v7307_v8 = vld [vmem:[#allocation2 + $0x96c] ss:$16 sps:$4 sm:$0xff]  }
 0x160   :  { %3869 = vmatprep.subr.bf16.mxu0 %v7220_v9  ;;  %4299 = vmatprep.subr.bf16.mxu1 %v7223_v10  ;;  %v7302_v9 = vld [vmem:[#allocation2 + $0x960] ss:$16 sps:$4 sm:$0xff]   ;;  %v7305_v10 = vld [vmem:[#allocation2 + $0x968] ss:$16 sps:$4 sm:$0xff]  }
 0x163   :  { %3870 = vmatpush1.bf16.msra.mxu0 %v7218_v11  ;;  %4300 = vmatpush1.bf16.msra.mxu1 %v7221_v12  ;;  %v7310_v11 = vld [vmem:[#allocation2 + $0x984] ss:$16 sps:$4 sm:$0xff]   ;;  %v7313_v12 = vld [vmem:[#allocation2 + $0x98c] ss:$16 sps:$4 sm:$0xff]  }
 0x164   :  { %3871 = vmatprep.subr.bf16.mxu0 %v7226_v13  ;;  %4301 = vmatprep.subr.bf16.mxu1 %v7229_v14  ;;  %v7308_v13 = vld [vmem:[#allocation2 + $0x980] ss:$16 sps:$4 sm:$0xff]   ;;  %v7311_v14 = vld [vmem:[#allocation2 + $0x988] ss:$16 sps:$4 sm:$0xff]  }
 0x167   :  { %3872 = vmatpush1.bf16.msra.mxu0 %v7224_v15  ;;  %4302 = vmatpush1.bf16.msra.mxu1 %v7227_v16  ;;  %v7316_v15 = vld [vmem:[#allocation2 + $0x9a4] ss:$16 sps:$4 sm:$0xff]   ;;  %v7319_v16 = vld [vmem:[#allocation2 + $0x9ac] ss:$16 sps:$4 sm:$0xff]  }
 0x168   :  { %3873 = vmatprep.subr.bf16.mxu0 %v7232_v17  ;;  %4303 = vmatprep.subr.bf16.mxu1 %v7235_v18  ;;  %v7314_v17 = vld [vmem:[#allocation2 + $0x9a0] ss:$16 sps:$4 sm:$0xff]   ;;  %v7317_v18 = vld [vmem:[#allocation2 + $0x9a8] ss:$16 sps:$4 sm:$0xff]  }
 0x16b   :  { %3874 = vmatpush1.bf16.msra.mxu0 %v7230_v19  ;;  %4304 = vmatpush1.bf16.msra.mxu1 %v7233_v20  ;;  %v7322_v19 = vld [vmem:[#allocation2 + $0x9c4] ss:$16 sps:$4 sm:$0xff]   ;;  %v7325_v20 = vld [vmem:[#allocation2 + $0x9cc] ss:$16 sps:$4 sm:$0xff]  }
 0x16c   :  { %3886 = vmatprep.subr.bf16.mxu0 %v7238_v21  ;;  %4316 = vmatprep.subr.bf16.mxu1 %v7241_v24  ;;  %v7320_v21 = vld [vmem:[#allocation2 + $0x9c0] ss:$16 sps:$4 sm:$0xff]   ;;  %v7331_v24 = vld [vmem:[#allocation2 + $0x9ec] ss:$16 sps:$4 sm:$0xff]  }
 0x16e   :  { %3876 = vmatmul.mubr.bf16.vlgmr.msra.gmra.mrb[0].mxu0 %v147_v27  ;;  %4306 = vmatmul.mubr.bf16.vlgmr.msra.gmra.mrb[0].mxu1 %v147_v27  ;;  %v7334_v27 = vld [vmem:[#allocation2 + $0xa04] ss:$16 sps:$4 sm:$0xff]  }
 0x16f   :  { %3887 = vmatpush1.bf16.msra.mxu0 %v7236_v25  ;;  %4317 = vmatpush1.bf16.msra.mxu1 %v7239_v26  ;;  %v7326_v25 = vld [vmem:[#allocation2 + $0x9e0] ss:$16 sps:$4 sm:$0xff]   ;;  %v7329_v26 = vld [vmem:[#allocation2 + $0x9e8] ss:$16 sps:$4 sm:$0xff]  }
 0x170   :  { %3888 = vmatprep.subr.bf16.mxu0 %v7244_v30  ;;  %4318 = vmatprep.subr.bf16.mxu1 %v7247_v31  ;;  %v130_v30 = vld [vmem:[%s8372_s0 + $0xd8] sm:$0xff] }
 0x171   :  { %3918 = vmatprep.mubr.bf16.mxu0 %v150_v32  ;;  %4348 = vmatprep.mubr.bf16.mxu1 %v150_v32  ;;  %v114_v31 = vld [vmem:[%s8372_s0 + $0x58] sm:$0xff]  ;;  %v133_v32 = vld [vmem:[%s8372_s0 + $0xf0] sm:$0xff] }
 0x173   :  { %3889 = vmatpush1.bf16.msra.mxu0 %v7242_v33  ;;  %4319 = vmatpush1.bf16.msra.mxu1 %v7245_v34  ;;  %v149_v33 = vpack.c.bf16 %v130_v30, %v111_v29  ;;  %v7332_v34 = vld [vmem:[#allocation2 + $0xa00] ss:$16 sps:$4 sm:$0xff]   ;;  %v7424_v29 = vld [vmem:[#allocation2 + $0xbe4] ss:$16 sps:$4 sm:$0xff]   ;;  %v7427_v30 = vld [vmem:[#allocation2 + $0xbec] ss:$16 sps:$4 sm:$0xff]  }
 0x174   :  { %3890 = vmatprep.subr.bf16.mxu0 %v7250_v35  ;;  %4320 = vmatprep.subr.bf16.mxu1 %v7253_v36  ;;  %v7335_v35 = vld [vmem:[#allocation2 + $0xa08] ss:$16 sps:$4 sm:$0xff]   ;;  %v7340_v36 = vld [vmem:[#allocation2 + $0xa24] ss:$16 sps:$4 sm:$0xff]  }
 0x177   :  { %3891 = vmatpush1.bf16.msra.mxu0 %v7248_v37  ;;  %4321 = vmatpush1.bf16.msra.mxu1 %v7251_v38  ;;  %v7343_v37 = vld [vmem:[#allocation2 + $0xa2c] ss:$16 sps:$4 sm:$0xff]   ;;  %v152_v38 = vpack.c.bf16 %v133_v32, %v114_v31  ;;  %v7422_v31 = vld [vmem:[#allocation2 + $0xbe0] ss:$16 sps:$4 sm:$0xff]   ;;  %v7425_v32 = vld [vmem:[#allocation2 + $0xbe8] ss:$16 sps:$4 sm:$0xff]  }
 0x178   :  { %3892 = vmatprep.subr.bf16.mxu0 %v7256_v39  ;;  %4322 = vmatprep.subr.bf16.mxu1 %v7259_v40  ;;  %v7338_v39 = vld [vmem:[#allocation2 + $0xa20] ss:$16 sps:$4 sm:$0xff]   ;;  %v7341_v40 = vld [vmem:[#allocation2 + $0xa28] ss:$16 sps:$4 sm:$0xff]  }
 0x17b   :  { %3893 = vmatpush1.bf16.msra.mxu0 %v7254_v41  ;;  %4323 = vmatpush1.bf16.msra.mxu1 %v7257_v42  ;;  %v7346_v41 = vld [vmem:[#allocation2 + $0xa44] ss:$16 sps:$4 sm:$0xff]   ;;  %v7349_v42 = vld [vmem:[#allocation2 + $0xa4c] ss:$16 sps:$4 sm:$0xff]  }
 0x17c   :  { %3894 = vmatprep.subr.bf16.mxu0 %v7262_v43  ;;  %4324 = vmatprep.subr.bf16.mxu1 %v7265_v44  ;;  %v7344_v43 = vld [vmem:[#allocation2 + $0xa40] ss:$16 sps:$4 sm:$0xff]   ;;  %v7347_v44 = vld [vmem:[#allocation2 + $0xa48] ss:$16 sps:$4 sm:$0xff]  }
 0x17f   :  { %3895 = vmatpush1.bf16.msra.mxu0 %v7260_v45  ;;  %4325 = vmatpush1.bf16.msra.mxu1 %v7263_v46  ;;  %v7352_v45 = vld [vmem:[#allocation2 + $0xa64] ss:$16 sps:$4 sm:$0xff]   ;;  %v7355_v46 = vld [vmem:[#allocation2 + $0xa6c] ss:$16 sps:$4 sm:$0xff]  }
 0x180   :  { %3896 = vmatprep.subr.bf16.mxu0 %v7268_v47  ;;  %4326 = vmatprep.subr.bf16.mxu1 %v7271_v48  ;;  %v7350_v47 = vld [vmem:[#allocation2 + $0xa60] ss:$16 sps:$4 sm:$0xff]   ;;  %v7353_v48 = vld [vmem:[#allocation2 + $0xa68] ss:$16 sps:$4 sm:$0xff]  }
 0x183   :  { %3897 = vmatpush1.bf16.msra.mxu0 %v7266_v49  ;;  %4327 = vmatpush1.bf16.msra.mxu1 %v7269_v50  ;;  %v7358_v49 = vld [vmem:[#allocation2 + $0xa84] ss:$16 sps:$4 sm:$0xff]   ;;  %v7361_v50 = vld [vmem:[#allocation2 + $0xa8c] ss:$16 sps:$4 sm:$0xff]  }
 0x184   :  { %3898 = vmatprep.subr.bf16.mxu0 %v7274_v51  ;;  %4328 = vmatprep.subr.bf16.mxu1 %v7277_v52  ;;  %v7356_v51 = vld [vmem:[#allocation2 + $0xa80] ss:$16 sps:$4 sm:$0xff]   ;;  %v7359_v52 = vld [vmem:[#allocation2 + $0xa88] ss:$16 sps:$4 sm:$0xff]  }
 0x187   :  { %3899 = vmatpush1.bf16.msra.mxu0 %v7272_v53  ;;  %4329 = vmatpush1.bf16.msra.mxu1 %v7275_v54  ;;  %v7364_v53 = vld [vmem:[#allocation2 + $0xaa4] ss:$16 sps:$4 sm:$0xff]   ;;  %v7367_v54 = vld [vmem:[#allocation2 + $0xaac] ss:$16 sps:$4 sm:$0xff]  }
 0x188   :  { %3900 = vmatprep.subr.bf16.mxu0 %v7280_v55  ;;  %4330 = vmatprep.subr.bf16.mxu1 %v7283_v56  ;;  %v7362_v55 = vld [vmem:[#allocation2 + $0xaa0] ss:$16 sps:$4 sm:$0xff]   ;;  %v7365_v56 = vld [vmem:[#allocation2 + $0xaa8] ss:$16 sps:$4 sm:$0xff]  }
 0x18b   :  { %3901 = vmatpush1.bf16.msra.mxu0 %v7278_v57  ;;  %4331 = vmatpush1.bf16.msra.mxu1 %v7281_v58  ;;  %v7370_v57 = vld [vmem:[#allocation2 + $0xac4] ss:$16 sps:$4 sm:$0xff]   ;;  %v7373_v58 = vld [vmem:[#allocation2 + $0xacc] ss:$16 sps:$4 sm:$0xff]  }
 0x18c   :  { %3902 = vmatprep.subr.bf16.mxu0 %v7286_v59  ;;  %4332 = vmatprep.subr.bf16.mxu1 %v7289_v60  ;;  %v7368_v59 = vld [vmem:[#allocation2 + $0xac0] ss:$16 sps:$4 sm:$0xff]   ;;  %v7371_v60 = vld [vmem:[#allocation2 + $0xac8] ss:$16 sps:$4 sm:$0xff]  }
 0x18f   :  { %3903 = vmatpush1.bf16.msra.mxu0 %v7284_v61  ;;  %4333 = vmatpush1.bf16.msra.mxu1 %v7287_v62  ;;  %v7376_v61 = vld [vmem:[#allocation2 + $0xae4] ss:$16 sps:$4 sm:$0xff]   ;;  %v7379_v62 = vld [vmem:[#allocation2 + $0xaec] ss:$16 sps:$4 sm:$0xff]  }
 0x190   :  { %3904 = vmatprep.subr.bf16.mxu0 %v7292_v63  ;;  %4334 = vmatprep.subr.bf16.mxu1 %v7295_v0  ;;  %v7374_v63 = vld [vmem:[#allocation2 + $0xae0] ss:$16 sps:$4 sm:$0xff]   ;;  %v7377_v0 = vld [vmem:[#allocation2 + $0xae8] ss:$16 sps:$4 sm:$0xff]  }
 0x193   :  { %3905 = vmatpush1.bf16.msra.mxu0 %v7290_v1  ;;  %4335 = vmatpush1.bf16.msra.mxu1 %v7293_v2  ;;  %v7382_v1 = vld [vmem:[#allocation2 + $0xb04] ss:$16 sps:$4 sm:$0xff]   ;;  %v7385_v2 = vld [vmem:[#allocation2 + $0xb0c] ss:$16 sps:$4 sm:$0xff]  }
 0x194   :  { %3906 = vmatprep.subr.bf16.mxu0 %v7298_v3  ;;  %4336 = vmatprep.subr.bf16.mxu1 %v7301_v4  ;;  %v7380_v3 = vld [vmem:[#allocation2 + $0xb00] ss:$16 sps:$4 sm:$0xff]   ;;  %v7383_v4 = vld [vmem:[#allocation2 + $0xb08] ss:$16 sps:$4 sm:$0xff]  }
 0x197   :  { %3907 = vmatpush1.bf16.msra.mxu0 %v7296_v5  ;;  %4337 = vmatpush1.bf16.msra.mxu1 %v7299_v6  ;;  %v7388_v5 = vld [vmem:[#allocation2 + $0xb24] ss:$16 sps:$4 sm:$0xff]   ;;  %v7391_v6 = vld [vmem:[#allocation2 + $0xb2c] ss:$16 sps:$4 sm:$0xff]  }
 0x198   :  { %3908 = vmatprep.subr.bf16.mxu0 %v7304_v7  ;;  %4338 = vmatprep.subr.bf16.mxu1 %v7307_v8  ;;  %v7386_v7 = vld [vmem:[#allocation2 + $0xb20] ss:$16 sps:$4 sm:$0xff]   ;;  %v7389_v8 = vld [vmem:[#allocation2 + $0xb28] ss:$16 sps:$4 sm:$0xff]  }
 0x19b   :  { %3909 = vmatpush1.bf16.msra.mxu0 %v7302_v9  ;;  %4339 = vmatpush1.bf16.msra.mxu1 %v7305_v10  ;;  %v7394_v9 = vld [vmem:[#allocation2 + $0xb44] ss:$16 sps:$4 sm:$0xff]   ;;  %v7397_v10 = vld [vmem:[#allocation2 + $0xb4c] ss:$16 sps:$4 sm:$0xff]  }
 0x19c   :  { %3910 = vmatprep.subr.bf16.mxu0 %v7310_v11  ;;  %4340 = vmatprep.subr.bf16.mxu1 %v7313_v12  ;;  %v7392_v11 = vld [vmem:[#allocation2 + $0xb40] ss:$16 sps:$4 sm:$0xff]   ;;  %v7395_v12 = vld [vmem:[#allocation2 + $0xb48] ss:$16 sps:$4 sm:$0xff]  }
 0x19f   :  { %3911 = vmatpush1.bf16.msra.mxu0 %v7308_v13  ;;  %4341 = vmatpush1.bf16.msra.mxu1 %v7311_v14  ;;  %v7400_v13 = vld [vmem:[#allocation2 + $0xb64] ss:$16 sps:$4 sm:$0xff]   ;;  %v7403_v14 = vld [vmem:[#allocation2 + $0xb6c] ss:$16 sps:$4 sm:$0xff]  }
 0x1a0   :  { %3912 = vmatprep.subr.bf16.mxu0 %v7316_v15  ;;  %4342 = vmatprep.subr.bf16.mxu1 %v7319_v16  ;;  %v7398_v15 = vld [vmem:[#allocation2 + $0xb60] ss:$16 sps:$4 sm:$0xff]   ;;  %v7401_v16 = vld [vmem:[#allocation2 + $0xb68] ss:$16 sps:$4 sm:$0xff]  }
 0x1a3   :  { %3913 = vmatpush1.bf16.msra.mxu0 %v7314_v17  ;;  %4343 = vmatpush1.bf16.msra.mxu1 %v7317_v18  ;;  %v7406_v17 = vld [vmem:[#allocation2 + $0xb84] ss:$16 sps:$4 sm:$0xff]   ;;  %v7409_v18 = vld [vmem:[#allocation2 + $0xb8c] ss:$16 sps:$4 sm:$0xff]  }
 0x1a4   :  { %3914 = vmatprep.subr.bf16.mxu0 %v7322_v19  ;;  %4344 = vmatprep.subr.bf16.mxu1 %v7325_v20  ;;  %v7404_v19 = vld [vmem:[#allocation2 + $0xb80] ss:$16 sps:$4 sm:$0xff]   ;;  %v7407_v20 = vld [vmem:[#allocation2 + $0xb88] ss:$16 sps:$4 sm:$0xff]  }
 0x1a7   :  { %3915 = vmatpush1.bf16.msra.mxu0 %v7320_v21  ;;  %4345 = vmatpush1.bf16.msra.mxu1 %v7323_v22  ;;  %v7412_v21 = vld [vmem:[#allocation2 + $0xba4] ss:$16 sps:$4 sm:$0xff]   ;;  %v7415_v22 = vld [vmem:[#allocation2 + $0xbac] ss:$16 sps:$4 sm:$0xff]  }
 0x1a8   :  { %3916 = vmatprep.subr.bf16.mxu0 %v7328_v23  ;;  %4346 = vmatprep.subr.bf16.mxu1 %v7331_v24  ;;  %v7410_v23 = vld [vmem:[#allocation2 + $0xba0] ss:$16 sps:$4 sm:$0xff]   ;;  %v7413_v24 = vld [vmem:[#allocation2 + $0xba8] ss:$16 sps:$4 sm:$0xff]  }
 0x1ab   :  { %3917 = vmatpush1.bf16.msra.mxu0 %v7326_v25  ;;  %4347 = vmatpush1.bf16.msra.mxu1 %v7329_v26  ;;  %v7418_v25 = vld [vmem:[#allocation2 + $0xbc4] ss:$16 sps:$4 sm:$0xff]   ;;  %v7421_v26 = vld [vmem:[#allocation2 + $0xbcc] ss:$16 sps:$4 sm:$0xff]  }
 0x1ac   :  { %3929 = vmatprep.subr.bf16.mxu0 %v7334_v27  ;;  %4359 = vmatprep.subr.bf16.mxu1 %v7337_v28  ;;  %v7416_v27 = vld [vmem:[#allocation2 + $0xbc0] ss:$16 sps:$4 sm:$0xff]   ;;  %v7419_v28 = vld [vmem:[#allocation2 + $0xbc8] ss:$16 sps:$4 sm:$0xff]  }
 0x1ae   :  { %3919 = vmatmul.mubr.bf16.vlgmr.msra.gmra.mrb[0].mxu0 %v149_v33  ;;  %4349 = vmatmul.mubr.bf16.vlgmr.msra.gmra.mrb[0].mxu1 %v149_v33  ;;  %v7430_v33 = vld [vmem:[#allocation2 + $0xc04] ss:$16 sps:$4 sm:$0xff]  }
 0x1af   :  { %3930 = vmatpush1.bf16.msra.mxu0 %v7332_v34  ;;  %4360 = vmatpush1.bf16.msra.mxu1 %v7335_v35  ;;  %v7433_v34 = vld [vmem:[#allocation2 + $0xc0c] ss:$16 sps:$4 sm:$0xff]   ;;  %v113_v35 = vld [vmem:[%s8372_s0 + $0x50] sm:$0xff] }
 0x1b0   :  { %3931 = vmatprep.subr.bf16.mxu0 %v7340_v36  ;;  %4361 = vmatprep.subr.bf16.mxu1 %v7343_v37  ;;  %v132_v36 = vld [vmem:[%s8372_s0 + $0xe8] sm:$0xff] }
 0x1b1   :  { %3961 = vmatprep.mubr.bf16.mxu0 %v152_v38  ;;  %4391 = vmatprep.mubr.bf16.mxu1 %v152_v38  ;;  %v116_v37 = vld [vmem:[%s8372_s0 + $0x68] sm:$0xff]  ;;  %v135_v38 = vld [vmem:[%s8372_s0 + $0x100] sm:$0xff] }
 0x1b3   :  { %3932 = vmatpush1.bf16.msra.mxu0 %v7338_v39  ;;  %4362 = vmatpush1.bf16.msra.mxu1 %v7341_v40  ;;  %v151_v39 = vpack.c.bf16 %v132_v36, %v113_v35  ;;  %v7428_v40 = vld [vmem:[#allocation2 + $0xc00] ss:$16 sps:$4 sm:$0xff]   ;;  %v7520_v35 = vld [vmem:[#allocation2 + $0xde4] ss:$16 sps:$4 sm:$0xff]   ;;  %v7523_v36 = vld [vmem:[#allocation2 + $0xdec] ss:$16 sps:$4 sm:$0xff]  }
 0x1b4   :  { %3933 = vmatprep.subr.bf16.mxu0 %v7346_v41  ;;  %4363 = vmatprep.subr.bf16.mxu1 %v7349_v42  ;;  %v7431_v41 = vld [vmem:[#allocation2 + $0xc08] ss:$16 sps:$4 sm:$0xff]   ;;  %v7436_v42 = vld [vmem:[#allocation2 + $0xc24] ss:$16 sps:$4 sm:$0xff]  }
 0x1b7   :  { %3934 = vmatpush1.bf16.msra.mxu0 %v7344_v43  ;;  %4364 = vmatpush1.bf16.msra.mxu1 %v7347_v44  ;;  %v7439_v43 = vld [vmem:[#allocation2 + $0xc2c] ss:$16 sps:$4 sm:$0xff]   ;;  %v154_v44 = vpack.c.bf16 %v135_v38, %v116_v37  ;;  %v7518_v37 = vld [vmem:[#allocation2 + $0xde0] ss:$16 sps:$4 sm:$0xff]   ;;  %v7521_v38 = vld [vmem:[#allocation2 + $0xde8] ss:$16 sps:$4 sm:$0xff]  }
 0x1b8   :  { %3935 = vmatprep.subr.bf16.mxu0 %v7352_v45  ;;  %4365 = vmatprep.subr.bf16.mxu1 %v7355_v46  ;;  %v7434_v45 = vld [vmem:[#allocation2 + $0xc20] ss:$16 sps:$4 sm:$0xff]   ;;  %v7437_v46 = vld [vmem:[#allocation2 + $0xc28] ss:$16 sps:$4 sm:$0xff]  }
 0x1bb   :  { %3936 = vmatpush1.bf16.msra.mxu0 %v7350_v47  ;;  %4366 = vmatpush1.bf16.msra.mxu1 %v7353_v48  ;;  %v7442_v47 = vld [vmem:[#allocation2 + $0xc44] ss:$16 sps:$4 sm:$0xff]   ;;  %v7445_v48 = vld [vmem:[#allocation2 + $0xc4c] ss:$16 sps:$4 sm:$0xff]  }
 0x1bc   :  { %3937 = vmatprep.subr.bf16.mxu0 %v7358_v49  ;;  %4367 = vmatprep.subr.bf16.mxu1 %v7361_v50  ;;  %v7440_v49 = vld [vmem:[#allocation2 + $0xc40] ss:$16 sps:$4 sm:$0xff]   ;;  %v7443_v50 = vld [vmem:[#allocation2 + $0xc48] ss:$16 sps:$4 sm:$0xff]  }
 0x1bf   :  { %3938 = vmatpush1.bf16.msra.mxu0 %v7356_v51  ;;  %4368 = vmatpush1.bf16.msra.mxu1 %v7359_v52  ;;  %v7448_v51 = vld [vmem:[#allocation2 + $0xc64] ss:$16 sps:$4 sm:$0xff]   ;;  %v7451_v52 = vld [vmem:[#allocation2 + $0xc6c] ss:$16 sps:$4 sm:$0xff]  }
 0x1c0   :  { %3939 = vmatprep.subr.bf16.mxu0 %v7364_v53  ;;  %4369 = vmatprep.subr.bf16.mxu1 %v7367_v54  ;;  %v7446_v53 = vld [vmem:[#allocation2 + $0xc60] ss:$16 sps:$4 sm:$0xff]   ;;  %v7449_v54 = vld [vmem:[#allocation2 + $0xc68] ss:$16 sps:$4 sm:$0xff]  }
 0x1c3   :  { %3940 = vmatpush1.bf16.msra.mxu0 %v7362_v55  ;;  %4370 = vmatpush1.bf16.msra.mxu1 %v7365_v56  ;;  %v7454_v55 = vld [vmem:[#allocation2 + $0xc84] ss:$16 sps:$4 sm:$0xff]   ;;  %v7457_v56 = vld [vmem:[#allocation2 + $0xc8c] ss:$16 sps:$4 sm:$0xff]  }
 0x1c4   :  { %3941 = vmatprep.subr.bf16.mxu0 %v7370_v57  ;;  %4371 = vmatprep.subr.bf16.mxu1 %v7373_v58  ;;  %v7452_v57 = vld [vmem:[#allocation2 + $0xc80] ss:$16 sps:$4 sm:$0xff]   ;;  %v7455_v58 = vld [vmem:[#allocation2 + $0xc88] ss:$16 sps:$4 sm:$0xff]  }
 0x1c7   :  { %3942 = vmatpush1.bf16.msra.mxu0 %v7368_v59  ;;  %4372 = vmatpush1.bf16.msra.mxu1 %v7371_v60  ;;  %v7460_v59 = vld [vmem:[#allocation2 + $0xca4] ss:$16 sps:$4 sm:$0xff]   ;;  %v7463_v60 = vld [vmem:[#allocation2 + $0xcac] ss:$16 sps:$4 sm:$0xff]  }
 0x1c8   :  { %3943 = vmatprep.subr.bf16.mxu0 %v7376_v61  ;;  %4373 = vmatprep.subr.bf16.mxu1 %v7379_v62  ;;  %v7458_v61 = vld [vmem:[#allocation2 + $0xca0] ss:$16 sps:$4 sm:$0xff]   ;;  %v7461_v62 = vld [vmem:[#allocation2 + $0xca8] ss:$16 sps:$4 sm:$0xff]  }
 0x1cb   :  { %3944 = vmatpush1.bf16.msra.mxu0 %v7374_v63  ;;  %4374 = vmatpush1.bf16.msra.mxu1 %v7377_v0  ;;  %v7466_v63 = vld [vmem:[#allocation2 + $0xcc4] ss:$16 sps:$4 sm:$0xff]   ;;  %v7469_v0 = vld [vmem:[#allocation2 + $0xccc] ss:$16 sps:$4 sm:$0xff]  }
 0x1cc   :  { %3945 = vmatprep.subr.bf16.mxu0 %v7382_v1  ;;  %4375 = vmatprep.subr.bf16.mxu1 %v7385_v2  ;;  %v7464_v1 = vld [vmem:[#allocation2 + $0xcc0] ss:$16 sps:$4 sm:$0xff]   ;;  %v7467_v2 = vld [vmem:[#allocation2 + $0xcc8] ss:$16 sps:$4 sm:$0xff]  }
 0x1cf   :  { %3946 = vmatpush1.bf16.msra.mxu0 %v7380_v3  ;;  %4376 = vmatpush1.bf16.msra.mxu1 %v7383_v4  ;;  %v7472_v3 = vld [vmem:[#allocation2 + $0xce4] ss:$16 sps:$4 sm:$0xff]   ;;  %v7475_v4 = vld [vmem:[#allocation2 + $0xcec] ss:$16 sps:$4 sm:$0xff]  }
 0x1d0   :  { %3947 = vmatprep.subr.bf16.mxu0 %v7388_v5  ;;  %4377 = vmatprep.subr.bf16.mxu1 %v7391_v6  ;;  %v7470_v5 = vld [vmem:[#allocation2 + $0xce0] ss:$16 sps:$4 sm:$0xff]   ;;  %v7473_v6 = vld [vmem:[#allocation2 + $0xce8] ss:$16 sps:$4 sm:$0xff]  }
 0x1d3   :  { %3948 = vmatpush1.bf16.msra.mxu0 %v7386_v7  ;;  %4378 = vmatpush1.bf16.msra.mxu1 %v7389_v8  ;;  %v7478_v7 = vld [vmem:[#allocation2 + $0xd04] ss:$16 sps:$4 sm:$0xff]   ;;  %v7481_v8 = vld [vmem:[#allocation2 + $0xd0c] ss:$16 sps:$4 sm:$0xff]  }
 0x1d4   :  { %3949 = vmatprep.subr.bf16.mxu0 %v7394_v9  ;;  %4379 = vmatprep.subr.bf16.mxu1 %v7397_v10  ;;  %v7476_v9 = vld [vmem:[#allocation2 + $0xd00] ss:$16 sps:$4 sm:$0xff]   ;;  %v7479_v10 = vld [vmem:[#allocation2 + $0xd08] ss:$16 sps:$4 sm:$0xff]  }
 0x1d7   :  { %3950 = vmatpush1.bf16.msra.mxu0 %v7392_v11  ;;  %4380 = vmatpush1.bf16.msra.mxu1 %v7395_v12  ;;  %v7484_v11 = vld [vmem:[#allocation2 + $0xd24] ss:$16 sps:$4 sm:$0xff]   ;;  %v7487_v12 = vld [vmem:[#allocation2 + $0xd2c] ss:$16 sps:$4 sm:$0xff]  }
 0x1d8   :  { %3951 = vmatprep.subr.bf16.mxu0 %v7400_v13  ;;  %4381 = vmatprep.subr.bf16.mxu1 %v7403_v14  ;;  %v7482_v13 = vld [vmem:[#allocation2 + $0xd20] ss:$16 sps:$4 sm:$0xff]   ;;  %v7485_v14 = vld [vmem:[#allocation2 + $0xd28] ss:$16 sps:$4 sm:$0xff]  }
 0x1db   :  { %3952 = vmatpush1.bf16.msra.mxu0 %v7398_v15  ;;  %4382 = vmatpush1.bf16.msra.mxu1 %v7401_v16  ;;  %v7490_v15 = vld [vmem:[#allocation2 + $0xd44] ss:$16 sps:$4 sm:$0xff]   ;;  %v7493_v16 = vld [vmem:[#allocation2 + $0xd4c] ss:$16 sps:$4 sm:$0xff]  }
 0x1dc   :  { %3953 = vmatprep.subr.bf16.mxu0 %v7406_v17  ;;  %4383 = vmatprep.subr.bf16.mxu1 %v7409_v18  ;;  %v7488_v17 = vld [vmem:[#allocation2 + $0xd40] ss:$16 sps:$4 sm:$0xff]   ;;  %v7491_v18 = vld [vmem:[#allocation2 + $0xd48] ss:$16 sps:$4 sm:$0xff]  }
 0x1df   :  { %3954 = vmatpush1.bf16.msra.mxu0 %v7404_v19  ;;  %4384 = vmatpush1.bf16.msra.mxu1 %v7407_v20  ;;  %v7496_v19 = vld [vmem:[#allocation2 + $0xd64] ss:$16 sps:$4 sm:$0xff]   ;;  %v7499_v20 = vld [vmem:[#allocation2 + $0xd6c] ss:$16 sps:$4 sm:$0xff]  }
 0x1e0   :  { %3955 = vmatprep.subr.bf16.mxu0 %v7412_v21  ;;  %4385 = vmatprep.subr.bf16.mxu1 %v7415_v22  ;;  %v7494_v21 = vld [vmem:[#allocation2 + $0xd60] ss:$16 sps:$4 sm:$0xff]   ;;  %v7497_v22 = vld [vmem:[#allocation2 + $0xd68] ss:$16 sps:$4 sm:$0xff]  }
 0x1e3   :  { %3956 = vmatpush1.bf16.msra.mxu0 %v7410_v23  ;;  %4386 = vmatpush1.bf16.msra.mxu1 %v7413_v24  ;;  %v7502_v23 = vld [vmem:[#allocation2 + $0xd84] ss:$16 sps:$4 sm:$0xff]   ;;  %v7505_v24 = vld [vmem:[#allocation2 + $0xd8c] ss:$16 sps:$4 sm:$0xff]  }
 0x1e4   :  { %3957 = vmatprep.subr.bf16.mxu0 %v7418_v25  ;;  %4387 = vmatprep.subr.bf16.mxu1 %v7421_v26  ;;  %v7500_v25 = vld [vmem:[#allocation2 + $0xd80] ss:$16 sps:$4 sm:$0xff]   ;;  %v7503_v26 = vld [vmem:[#allocation2 + $0xd88] ss:$16 sps:$4 sm:$0xff]  }
 0x1e7   :  { %3958 = vmatpush1.bf16.msra.mxu0 %v7416_v27  ;;  %4388 = vmatpush1.bf16.msra.mxu1 %v7419_v28  ;;  %v7508_v27 = vld [vmem:[#allocation2 + $0xda4] ss:$16 sps:$4 sm:$0xff]   ;;  %v7511_v28 = vld [vmem:[#allocation2 + $0xdac] ss:$16 sps:$4 sm:$0xff]  }
 0x1e8   :  { %3959 = vmatprep.subr.bf16.mxu0 %v7424_v29  ;;  %4389 = vmatprep.subr.bf16.mxu1 %v7427_v30  ;;  %v7506_v29 = vld [vmem:[#allocation2 + $0xda0] ss:$16 sps:$4 sm:$0xff]   ;;  %v7509_v30 = vld [vmem:[#allocation2 + $0xda8] ss:$16 sps:$4 sm:$0xff]  }
 0x1eb   :  { %3960 = vmatpush1.bf16.msra.mxu0 %v7422_v31  ;;  %4390 = vmatpush1.bf16.msra.mxu1 %v7425_v32  ;;  %v7514_v31 = vld [vmem:[#allocation2 + $0xdc4] ss:$16 sps:$4 sm:$0xff]   ;;  %v7517_v32 = vld [vmem:[#allocation2 + $0xdcc] ss:$16 sps:$4 sm:$0xff]  }
 0x1ec   :  { %3972 = vmatprep.subr.bf16.mxu0 %v7430_v33  ;;  %4402 = vmatprep.subr.bf16.mxu1 %v7433_v34  ;;  %v7512_v33 = vld [vmem:[#allocation2 + $0xdc0] ss:$16 sps:$4 sm:$0xff]   ;;  %v7515_v34 = vld [vmem:[#allocation2 + $0xdc8] ss:$16 sps:$4 sm:$0xff]  }
 0x1ee   :  { %3962 = vmatmul.mubr.bf16.vlgmr.msra.gmra.mrb[0].mxu0 %v151_v39  ;;  %4392 = vmatmul.mubr.bf16.vlgmr.msra.gmra.mrb[0].mxu1 %v151_v39  ;;  %v115_v39 = vld [vmem:[%s8372_s0 + $0x60] sm:$0xff] }
 0x1ef   :  { %3973 = vmatpush1.bf16.msra.mxu0 %v7428_v40  ;;  %4403 = vmatpush1.bf16.msra.mxu1 %v7431_v41  ;;  %v134_v40 = vld [vmem:[%s8372_s0 + $0xf8] sm:$0xff]  ;;  %v7526_v41 = vld [vmem:[#allocation2 + $0xe04] ss:$16 sps:$4 sm:$0xff]  }
 0x1f0   :  { %3974 = vmatprep.subr.bf16.mxu0 %v7436_v42  ;;  %4404 = vmatprep.subr.bf16.mxu1 %v7439_v43  ;;  %v7529_v42 = vld [vmem:[#allocation2 + $0xe0c] ss:$16 sps:$4 sm:$0xff]   ;;  %v153_v43 = vpack.c.bf16 %v134_v40, %v115_v39  ;;  %v7608_v39 = vld [vmem:[#allocation2 + $0xfc0] ss:$16 sps:$4 sm:$0xff]   ;;  %v7611_v40 = vld [vmem:[#allocation2 + $0xfc8] ss:$16 sps:$4 sm:$0xff]  }
 0x1f1   :  { %4004 = vmatprep.mubr.bf16.mxu0 %v154_v44  ;;  %4434 = vmatprep.mubr.bf16.mxu1 %v154_v44  ;;  %v118_v44 = vld [vmem:[%s8372_s0 + $0x78] sm:$0xff] }
 0x1f3   :  { %3975 = vmatpush1.bf16.msra.mxu0 %v7434_v45  ;;  %4405 = vmatpush1.bf16.msra.mxu1 %v7437_v46  ;;  %v137_v45 = vld [vmem:[%s8372_s0 + $0x110] sm:$0xff] }
 0x1f4   :  { %3976 = vmatprep.subr.bf16.mxu0 %v7442_v47  ;;  %4406 = vmatprep.subr.bf16.mxu1 %v7445_v48  ;;  %v7524_v46 = vld [vmem:[#allocation2 + $0xe00] ss:$16 sps:$4 sm:$0xff]   ;;  %v7527_v47 = vld [vmem:[#allocation2 + $0xe08] ss:$16 sps:$4 sm:$0xff]   ;;  %v7532_v48 = vld [vmem:[#allocation2 + $0xe24] ss:$16 sps:$4 sm:$0xff]  }
 0x1f7   :  { %3977 = vmatpush1.bf16.msra.mxu0 %v7440_v49  ;;  %4407 = vmatpush1.bf16.msra.mxu1 %v7443_v50  ;;  %v7535_v49 = vld [vmem:[#allocation2 + $0xe2c] ss:$16 sps:$4 sm:$0xff]   ;;  %v156_v50 = vpack.c.bf16 %v137_v45, %v118_v44  ;;  %v7617_v44 = vld [vmem:[#allocation2 + $0xfe8] ss:$16 sps:$4 sm:$0xff]   ;;  %v117_v45 = vld [vmem:[%s8372_s0 + $0x70] sm:$0xff] }
 0x1f8   :  { %3978 = vmatprep.subr.bf16.mxu0 %v7448_v51  ;;  %4408 = vmatprep.subr.bf16.mxu1 %v7451_v52  ;;  %v7530_v51 = vld [vmem:[#allocation2 + $0xe20] ss:$16 sps:$4 sm:$0xff]   ;;  %v7533_v52 = vld [vmem:[#allocation2 + $0xe28] ss:$16 sps:$4 sm:$0xff]  }
 0x1fb   :  { %3979 = vmatpush1.bf16.msra.mxu0 %v7446_v53  ;;  %4409 = vmatpush1.bf16.msra.mxu1 %v7449_v54  ;;  %v7538_v53 = vld [vmem:[#allocation2 + $0xe44] ss:$16 sps:$4 sm:$0xff]   ;;  %v7541_v54 = vld [vmem:[#allocation2 + $0xe4c] ss:$16 sps:$4 sm:$0xff]  }
 0x1fc   :  { %3980 = vmatprep.subr.bf16.mxu0 %v7454_v55  ;;  %4410 = vmatprep.subr.bf16.mxu1 %v7457_v56  ;;  %v7536_v55 = vld [vmem:[#allocation2 + $0xe40] ss:$16 sps:$4 sm:$0xff]   ;;  %v7539_v56 = vld [vmem:[#allocation2 + $0xe48] ss:$16 sps:$4 sm:$0xff]  }
 0x1ff   :  { %3981 = vmatpush1.bf16.msra.mxu0 %v7452_v57  ;;  %4411 = vmatpush1.bf16.msra.mxu1 %v7455_v58  ;;  %v7544_v57 = vld [vmem:[#allocation2 + $0xe64] ss:$16 sps:$4 sm:$0xff]   ;;  %v7547_v58 = vld [vmem:[#allocation2 + $0xe6c] ss:$16 sps:$4 sm:$0xff]  }
 0x200   :  { %3982 = vmatprep.subr.bf16.mxu0 %v7460_v59  ;;  %4412 = vmatprep.subr.bf16.mxu1 %v7463_v60  ;;  %v7542_v59 = vld [vmem:[#allocation2 + $0xe60] ss:$16 sps:$4 sm:$0xff]   ;;  %v7545_v60 = vld [vmem:[#allocation2 + $0xe68] ss:$16 sps:$4 sm:$0xff]  }
 0x203   :  { %3983 = vmatpush1.bf16.msra.mxu0 %v7458_v61  ;;  %4413 = vmatpush1.bf16.msra.mxu1 %v7461_v62  ;;  %v7550_v61 = vld [vmem:[#allocation2 + $0xe84] ss:$16 sps:$4 sm:$0xff]   ;;  %v7553_v62 = vld [vmem:[#allocation2 + $0xe8c] ss:$16 sps:$4 sm:$0xff]  }
 0x204   :  { %3984 = vmatprep.subr.bf16.mxu0 %v7466_v63  ;;  %4414 = vmatprep.subr.bf16.mxu1 %v7469_v0  ;;  %v7548_v63 = vld [vmem:[#allocation2 + $0xe80] ss:$16 sps:$4 sm:$0xff]   ;;  %v7551_v0 = vld [vmem:[#allocation2 + $0xe88] ss:$16 sps:$4 sm:$0xff]  }
 0x207   :  { %3985 = vmatpush1.bf16.msra.mxu0 %v7464_v1  ;;  %4415 = vmatpush1.bf16.msra.mxu1 %v7467_v2  ;;  %v7556_v1 = vld [vmem:[#allocation2 + $0xea4] ss:$16 sps:$4 sm:$0xff]   ;;  %v7559_v2 = vld [vmem:[#allocation2 + $0xeac] ss:$16 sps:$4 sm:$0xff]  }
 0x208   :  { %3986 = vmatprep.subr.bf16.mxu0 %v7472_v3  ;;  %4416 = vmatprep.subr.bf16.mxu1 %v7475_v4  ;;  %v7554_v3 = vld [vmem:[#allocation2 + $0xea0] ss:$16 sps:$4 sm:$0xff]   ;;  %v7557_v4 = vld [vmem:[#allocation2 + $0xea8] ss:$16 sps:$4 sm:$0xff]  }
 0x20b   :  { %3987 = vmatpush1.bf16.msra.mxu0 %v7470_v5  ;;  %4417 = vmatpush1.bf16.msra.mxu1 %v7473_v6  ;;  %v7562_v5 = vld [vmem:[#allocation2 + $0xec4] ss:$16 sps:$4 sm:$0xff]   ;;  %v7565_v6 = vld [vmem:[#allocation2 + $0xecc] ss:$16 sps:$4 sm:$0xff]  }
 0x20c   :  { %3988 = vmatprep.subr.bf16.mxu0 %v7478_v7  ;;  %4418 = vmatprep.subr.bf16.mxu1 %v7481_v8  ;;  %v7560_v7 = vld [vmem:[#allocation2 + $0xec0] ss:$16 sps:$4 sm:$0xff]   ;;  %v7563_v8 = vld [vmem:[#allocation2 + $0xec8] ss:$16 sps:$4 sm:$0xff]  }
 0x20f   :  { %3989 = vmatpush1.bf16.msra.mxu0 %v7476_v9  ;;  %4419 = vmatpush1.bf16.msra.mxu1 %v7479_v10  ;;  %v7568_v9 = vld [vmem:[#allocation2 + $0xee4] ss:$16 sps:$4 sm:$0xff]   ;;  %v7571_v10 = vld [vmem:[#allocation2 + $0xeec] ss:$16 sps:$4 sm:$0xff]  }
 0x210   :  { %3990 = vmatprep.subr.bf16.mxu0 %v7484_v11  ;;  %4420 = vmatprep.subr.bf16.mxu1 %v7487_v12  ;;  %v7566_v11 = vld [vmem:[#allocation2 + $0xee0] ss:$16 sps:$4 sm:$0xff]   ;;  %v7569_v12 = vld [vmem:[#allocation2 + $0xee8] ss:$16 sps:$4 sm:$0xff]  }
 0x213   :  { %3991 = vmatpush1.bf16.msra.mxu0 %v7482_v13  ;;  %4421 = vmatpush1.bf16.msra.mxu1 %v7485_v14  ;;  %v7574_v13 = vld [vmem:[#allocation2 + $0xf04] ss:$16 sps:$4 sm:$0xff]   ;;  %v7577_v14 = vld [vmem:[#allocation2 + $0xf0c] ss:$16 sps:$4 sm:$0xff]  }
 0x214   :  { %3992 = vmatprep.subr.bf16.mxu0 %v7490_v15  ;;  %4422 = vmatprep.subr.bf16.mxu1 %v7493_v16  ;;  %v7572_v15 = vld [vmem:[#allocation2 + $0xf00] ss:$16 sps:$4 sm:$0xff]   ;;  %v7575_v16 = vld [vmem:[#allocation2 + $0xf08] ss:$16 sps:$4 sm:$0xff]  }
 0x217   :  { %3993 = vmatpush1.bf16.msra.mxu0 %v7488_v17  ;;  %4423 = vmatpush1.bf16.msra.mxu1 %v7491_v18  ;;  %v7580_v17 = vld [vmem:[#allocation2 + $0xf24] ss:$16 sps:$4 sm:$0xff]   ;;  %v7583_v18 = vld [vmem:[#allocation2 + $0xf2c] ss:$16 sps:$4 sm:$0xff]  }
 0x218   :  { %3994 = vmatprep.subr.bf16.mxu0 %v7496_v19  ;;  %4424 = vmatprep.subr.bf16.mxu1 %v7499_v20  ;;  %v7578_v19 = vld [vmem:[#allocation2 + $0xf20] ss:$16 sps:$4 sm:$0xff]   ;;  %v7581_v20 = vld [vmem:[#allocation2 + $0xf28] ss:$16 sps:$4 sm:$0xff]  }
 0x21b   :  { %3995 = vmatpush1.bf16.msra.mxu0 %v7494_v21  ;;  %4425 = vmatpush1.bf16.msra.mxu1 %v7497_v22  ;;  %v7586_v21 = vld [vmem:[#allocation2 + $0xf44] ss:$16 sps:$4 sm:$0xff]   ;;  %v7589_v22 = vld [vmem:[#allocation2 + $0xf4c] ss:$16 sps:$4 sm:$0xff]  }
 0x21c   :  { %3996 = vmatprep.subr.bf16.mxu0 %v7502_v23  ;;  %4426 = vmatprep.subr.bf16.mxu1 %v7505_v24  ;;  %v7584_v23 = vld [vmem:[#allocation2 + $0xf40] ss:$16 sps:$4 sm:$0xff]   ;;  %v7587_v24 = vld [vmem:[#allocation2 + $0xf48] ss:$16 sps:$4 sm:$0xff]  }
 0x21f   :  { %3997 = vmatpush1.bf16.msra.mxu0 %v7500_v25  ;;  %4427 = vmatpush1.bf16.msra.mxu1 %v7503_v26  ;;  %v7592_v25 = vld [vmem:[#allocation2 + $0xf64] ss:$16 sps:$4 sm:$0xff]   ;;  %v7595_v26 = vld [vmem:[#allocation2 + $0xf6c] ss:$16 sps:$4 sm:$0xff]  }
 0x220   :  { %3998 = vmatprep.subr.bf16.mxu0 %v7508_v27  ;;  %4428 = vmatprep.subr.bf16.mxu1 %v7511_v28  ;;  %v7590_v27 = vld [vmem:[#allocation2 + $0xf60] ss:$16 sps:$4 sm:$0xff]   ;;  %v7593_v28 = vld [vmem:[#allocation2 + $0xf68] ss:$16 sps:$4 sm:$0xff]  }
 0x223   :  { %3999 = vmatpush1.bf16.msra.mxu0 %v7506_v29  ;;  %4429 = vmatpush1.bf16.msra.mxu1 %v7509_v30  ;;  %v7598_v29 = vld [vmem:[#allocation2 + $0xf84] ss:$16 sps:$4 sm:$0xff]   ;;  %v7601_v30 = vld [vmem:[#allocation2 + $0xf8c] ss:$16 sps:$4 sm:$0xff]  }
 0x224   :  { %4000 = vmatprep.subr.bf16.mxu0 %v7514_v31  ;;  %4430 = vmatprep.subr.bf16.mxu1 %v7517_v32  ;;  %v7596_v31 = vld [vmem:[#allocation2 + $0xf80] ss:$16 sps:$4 sm:$0xff]   ;;  %v7599_v32 = vld [vmem:[#allocation2 + $0xf88] ss:$16 sps:$4 sm:$0xff]  }
 0x227   :  { %4001 = vmatpush1.bf16.msra.mxu0 %v7512_v33  ;;  %4431 = vmatpush1.bf16.msra.mxu1 %v7515_v34  ;;  %v7604_v33 = vld [vmem:[#allocation2 + $0xfa4] ss:$16 sps:$4 sm:$0xff]   ;;  %v7607_v34 = vld [vmem:[#allocation2 + $0xfac] ss:$16 sps:$4 sm:$0xff]  }
 0x228   :  { %4002 = vmatprep.subr.bf16.mxu0 %v7520_v35  ;;  %4432 = vmatprep.subr.bf16.mxu1 %v7523_v36  ;;  %v7602_v35 = vld [vmem:[#allocation2 + $0xfa0] ss:$16 sps:$4 sm:$0xff]   ;;  %v7605_v36 = vld [vmem:[#allocation2 + $0xfa8] ss:$16 sps:$4 sm:$0xff]  }
 0x22b   :  { %4003 = vmatpush1.bf16.msra.mxu0 %v7518_v37  ;;  %4433 = vmatpush1.bf16.msra.mxu1 %v7521_v38  ;;  %v7610_v37 = vld [vmem:[#allocation2 + $0xfc4] ss:$16 sps:$4 sm:$0xff]   ;;  %v7613_v38 = vld [vmem:[#allocation2 + $0xfcc] ss:$16 sps:$4 sm:$0xff]  }
 0x22c   :  { %4015 = vmatprep.subr.bf16.mxu0 %v7526_v41  ;;  %4445 = vmatprep.subr.bf16.mxu1 %v7529_v42  ;;  %v7616_v41 = vld [vmem:[#allocation2 + $0xfe4] ss:$16 sps:$4 sm:$0xff]   ;;  %v7619_v42 = vld [vmem:[#allocation2 + $0xfec] ss:$16 sps:$4 sm:$0xff]  }
 0x22e   :  { %4005 = vmatmul.mubr.bf16.vlgmr.msra.gmra.mrb[0].mxu0 %v153_v43  ;;  %4435 = vmatmul.mubr.bf16.vlgmr.msra.gmra.mrb[0].mxu1 %v153_v43  ;;  %v7614_v43 = vld [vmem:[#allocation2 + $0xfe0] ss:$16 sps:$4 sm:$0xff]  }
 0x22f   :  { %4016 = vmatpush1.bf16.msra.mxu0 %v7524_v46  ;;  %4446 = vmatpush1.bf16.msra.mxu1 %v7527_v47  ;;  %v136_v46 = vld [vmem:[%s8372_s0 + $0x108] sm:$0xff]  ;;  %v7622_v47 = vld [vmem:[#allocation2 + $0x1004] ss:$16 sps:$4 sm:$0xff]  }
 0x230   :  { %4017 = vmatprep.subr.bf16.mxu0 %v7532_v48  ;;  %4447 = vmatprep.subr.bf16.mxu1 %v7535_v49  ;;  %v7625_v48 = vld [vmem:[#allocation2 + $0x100c] ss:$16 sps:$4 sm:$0xff]   ;;  %v155_v49 = vpack.c.bf16 %v136_v46, %v117_v45  ;;  %v7704_v45 = vld [vmem:[#allocation2 + $0x11c0] ss:$16 sps:$4 sm:$0xff]   ;;  %v7707_v46 = vld [vmem:[#allocation2 + $0x11c8] ss:$16 sps:$4 sm:$0xff]  }
 0x231   :  { %4047 = vmatprep.mubr.bf16.mxu0 %v156_v50  ;;  %4477 = vmatprep.mubr.bf16.mxu1 %v156_v50  ;;  %v120_v50 = vld [vmem:[%s8372_s0 + $0x88] sm:$0xff] }
 0x233   :  { %4018 = vmatpush1.bf16.msra.mxu0 %v7530_v51  ;;  %4448 = vmatpush1.bf16.msra.mxu1 %v7533_v52  ;;  %v139_v51 = vld [vmem:[%s8372_s0 + $0x120] sm:$0xff] }
 0x234   :  { %4019 = vmatprep.subr.bf16.mxu0 %v7538_v53  ;;  %4449 = vmatprep.subr.bf16.mxu1 %v7541_v54  ;;  %v7620_v52 = vld [vmem:[#allocation2 + $0x1000] ss:$16 sps:$4 sm:$0xff]   ;;  %v7623_v53 = vld [vmem:[#allocation2 + $0x1008] ss:$16 sps:$4 sm:$0xff]   ;;  %v7628_v54 = vld [vmem:[#allocation2 + $0x1024] ss:$16 sps:$4 sm:$0xff]  }
 0x237   :  { %4020 = vmatpush1.bf16.msra.mxu0 %v7536_v55  ;;  %4450 = vmatpush1.bf16.msra.mxu1 %v7539_v56  ;;  %v7631_v55 = vld [vmem:[#allocation2 + $0x102c] ss:$16 sps:$4 sm:$0xff]   ;;  %v158_v56 = vpack.c.bf16 %v139_v51, %v120_v50  ;;  %v7713_v50 = vld [vmem:[#allocation2 + $0x11e8] ss:$16 sps:$4 sm:$0xff]   ;;  %v119_v51 = vld [vmem:[%s8372_s0 + $0x80] sm:$0xff] }
 0x238   :  { %4021 = vmatprep.subr.bf16.mxu0 %v7544_v57  ;;  %4451 = vmatprep.subr.bf16.mxu1 %v7547_v58  ;;  %v7626_v57 = vld [vmem:[#allocation2 + $0x1020] ss:$16 sps:$4 sm:$0xff]   ;;  %v7629_v58 = vld [vmem:[#allocation2 + $0x1028] ss:$16 sps:$4 sm:$0xff]  }
 0x23b   :  { %4022 = vmatpush1.bf16.msra.mxu0 %v7542_v59  ;;  %4452 = vmatpush1.bf16.msra.mxu1 %v7545_v60  ;;  %v7634_v59 = vld [vmem:[#allocation2 + $0x1044] ss:$16 sps:$4 sm:$0xff]   ;;  %v7637_v60 = vld [vmem:[#allocation2 + $0x104c] ss:$16 sps:$4 sm:$0xff]  }
 0x23c   :  { %4023 = vmatprep.subr.bf16.mxu0 %v7550_v61  ;;  %4453 = vmatprep.subr.bf16.mxu1 %v7553_v62  ;;  %v7632_v61 = vld [vmem:[#allocation2 + $0x1040] ss:$16 sps:$4 sm:$0xff]   ;;  %v7635_v62 = vld [vmem:[#allocation2 + $0x1048] ss:$16 sps:$4 sm:$0xff]  }
 0x23f   :  { %4024 = vmatpush1.bf16.msra.mxu0 %v7548_v63  ;;  %4454 = vmatpush1.bf16.msra.mxu1 %v7551_v0  ;;  %v7640_v63 = vld [vmem:[#allocation2 + $0x1064] ss:$16 sps:$4 sm:$0xff]   ;;  %v7643_v0 = vld [vmem:[#allocation2 + $0x106c] ss:$16 sps:$4 sm:$0xff]  }
 0x240   :  { %4025 = vmatprep.subr.bf16.mxu0 %v7556_v1  ;;  %4455 = vmatprep.subr.bf16.mxu1 %v7559_v2  ;;  %v7638_v1 = vld [vmem:[#allocation2 + $0x1060] ss:$16 sps:$4 sm:$0xff]   ;;  %v7641_v2 = vld [vmem:[#allocation2 + $0x1068] ss:$16 sps:$4 sm:$0xff]  }
 0x243   :  { %4026 = vmatpush1.bf16.msra.mxu0 %v7554_v3  ;;  %4456 = vmatpush1.bf16.msra.mxu1 %v7557_v4  ;;  %v7646_v3 = vld [vmem:[#allocation2 + $0x1084] ss:$16 sps:$4 sm:$0xff]   ;;  %v7649_v4 = vld [vmem:[#allocation2 + $0x108c] ss:$16 sps:$4 sm:$0xff]  }
 0x244   :  { %4027 = vmatprep.subr.bf16.mxu0 %v7562_v5  ;;  %4457 = vmatprep.subr.bf16.mxu1 %v7565_v6  ;;  %v7644_v5 = vld [vmem:[#allocation2 + $0x1080] ss:$16 sps:$4 sm:$0xff]   ;;  %v7647_v6 = vld [vmem:[#allocation2 + $0x1088] ss:$16 sps:$4 sm:$0xff]  }
 0x247   :  { %4028 = vmatpush1.bf16.msra.mxu0 %v7560_v7  ;;  %4458 = vmatpush1.bf16.msra.mxu1 %v7563_v8  ;;  %v7652_v7 = vld [vmem:[#allocation2 + $0x10a4] ss:$16 sps:$4 sm:$0xff]   ;;  %v7655_v8 = vld [vmem:[#allocation2 + $0x10ac] ss:$16 sps:$4 sm:$0xff]  }
 0x248   :  { %4029 = vmatprep.subr.bf16.mxu0 %v7568_v9  ;;  %4459 = vmatprep.subr.bf16.mxu1 %v7571_v10  ;;  %v7650_v9 = vld [vmem:[#allocation2 + $0x10a0] ss:$16 sps:$4 sm:$0xff]   ;;  %v7653_v10 = vld [vmem:[#allocation2 + $0x10a8] ss:$16 sps:$4 sm:$0xff]  }
 0x24b   :  { %4030 = vmatpush1.bf16.msra.mxu0 %v7566_v11  ;;  %4460 = vmatpush1.bf16.msra.mxu1 %v7569_v12  ;;  %v7658_v11 = vld [vmem:[#allocation2 + $0x10c4] ss:$16 sps:$4 sm:$0xff]   ;;  %v7661_v12 = vld [vmem:[#allocation2 + $0x10cc] ss:$16 sps:$4 sm:$0xff]  }
 0x24c   :  { %4031 = vmatprep.subr.bf16.mxu0 %v7574_v13  ;;  %4461 = vmatprep.subr.bf16.mxu1 %v7577_v14  ;;  %v7656_v13 = vld [vmem:[#allocation2 + $0x10c0] ss:$16 sps:$4 sm:$0xff]   ;;  %v7659_v14 = vld [vmem:[#allocation2 + $0x10c8] ss:$16 sps:$4 sm:$0xff]  }
 0x24f   :  { %4032 = vmatpush1.bf16.msra.mxu0 %v7572_v15  ;;  %4462 = vmatpush1.bf16.msra.mxu1 %v7575_v16  ;;  %v7664_v15 = vld [vmem:[#allocation2 + $0x10e4] ss:$16 sps:$4 sm:$0xff]   ;;  %v7667_v16 = vld [vmem:[#allocation2 + $0x10ec] ss:$16 sps:$4 sm:$0xff]  }
 0x250   :  { %4033 = vmatprep.subr.bf16.mxu0 %v7580_v17  ;;  %4463 = vmatprep.subr.bf16.mxu1 %v7583_v18  ;;  %v7662_v17 = vld [vmem:[#allocation2 + $0x10e0] ss:$16 sps:$4 sm:$0xff]   ;;  %v7665_v18 = vld [vmem:[#allocation2 + $0x10e8] ss:$16 sps:$4 sm:$0xff]  }
 0x253   :  { %4034 = vmatpush1.bf16.msra.mxu0 %v7578_v19  ;;  %4464 = vmatpush1.bf16.msra.mxu1 %v7581_v20  ;;  %v7670_v19 = vld [vmem:[#allocation2 + $0x1104] ss:$16 sps:$4 sm:$0xff]   ;;  %v7673_v20 = vld [vmem:[#allocation2 + $0x110c] ss:$16 sps:$4 sm:$0xff]  }
 0x254   :  { %4035 = vmatprep.subr.bf16.mxu0 %v7586_v21  ;;  %4465 = vmatprep.subr.bf16.mxu1 %v7589_v22  ;;  %v7668_v21 = vld [vmem:[#allocation2 + $0x1100] ss:$16 sps:$4 sm:$0xff]   ;;  %v7671_v22 = vld [vmem:[#allocation2 + $0x1108] ss:$16 sps:$4 sm:$0xff]  }
 0x257   :  { %4036 = vmatpush1.bf16.msra.mxu0 %v7584_v23  ;;  %4466 = vmatpush1.bf16.msra.mxu1 %v7587_v24  ;;  %v7676_v23 = vld [vmem:[#allocation2 + $0x1124] ss:$16 sps:$4 sm:$0xff]   ;;  %v7679_v24 = vld [vmem:[#allocation2 + $0x112c] ss:$16 sps:$4 sm:$0xff]  }
 0x258   :  { %4037 = vmatprep.subr.bf16.mxu0 %v7592_v25  ;;  %4467 = vmatprep.subr.bf16.mxu1 %v7595_v26  ;;  %v7674_v25 = vld [vmem:[#allocation2 + $0x1120] ss:$16 sps:$4 sm:$0xff]   ;;  %v7677_v26 = vld [vmem:[#allocation2 + $0x1128] ss:$16 sps:$4 sm:$0xff]  }
 0x25b   :  { %4038 = vmatpush1.bf16.msra.mxu0 %v7590_v27  ;;  %4468 = vmatpush1.bf16.msra.mxu1 %v7593_v28  ;;  %v7682_v27 = vld [vmem:[#allocation2 + $0x1144] ss:$16 sps:$4 sm:$0xff]   ;;  %v7685_v28 = vld [vmem:[#allocation2 + $0x114c] ss:$16 sps:$4 sm:$0xff]  }
 0x25c   :  { %4039 = vmatprep.subr.bf16.mxu0 %v7598_v29  ;;  %4469 = vmatprep.subr.bf16.mxu1 %v7601_v30  ;;  %v7680_v29 = vld [vmem:[#allocation2 + $0x1140] ss:$16 sps:$4 sm:$0xff]   ;;  %v7683_v30 = vld [vmem:[#allocation2 + $0x1148] ss:$16 sps:$4 sm:$0xff]  }
 0x25f   :  { %4040 = vmatpush1.bf16.msra.mxu0 %v7596_v31  ;;  %4470 = vmatpush1.bf16.msra.mxu1 %v7599_v32  ;;  %v7688_v31 = vld [vmem:[#allocation2 + $0x1164] ss:$16 sps:$4 sm:$0xff]   ;;  %v7691_v32 = vld [vmem:[#allocation2 + $0x116c] ss:$16 sps:$4 sm:$0xff]  }
 0x260   :  { %4041 = vmatprep.subr.bf16.mxu0 %v7604_v33  ;;  %4471 = vmatprep.subr.bf16.mxu1 %v7607_v34  ;;  %v7686_v33 = vld [vmem:[#allocation2 + $0x1160] ss:$16 sps:$4 sm:$0xff]   ;;  %v7689_v34 = vld [vmem:[#allocation2 + $0x1168] ss:$16 sps:$4 sm:$0xff]  }
 0x263   :  { %4042 = vmatpush1.bf16.msra.mxu0 %v7602_v35  ;;  %4472 = vmatpush1.bf16.msra.mxu1 %v7605_v36  ;;  %v7694_v35 = vld [vmem:[#allocation2 + $0x1184] ss:$16 sps:$4 sm:$0xff]   ;;  %v7697_v36 = vld [vmem:[#allocation2 + $0x118c] ss:$16 sps:$4 sm:$0xff]  }
 0x264   :  { %4043 = vmatprep.subr.bf16.mxu0 %v7610_v37  ;;  %4473 = vmatprep.subr.bf16.mxu1 %v7613_v38  ;;  %v7692_v37 = vld [vmem:[#allocation2 + $0x1180] ss:$16 sps:$4 sm:$0xff]   ;;  %v7695_v38 = vld [vmem:[#allocation2 + $0x1188] ss:$16 sps:$4 sm:$0xff]  }
 0x267   :  { %4044 = vmatpush1.bf16.msra.mxu0 %v7608_v39  ;;  %4474 = vmatpush1.bf16.msra.mxu1 %v7611_v40  ;;  %v7700_v39 = vld [vmem:[#allocation2 + $0x11a4] ss:$16 sps:$4 sm:$0xff]   ;;  %v7703_v40 = vld [vmem:[#allocation2 + $0x11ac] ss:$16 sps:$4 sm:$0xff]  }
 0x268   :  { %4045 = vmatprep.subr.bf16.mxu0 %v7616_v41  ;;  %4475 = vmatprep.subr.bf16.mxu1 %v7619_v42  ;;  %v7698_v41 = vld [vmem:[#allocation2 + $0x11a0] ss:$16 sps:$4 sm:$0xff]   ;;  %v7701_v42 = vld [vmem:[#allocation2 + $0x11a8] ss:$16 sps:$4 sm:$0xff]  }
 0x26b   :  { %4046 = vmatpush1.bf16.msra.mxu0 %v7614_v43  ;;  %4476 = vmatpush1.bf16.msra.mxu1 %v7617_v44  ;;  %v7706_v43 = vld [vmem:[#allocation2 + $0x11c4] ss:$16 sps:$4 sm:$0xff]   ;;  %v7709_v44 = vld [vmem:[#allocation2 + $0x11cc] ss:$16 sps:$4 sm:$0xff]  }
 0x26c   :  { %4058 = vmatprep.subr.bf16.mxu0 %v7622_v47  ;;  %4488 = vmatprep.subr.bf16.mxu1 %v7625_v48  ;;  %v7712_v47 = vld [vmem:[#allocation2 + $0x11e4] ss:$16 sps:$4 sm:$0xff]   ;;  %v7715_v48 = vld [vmem:[#allocation2 + $0x11ec] ss:$16 sps:$4 sm:$0xff]  }
 0x26e   :  { %4048 = vmatmul.mubr.bf16.vlgmr.msra.gmra.mrb[0].mxu0 %v155_v49  ;;  %4478 = vmatmul.mubr.bf16.vlgmr.msra.gmra.mrb[0].mxu1 %v155_v49  ;;  %v7710_v49 = vld [vmem:[#allocation2 + $0x11e0] ss:$16 sps:$4 sm:$0xff]  }
 0x26f   :  { %4059 = vmatpush1.bf16.msra.mxu0 %v7620_v52  ;;  %4489 = vmatpush1.bf16.msra.mxu1 %v7623_v53  ;;  %v138_v52 = vld [vmem:[%s8372_s0 + $0x118] sm:$0xff]  ;;  %v7718_v53 = vld [vmem:[#allocation2 + $0x1204] ss:$16 sps:$4 sm:$0xff]  }
 0x270   :  { %4060 = vmatprep.subr.bf16.mxu0 %v7628_v54  ;;  %4490 = vmatprep.subr.bf16.mxu1 %v7631_v55  ;;  %v7721_v54 = vld [vmem:[#allocation2 + $0x120c] ss:$16 sps:$4 sm:$0xff]   ;;  %v157_v55 = vpack.c.bf16 %v138_v52, %v119_v51  ;;  %v7805_v51 = vld [vmem:[#allocation6 + $0x16c] ss:$16 sps:$4 sm:$0xff]   ;;  %v7800_v52 = vld [vmem:[#allocation6 + $0x160] ss:$16 sps:$4 sm:$0xff]  }
 0x271   :  { %4090 = vmatprep.mubr.bf16.mxu0 %v158_v56  ;;  %4520 = vmatprep.mubr.bf16.mxu1 %v158_v56  ;;  %v7716_v56 = vld [vmem:[#allocation2 + $0x1200] ss:$16 sps:$4 sm:$0xff]  }
 0x273   :  { %4061 = vmatpush1.bf16.msra.mxu0 %v7626_v57  ;;  %4491 = vmatpush1.bf16.msra.mxu1 %v7629_v58  ;;  %v7719_v57 = vld [vmem:[#allocation2 + $0x1208] ss:$16 sps:$4 sm:$0xff]   ;;  %v7724_v58 = vld [vmem:[#allocation2 + $0x1224] ss:$16 sps:$4 sm:$0xff]  }
 0x274   :  { %4062 = vmatprep.subr.bf16.mxu0 %v7634_v59  ;;  %4492 = vmatprep.subr.bf16.mxu1 %v7637_v60  ;;  %v7727_v59 = vld [vmem:[#allocation2 + $0x122c] ss:$16 sps:$4 sm:$0xff]   ;;  %v7722_v60 = vld [vmem:[#allocation2 + $0x1220] ss:$16 sps:$4 sm:$0xff]  }
 0x277   :  { %4063 = vmatpush1.bf16.msra.mxu0 %v7632_v61  ;;  %4493 = vmatpush1.bf16.msra.mxu1 %v7635_v62  ;;  %v7725_v61 = vld [vmem:[#allocation2 + $0x1228] ss:$16 sps:$4 sm:$0xff]   ;;  %v7730_v62 = vld [vmem:[#allocation2 + $0x1244] ss:$16 sps:$4 sm:$0xff]  }
 0x278   :  { %4064 = vmatprep.subr.bf16.mxu0 %v7640_v63  ;;  %4494 = vmatprep.subr.bf16.mxu1 %v7643_v0  ;;  %v7733_v63 = vld [vmem:[#allocation2 + $0x124c] ss:$16 sps:$4 sm:$0xff]   ;;  %v8116_v0 = vmov 0  }
 0x27b   :  { %4065 = vmatpush1.bf16.msra.mxu0 %v7638_v1  ;;  %4495 = vmatpush1.bf16.msra.mxu1 %v7641_v2  ;;  %v7728_v1 = vld [vmem:[#allocation2 + $0x1240] ss:$16 sps:$4 sm:$0xff]   ;;  %v7731_v2 = vld [vmem:[#allocation2 + $0x1248] ss:$16 sps:$4 sm:$0xff]  }
 0x27c   :  { %4066 = vmatprep.subr.bf16.mxu0 %v7646_v3  ;;  %4496 = vmatprep.subr.bf16.mxu1 %v7649_v4  ;;  %v121_v3 = vld [vmem:[%s8372_s0 + $0x90] sm:$0xff]  ;;  %v140_v4 = vld [vmem:[%s8372_s0 + $0x128] sm:$0xff] }
 0x27f   :  { %4067 = vmatpush1.bf16.msra.mxu0 %v7644_v5  ;;  %4497 = vmatpush1.bf16.msra.mxu1 %v7647_v6  ;;  %v7736_v5 = vld [vmem:[#allocation6 + $0x4] ss:$16 sps:$4 sm:$0xff]   ;;  %v7739_v6 = vld [vmem:[#allocation6 + $0xc] ss:$16 sps:$4 sm:$0xff]  }
 0x280   :  { %4068 = vmatprep.subr.bf16.mxu0 %v7652_v7  ;;  %4498 = vmatprep.subr.bf16.mxu1 %v7655_v8  ;;  %v159_v7 = vpack.c.bf16 %v140_v4, %v121_v3  ;;  %v7734_v8 = vld [vmem:[#allocation6] ss:$16 sps:$4 sm:$0xff]   ;;  %v7829_v3 = vld [vmem:[#allocation6 + $0x1ec] ss:$16 sps:$4 sm:$0xff]  }
 0x281   :  { %v7824_v4 = vld [vmem:[#allocation6 + $0x1e0] ss:$16 sps:$4 sm:$0xff]  }
 0x283   :  { %4069 = vmatpush1.bf16.msra.mxu0 %v7650_v9  ;;  %4499 = vmatpush1.bf16.msra.mxu1 %v7653_v10  ;;  %v7737_v9 = vld [vmem:[#allocation6 + $0x8] ss:$16 sps:$4 sm:$0xff]   ;;  %v7742_v10 = vld [vmem:[#allocation6 + $0x24] ss:$16 sps:$4 sm:$0xff]  }
 0x284   :  { %4070 = vmatprep.subr.bf16.mxu0 %v7658_v11  ;;  %4500 = vmatprep.subr.bf16.mxu1 %v7661_v12  ;;  %v7745_v11 = vld [vmem:[#allocation6 + $0x2c] ss:$16 sps:$4 sm:$0xff]   ;;  %v7740_v12 = vld [vmem:[#allocation6 + $0x20] ss:$16 sps:$4 sm:$0xff]  }
 0x287   :  { %4071 = vmatpush1.bf16.msra.mxu0 %v7656_v13  ;;  %4501 = vmatpush1.bf16.msra.mxu1 %v7659_v14  ;;  %v7743_v13 = vld [vmem:[#allocation6 + $0x28] ss:$16 sps:$4 sm:$0xff]   ;;  %v7748_v14 = vld [vmem:[#allocation6 + $0x44] ss:$16 sps:$4 sm:$0xff]  }
 0x288   :  { %4072 = vmatprep.subr.bf16.mxu0 %v7664_v15  ;;  %4502 = vmatprep.subr.bf16.mxu1 %v7667_v16  ;;  %v7751_v15 = vld [vmem:[#allocation6 + $0x4c] ss:$16 sps:$4 sm:$0xff]   ;;  %v7746_v16 = vld [vmem:[#allocation6 + $0x40] ss:$16 sps:$4 sm:$0xff]  }
 0x28b   :  { %4073 = vmatpush1.bf16.msra.mxu0 %v7662_v17  ;;  %4503 = vmatpush1.bf16.msra.mxu1 %v7665_v18  ;;  %v7749_v17 = vld [vmem:[#allocation6 + $0x48] ss:$16 sps:$4 sm:$0xff]   ;;  %v7754_v18 = vld [vmem:[#allocation6 + $0x64] ss:$16 sps:$4 sm:$0xff]  }
 0x28c   :  { %4074 = vmatprep.subr.bf16.mxu0 %v7670_v19  ;;  %4504 = vmatprep.subr.bf16.mxu1 %v7673_v20  ;;  %v7757_v19 = vld [vmem:[#allocation6 + $0x6c] ss:$16 sps:$4 sm:$0xff]   ;;  %v7752_v20 = vld [vmem:[#allocation6 + $0x60] ss:$16 sps:$4 sm:$0xff]  }
 0x28f   :  { %4075 = vmatpush1.bf16.msra.mxu0 %v7668_v21  ;;  %4505 = vmatpush1.bf16.msra.mxu1 %v7671_v22  ;;  %v7755_v21 = vld [vmem:[#allocation6 + $0x68] ss:$16 sps:$4 sm:$0xff]   ;;  %v7760_v22 = vld [vmem:[#allocation6 + $0x84] ss:$16 sps:$4 sm:$0xff]  }
 0x290   :  { %4076 = vmatprep.subr.bf16.mxu0 %v7676_v23  ;;  %4506 = vmatprep.subr.bf16.mxu1 %v7679_v24  ;;  %v7763_v23 = vld [vmem:[#allocation6 + $0x8c] ss:$16 sps:$4 sm:$0xff]   ;;  %v7758_v24 = vld [vmem:[#allocation6 + $0x80] ss:$16 sps:$4 sm:$0xff]  }
 0x293   :  { %4077 = vmatpush1.bf16.msra.mxu0 %v7674_v25  ;;  %4507 = vmatpush1.bf16.msra.mxu1 %v7677_v26  ;;  %v7761_v25 = vld [vmem:[#allocation6 + $0x88] ss:$16 sps:$4 sm:$0xff]   ;;  %v7766_v26 = vld [vmem:[#allocation6 + $0xa4] ss:$16 sps:$4 sm:$0xff]  }
 0x294   :  { %4078 = vmatprep.subr.bf16.mxu0 %v7682_v27  ;;  %4508 = vmatprep.subr.bf16.mxu1 %v7685_v28  ;;  %v7769_v27 = vld [vmem:[#allocation6 + $0xac] ss:$16 sps:$4 sm:$0xff]   ;;  %v7764_v28 = vld [vmem:[#allocation6 + $0xa0] ss:$16 sps:$4 sm:$0xff]  }
 0x297   :  { %4079 = vmatpush1.bf16.msra.mxu0 %v7680_v29  ;;  %4509 = vmatpush1.bf16.msra.mxu1 %v7683_v30  ;;  %v7767_v29 = vld [vmem:[#allocation6 + $0xa8] ss:$16 sps:$4 sm:$0xff]   ;;  %v7772_v30 = vld [vmem:[#allocation6 + $0xc4] ss:$16 sps:$4 sm:$0xff]  }
 0x298   :  { %4080 = vmatprep.subr.bf16.mxu0 %v7688_v31  ;;  %4510 = vmatprep.subr.bf16.mxu1 %v7691_v32  ;;  %v7775_v31 = vld [vmem:[#allocation6 + $0xcc] ss:$16 sps:$4 sm:$0xff]   ;;  %v7770_v32 = vld [vmem:[#allocation6 + $0xc0] ss:$16 sps:$4 sm:$0xff]  }
 0x29b   :  { %4081 = vmatpush1.bf16.msra.mxu0 %v7686_v33  ;;  %4511 = vmatpush1.bf16.msra.mxu1 %v7689_v34  ;;  %v7773_v33 = vld [vmem:[#allocation6 + $0xc8] ss:$16 sps:$4 sm:$0xff]   ;;  %v7778_v34 = vld [vmem:[#allocation6 + $0xe4] ss:$16 sps:$4 sm:$0xff]  }
 0x29c   :  { %4082 = vmatprep.subr.bf16.mxu0 %v7694_v35  ;;  %4512 = vmatprep.subr.bf16.mxu1 %v7697_v36  ;;  %v7781_v35 = vld [vmem:[#allocation6 + $0xec] ss:$16 sps:$4 sm:$0xff]   ;;  %v7776_v36 = vld [vmem:[#allocation6 + $0xe0] ss:$16 sps:$4 sm:$0xff]  }
 0x29f   :  { %4083 = vmatpush1.bf16.msra.mxu0 %v7692_v37  ;;  %4513 = vmatpush1.bf16.msra.mxu1 %v7695_v38  ;;  %v7779_v37 = vld [vmem:[#allocation6 + $0xe8] ss:$16 sps:$4 sm:$0xff]   ;;  %v7784_v38 = vld [vmem:[#allocation6 + $0x104] ss:$16 sps:$4 sm:$0xff]  }
 0x2a0   :  { %4084 = vmatprep.subr.bf16.mxu0 %v7700_v39  ;;  %4514 = vmatprep.subr.bf16.mxu1 %v7703_v40  ;;  %v7787_v39 = vld [vmem:[#allocation6 + $0x10c] ss:$16 sps:$4 sm:$0xff]   ;;  %v7782_v40 = vld [vmem:[#allocation6 + $0x100] ss:$16 sps:$4 sm:$0xff]  }
 0x2a3   :  { %4085 = vmatpush1.bf16.msra.mxu0 %v7698_v41  ;;  %4515 = vmatpush1.bf16.msra.mxu1 %v7701_v42  ;;  %v7785_v41 = vld [vmem:[#allocation6 + $0x108] ss:$16 sps:$4 sm:$0xff]   ;;  %v7790_v42 = vld [vmem:[#allocation6 + $0x124] ss:$16 sps:$4 sm:$0xff]  }
 0x2a4   :  { %4086 = vmatprep.subr.bf16.mxu0 %v7706_v43  ;;  %4516 = vmatprep.subr.bf16.mxu1 %v7709_v44  ;;  %v7793_v43 = vld [vmem:[#allocation6 + $0x12c] ss:$16 sps:$4 sm:$0xff]   ;;  %v7788_v44 = vld [vmem:[#allocation6 + $0x120] ss:$16 sps:$4 sm:$0xff]  }
 0x2a7   :  { %4087 = vmatpush1.bf16.msra.mxu0 %v7704_v45  ;;  %4517 = vmatpush1.bf16.msra.mxu1 %v7707_v46  ;;  %v7791_v45 = vld [vmem:[#allocation6 + $0x128] ss:$16 sps:$4 sm:$0xff]   ;;  %v7796_v46 = vld [vmem:[#allocation6 + $0x144] ss:$16 sps:$4 sm:$0xff]  }
 0x2a8   :  { %4088 = vmatprep.subr.bf16.mxu0 %v7712_v47  ;;  %4518 = vmatprep.subr.bf16.mxu1 %v7715_v48  ;;  %v7799_v47 = vld [vmem:[#allocation6 + $0x14c] ss:$16 sps:$4 sm:$0xff]   ;;  %v7794_v48 = vld [vmem:[#allocation6 + $0x140] ss:$16 sps:$4 sm:$0xff]  }
 0x2ab   :  { %4089 = vmatpush1.bf16.msra.mxu0 %v7710_v49  ;;  %4519 = vmatpush1.bf16.msra.mxu1 %v7713_v50  ;;  %v7797_v49 = vld [vmem:[#allocation6 + $0x148] ss:$16 sps:$4 sm:$0xff]   ;;  %v7802_v50 = vld [vmem:[#allocation6 + $0x164] ss:$16 sps:$4 sm:$0xff]  }
 0x2ac   :  { %4101 = vmatprep.subr.bf16.mxu0 %v7718_v53  ;;  %4531 = vmatprep.subr.bf16.mxu1 %v7721_v54  ;;  %v7803_v53 = vld [vmem:[#allocation6 + $0x168] ss:$16 sps:$4 sm:$0xff]   ;;  %v7808_v54 = vld [vmem:[#allocation6 + $0x184] ss:$16 sps:$4 sm:$0xff]  }
 0x2ae   :  { %4091 = vmatmul.mubr.bf16.vlgmr.msra.gmra.mrb[0].mxu0 %v157_v55  ;;  %4521 = vmatmul.mubr.bf16.vlgmr.msra.gmra.mrb[0].mxu1 %v157_v55  ;;  %v7811_v55 = vld [vmem:[#allocation6 + $0x18c] ss:$16 sps:$4 sm:$0xff]  }
 0x2af   :  { %4102 = vmatpush1.bf16.msra.mxu0 %v7716_v56  ;;  %4532 = vmatpush1.bf16.msra.mxu1 %v7719_v57  ;;  %v7806_v56 = vld [vmem:[#allocation6 + $0x180] ss:$16 sps:$4 sm:$0xff]   ;;  %v7809_v57 = vld [vmem:[#allocation6 + $0x188] ss:$16 sps:$4 sm:$0xff]  }
 0x2b0   :  { %4103 = vmatprep.subr.bf16.mxu0 %v7724_v58  ;;  %4533 = vmatprep.subr.bf16.mxu1 %v7727_v59  ;;  %v7814_v58 = vld [vmem:[#allocation6 + $0x1a4] ss:$16 sps:$4 sm:$0xff]   ;;  %v7817_v59 = vld [vmem:[#allocation6 + $0x1ac] ss:$16 sps:$4 sm:$0xff]  }
 0x2b1   :  { %4133 = vmatprep.mubr.bf16.mxu0 %v8116_v0  ;;  %4563 = vmatprep.mubr.bf16.mxu1 %v8116_v0  ;;  %v7818_v0 = vld [vmem:[#allocation6 + $0x1c0] ss:$16 sps:$4 sm:$0xff]  }
 0x2b3   :  { %4104 = vmatpush1.bf16.msra.mxu0 %v7722_v60  ;;  %4534 = vmatpush1.bf16.msra.mxu1 %v7725_v61  ;;  %v7812_v60 = vld [vmem:[#allocation6 + $0x1a0] ss:$16 sps:$4 sm:$0xff]   ;;  %v7815_v61 = vld [vmem:[#allocation6 + $0x1a8] ss:$16 sps:$4 sm:$0xff]  }
 0x2b4   :  { %4105 = vmatprep.subr.bf16.mxu0 %v7730_v62  ;;  %4535 = vmatprep.subr.bf16.mxu1 %v7733_v63  ;;  %v7820_v62 = vld [vmem:[#allocation6 + $0x1c4] ss:$16 sps:$4 sm:$0xff]   ;;  %v7823_v63 = vld [vmem:[#allocation6 + $0x1cc] ss:$16 sps:$4 sm:$0xff]  }
 0x2b7   :  { %4106 = vmatpush1.bf16.msra.mxu0 %v7728_v1  ;;  %4536 = vmatpush1.bf16.msra.mxu1 %v7731_v2  ;;  %v7821_v1 = vld [vmem:[#allocation6 + $0x1c8] ss:$16 sps:$4 sm:$0xff]   ;;  %v7826_v2 = vld [vmem:[#allocation6 + $0x1e4] ss:$16 sps:$4 sm:$0xff]  }
 0x2b8   :  { %5376 = vmatprep.subr.bf16.mxu0 %v7736_v5  ;;  %5462 = vmatprep.subr.bf16.mxu1 %v7739_v6  ;;  %v7827_v5 = vld [vmem:[#allocation6 + $0x1e8] ss:$16 sps:$4 sm:$0xff]   ;;  %v7832_v6 = vld [vmem:[#allocation6 + $0x204] ss:$16 sps:$4 sm:$0xff]  }
 0x2ba   :  { %6529 = vmatmul.mubr.msk.bf16.vlgmr.msra.gmra.mrb[0].mxu0 %vm3710_vm0, %v159_v7  ;;  %6530 = vmatmul.mubr.msk.bf16.vlgmr.msra.gmra.mrb[0].mxu1 %vm3710_vm0, %v159_v7  ;;  %v7835_v7 = vld [vmem:[#allocation6 + $0x20c] ss:$16 sps:$4 sm:$0xff]  }
 0x2bb   :  { %5377 = vmatpush1.bf16.msra.mxu0 %v7734_v8  ;;  %5463 = vmatpush1.bf16.msra.mxu1 %v7737_v9  ;;  %v750_v8 = vlaneseq }
 0x2bc   :  { %5378 = vmatprep.subr.bf16.mxu0 %v7742_v10  ;;  %5464 = vmatprep.subr.bf16.mxu1 %v7745_v11 }
 0x2bd   :  { %v8343_v9 = vshrl.u32 %v750_v8, 7  ;;  %v7869_v8 = vld [vmem:[#allocation6 + $0x2c8] ss:$16 sps:$4 sm:$0xff]  }
 0x2bf   :  { %5379 = vmatpush1.bf16.msra.mxu0 %v7740_v12  ;;  %5465 = vmatpush1.bf16.msra.mxu1 %v7743_v13  ;;  %v752_v10 = vsub.s32 0, %v8343_v9  ;;  %v760_v11 = vsub.s32 2, %v8343_v9  ;;  %v748_v12 = vld [vmem:[#allocation4] sm:$0xf]  ;;  %v756_v13 = vsub.s32 1, %v8343_v9 }
 0x2c0   :  { %5380 = vmatprep.subr.bf16.mxu0 %v7748_v14  ;;  %5466 = vmatprep.subr.bf16.mxu1 %v7751_v15  ;;  %v764_v14 = vsub.s32 3, %v8343_v9 }
 0x2c1   :  { %v753_v15 = vrot.slane %v748_v12, %v752_v10 }
 0x2c3   :  { %5381 = vmatpush1.bf16.msra.mxu0 %v7746_v16  ;;  %5467 = vmatpush1.bf16.msra.mxu1 %v7749_v17  ;;  %v761_v16 = vrot.slane %v748_v12, %v760_v11  ;;  %v757_v17 = vrot.slane %v748_v12, %v756_v13 }
 0x2c4   :  { %5382 = vmatprep.subr.bf16.mxu0 %v7754_v18  ;;  %5468 = vmatprep.subr.bf16.mxu1 %v7757_v19  ;;  %v765_v18 = vrot.slane %v748_v12, %v764_v14  ;;  %v7874_v12 = vld [vmem:[#allocation6 + $0x2e4] ss:$16 sps:$4 sm:$0xff]  }
 0x2c7   :  { %5383 = vmatpush1.bf16.msra.mxu0 %v7752_v20  ;;  %5469 = vmatpush1.bf16.msra.mxu1 %v7755_v21 }
 0x2c8   :  { %5384 = vmatprep.subr.bf16.mxu0 %v7760_v22  ;;  %5470 = vmatprep.subr.bf16.mxu1 %v7763_v23 }
 0x2cb   :  { %5385 = vmatpush1.bf16.msra.mxu0 %v7758_v24  ;;  %5471 = vmatpush1.bf16.msra.mxu1 %v7761_v25 }
 0x2cc   :  { %5386 = vmatprep.subr.bf16.mxu0 %v7766_v26  ;;  %5472 = vmatprep.subr.bf16.mxu1 %v7769_v27 }
 0x2cf   :  { %5387 = vmatpush1.bf16.msra.mxu0 %v7764_v28  ;;  %5473 = vmatpush1.bf16.msra.mxu1 %v7767_v29 }
 0x2d0   :  { %5388 = vmatprep.subr.bf16.mxu0 %v7772_v30  ;;  %5474 = vmatprep.subr.bf16.mxu1 %v7775_v31 }
 0x2d3   :  { %5389 = vmatpush1.bf16.msra.mxu0 %v7770_v32  ;;  %5475 = vmatpush1.bf16.msra.mxu1 %v7773_v33 }
 0x2d4   :  { %5390 = vmatprep.subr.bf16.mxu0 %v7778_v34  ;;  %5476 = vmatprep.subr.bf16.mxu1 %v7781_v35 }
 0x2d7   :  { %5391 = vmatpush1.bf16.msra.mxu0 %v7776_v36  ;;  %5477 = vmatpush1.bf16.msra.mxu1 %v7779_v37 }
 0x2d8   :  { %5392 = vmatprep.subr.bf16.mxu0 %v7784_v38  ;;  %5478 = vmatprep.subr.bf16.mxu1 %v7787_v39 }
 0x2db   :  { %5393 = vmatpush1.bf16.msra.mxu0 %v7782_v40  ;;  %5479 = vmatpush1.bf16.msra.mxu1 %v7785_v41 }
 0x2dc   :  { %5394 = vmatprep.subr.bf16.mxu0 %v7790_v42  ;;  %5480 = vmatprep.subr.bf16.mxu1 %v7793_v43 }
 0x2df   :  { %5395 = vmatpush1.bf16.msra.mxu0 %v7788_v44  ;;  %5481 = vmatpush1.bf16.msra.mxu1 %v7791_v45 }
 0x2e0   :  { %5396 = vmatprep.subr.bf16.mxu0 %v7796_v46  ;;  %5482 = vmatprep.subr.bf16.mxu1 %v7799_v47  ;;  %v7830_v47 = vld [vmem:[#allocation6 + $0x200] ss:$16 sps:$4 sm:$0xff]  }
 0x2e3   :  { %5397 = vmatpush1.bf16.msra.mxu0 %v7794_v48  ;;  %5483 = vmatpush1.bf16.msra.mxu1 %v7797_v49  ;;  %v7833_v48 = vld [vmem:[#allocation6 + $0x208] ss:$16 sps:$4 sm:$0xff]   ;;  %v7838_v49 = vld [vmem:[#allocation6 + $0x224] ss:$16 sps:$4 sm:$0xff]  }
 0x2e4   :  { %5398 = vmatprep.subr.bf16.mxu0 %v7802_v50  ;;  %5484 = vmatprep.subr.bf16.mxu1 %v7805_v51  ;;  %v7841_v50 = vld [vmem:[#allocation6 + $0x22c] ss:$16 sps:$4 sm:$0xff]   ;;  %v7836_v51 = vld [vmem:[#allocation6 + $0x220] ss:$16 sps:$4 sm:$0xff]  }
 0x2e7   :  { %5399 = vmatpush1.bf16.msra.mxu0 %v7800_v52  ;;  %5485 = vmatpush1.bf16.msra.mxu1 %v7803_v53  ;;  %v7839_v52 = vld [vmem:[#allocation6 + $0x228] ss:$16 sps:$4 sm:$0xff]   ;;  %v7844_v53 = vld [vmem:[#allocation6 + $0x244] ss:$16 sps:$4 sm:$0xff]  }
 0x2e8   :  { %5400 = vmatprep.subr.bf16.mxu0 %v7808_v54  ;;  %5486 = vmatprep.subr.bf16.mxu1 %v7811_v55  ;;  %v7847_v54 = vld [vmem:[#allocation6 + $0x24c] ss:$16 sps:$4 sm:$0xff]   ;;  %v7842_v55 = vld [vmem:[#allocation6 + $0x240] ss:$16 sps:$4 sm:$0xff]  }
 0x2eb   :  { %5401 = vmatpush1.bf16.msra.mxu0 %v7806_v56  ;;  %5487 = vmatpush1.bf16.msra.mxu1 %v7809_v57  ;;  %v7845_v56 = vld [vmem:[#allocation6 + $0x248] ss:$16 sps:$4 sm:$0xff]   ;;  %v7850_v57 = vld [vmem:[#allocation6 + $0x264] ss:$16 sps:$4 sm:$0xff]  }
 0x2ec   :  { %5402 = vmatprep.subr.bf16.mxu0 %v7814_v58  ;;  %5488 = vmatprep.subr.bf16.mxu1 %v7817_v59  ;;  %v7853_v58 = vld [vmem:[#allocation6 + $0x26c] ss:$16 sps:$4 sm:$0xff]   ;;  %v7848_v59 = vld [vmem:[#allocation6 + $0x260] ss:$16 sps:$4 sm:$0xff]  }
 0x2ef   :  { %5403 = vmatpush1.bf16.msra.mxu0 %v7812_v60  ;;  %5489 = vmatpush1.bf16.msra.mxu1 %v7815_v61  ;;  %v7851_v60 = vld [vmem:[#allocation6 + $0x268] ss:$16 sps:$4 sm:$0xff]   ;;  %v7856_v61 = vld [vmem:[#allocation6 + $0x284] ss:$16 sps:$4 sm:$0xff]  }
 0x2f0   :  { %5404 = vmatprep.subr.bf16.mxu0 %v7820_v62  ;;  %5490 = vmatprep.subr.bf16.mxu1 %v7823_v63  ;;  %v7859_v62 = vld [vmem:[#allocation6 + $0x28c] ss:$16 sps:$4 sm:$0xff]   ;;  %v7854_v63 = vld [vmem:[#allocation6 + $0x280] ss:$16 sps:$4 sm:$0xff]  }
 0x2f3   :  { %5405 = vmatpush1.bf16.msra.mxu0 %v7818_v0  ;;  %5491 = vmatpush1.bf16.msra.mxu1 %v7821_v1  ;;  %v7857_v0 = vld [vmem:[#allocation6 + $0x288] ss:$16 sps:$4 sm:$0xff]   ;;  %v7862_v1 = vld [vmem:[#allocation6 + $0x2a4] ss:$16 sps:$4 sm:$0xff]  }
 0x2f4   :  { %5406 = vmatprep.subr.bf16.mxu0 %v7826_v2  ;;  %5492 = vmatprep.subr.bf16.mxu1 %v7829_v3  ;;  %v7865_v2 = vld [vmem:[#allocation6 + $0x2ac] ss:$16 sps:$4 sm:$0xff]   ;;  %v7860_v3 = vld [vmem:[#allocation6 + $0x2a0] ss:$16 sps:$4 sm:$0xff]  }
 0x2f7   :  { %5407 = vmatpush1.bf16.msra.mxu0 %v7824_v4  ;;  %5493 = vmatpush1.bf16.msra.mxu1 %v7827_v5  ;;  %v7863_v4 = vld [vmem:[#allocation6 + $0x2a8] ss:$16 sps:$4 sm:$0xff]   ;;  %v7868_v5 = vld [vmem:[#allocation6 + $0x2c4] ss:$16 sps:$4 sm:$0xff]  }
 0x2f8   :  { %5419 = vmatprep.subr.bf16.mxu0 %v7832_v6  ;;  %5505 = vmatprep.subr.bf16.mxu1 %v7835_v7  ;;  %v7871_v6 = vld [vmem:[#allocation6 + $0x2cc] ss:$16 sps:$4 sm:$0xff]   ;;  %v7866_v7 = vld [vmem:[#allocation6 + $0x2c0] ss:$16 sps:$4 sm:$0xff]  }
 0x38d   :  { %v4135_v19 = vpop.f32.mrb[0].mxu0  ;;  %v4565_v20 = vpop.f32.mrb[0].mxu1 }
 0x38e   :  { %v6745_v21 = vadd.f32 %v4135_v19, %v753_v15  ;;  %v6749_v22 = vadd.f32 %v4565_v20, %v761_v16  ;;  %v4137_v23 = vpop.f32.mrb[1].mxu0  ;;  %v4567_v24 = vpop.f32.mrb[1].mxu1  ;;  %v7883_v19 = vld [vmem:[#allocation6 + $0x30c] ss:$16 sps:$4 sm:$0xff]   ;;  %v7878_v20 = vld [vmem:[#allocation6 + $0x300] ss:$16 sps:$4 sm:$0xff]  }
 0x38f   :  { %v6746_v25 = vadd.f32 %v4137_v23, %v757_v17  ;;  %v6750_v26 = vadd.f32 %v4567_v24, %v765_v18  ;;  %v4139_v27 = vpop.f32.mrb[2].mxu0  ;;  %v4569_v28 = vpop.f32.mrb[2].mxu1  ;;  %v7889_v23 = vld [vmem:[#allocation6 + $0x32c] ss:$16 sps:$4 sm:$0xff]   ;;  %v7884_v24 = vld [vmem:[#allocation6 + $0x320] ss:$16 sps:$4 sm:$0xff]  }
 0x390   :  { %v6747_v29 = vadd.f32 %v4139_v27, %v753_v15  ;;  %v6751_v30 = vadd.f32 %v4569_v28, %v761_v16  ;;  %v4141_v31 = vpop.f32.mrb[3].mxu0  ;;  %v4571_v32 = vpop.f32.mrb[3].mxu1  ;;  %v4574_v35 = vmax.f32 %v6745_v21, 0.0  ;;  %v4576_v36 = vmax.f32 %v6749_v22, 0.0  ;;  %v7877_v15 = vld [vmem:[#allocation6 + $0x2ec] ss:$16 sps:$4 sm:$0xff]  }
 0x391   :  { %v6748_v33 = vadd.f32 %v4141_v31, %v757_v17  ;;  %v6752_v34 = vadd.f32 %v4571_v32, %v765_v18  ;;  %v4575_v39 = vmax.f32 %v6746_v25, 0.0  ;;  %v4577_v40 = vmax.f32 %v6750_v26, 0.0  ;;  %v7872_v16 = vld [vmem:[#allocation6 + $0x2e0] ss:$16 sps:$4 sm:$0xff]   ;;  %v7875_v17 = vld [vmem:[#allocation6 + $0x2e8] ss:$16 sps:$4 sm:$0xff]  }
 0x392   :  { %v4578_v37 = vmax.f32 %v6747_v29, 0.0  ;;  %v4580_v38 = vmax.f32 %v6751_v30, 0.0  ;;  %v7880_v18 = vld [vmem:[#allocation6 + $0x304] ss:$16 sps:$4 sm:$0xff]   ;;  %v7881_v21 = vld [vmem:[#allocation6 + $0x308] ss:$16 sps:$4 sm:$0xff]  }
 0x393   :  { %v4579_v41 = vmax.f32 %v6748_v33, 0.0  ;;  %v4581_v42 = vmax.f32 %v6752_v34, 0.0  ;;  %v7886_v22 = vld [vmem:[#allocation6 + $0x324] ss:$16 sps:$4 sm:$0xff]   ;;  %v7887_v25 = vld [vmem:[#allocation6 + $0x328] ss:$16 sps:$4 sm:$0xff]  }
 0x394   :  { %v4582_v43 = vpack.c.bf16 %v4578_v37, %v4574_v35  ;;  %v8357_v44 = vpack.c.bf16 %v4580_v38, %v4576_v36  ;;  %v7892_v26 = vld [vmem:[#allocation6 + $0x344] ss:$16 sps:$4 sm:$0xff]   ;;  %v7895_v27 = vld [vmem:[#allocation6 + $0x34c] ss:$16 sps:$4 sm:$0xff]   ;;  %v7890_v28 = vld [vmem:[#allocation6 + $0x340] ss:$16 sps:$4 sm:$0xff]  }
 0x395   :  { %v4583_v45 = vpack.c.bf16 %v4579_v41, %v4575_v39  ;;  %v4585_v46 = vpack.c.bf16 %v4581_v42, %v4577_v40  ;;  %v7893_v29 = vld [vmem:[#allocation6 + $0x348] ss:$16 sps:$4 sm:$0xff]   ;;  %v7898_v30 = vld [vmem:[#allocation6 + $0x364] ss:$16 sps:$4 sm:$0xff]   ;;  %v7901_v31 = vld [vmem:[#allocation6 + $0x36c] ss:$16 sps:$4 sm:$0xff]  }
 0x396   :  { %v7896_v32 = vld [vmem:[#allocation6 + $0x360] ss:$16 sps:$4 sm:$0xff]   ;;  %v7899_v33 = vld [vmem:[#allocation6 + $0x368] ss:$16 sps:$4 sm:$0xff]   ;;  %v7904_v34 = vld [vmem:[#allocation6 + $0x384] ss:$16 sps:$4 sm:$0xff]  }
 0x397   :  { %5408 = vmatprep.mubr.bf16.mxu0 %v4583_v45  ;;  %5494 = vmatprep.mubr.bf16.mxu1 %v4583_v45  ;;  %v7907_v35 = vld [vmem:[#allocation6 + $0x38c] ss:$16 sps:$4 sm:$0xff]   ;;  %v7902_v36 = vld [vmem:[#allocation6 + $0x380] ss:$16 sps:$4 sm:$0xff]   ;;  %v7905_v37 = vld [vmem:[#allocation6 + $0x388] ss:$16 sps:$4 sm:$0xff]  }
 0x398   :  { %5409 = vmatmul.mubr.bf16.vlgmr.msra.gmra.mrb[4].mxu0 %v4582_v43  ;;  %5495 = vmatmul.mubr.bf16.vlgmr.msra.gmra.mrb[4].mxu1 %v4582_v43  ;;  %v7910_v38 = vld [vmem:[#allocation6 + $0x3a4] ss:$16 sps:$4 sm:$0xff]   ;;  %v7913_v39 = vld [vmem:[#allocation6 + $0x3ac] ss:$16 sps:$4 sm:$0xff]   ;;  %v7908_v40 = vld [vmem:[#allocation6 + $0x3a0] ss:$16 sps:$4 sm:$0xff]  }
 0x399   :  { %5420 = vmatpush1.bf16.msra.mxu0 %v7830_v47  ;;  %5506 = vmatpush1.bf16.msra.mxu1 %v7833_v48  ;;  %v7911_v41 = vld [vmem:[#allocation6 + $0x3a8] ss:$16 sps:$4 sm:$0xff]   ;;  %v7916_v42 = vld [vmem:[#allocation6 + $0x3c4] ss:$16 sps:$4 sm:$0xff]   ;;  %v7919_v43 = vld [vmem:[#allocation6 + $0x3cc] ss:$16 sps:$4 sm:$0xff]  }
 0x39a   :  { %5451 = vmatprep.mubr.bf16.mxu0 %v4585_v46  ;;  %5537 = vmatprep.mubr.bf16.mxu1 %v4585_v46  ;;  %v7914_v45 = vld [vmem:[#allocation6 + $0x3c0] ss:$16 sps:$4 sm:$0xff]   ;;  %v7917_v46 = vld [vmem:[#allocation6 + $0x3c8] ss:$16 sps:$4 sm:$0xff]   ;;  %v7922_v47 = vld [vmem:[#allocation6 + $0x3e4] ss:$16 sps:$4 sm:$0xff]  }
 0x39b   :  { %5421 = vmatprep.subr.bf16.mxu0 %v7838_v49  ;;  %5507 = vmatprep.subr.bf16.mxu1 %v7841_v50  ;;  %v7925_v48 = vld [vmem:[#allocation6 + $0x3ec] ss:$16 sps:$4 sm:$0xff]   ;;  %v7920_v49 = vld [vmem:[#allocation6 + $0x3e0] ss:$16 sps:$4 sm:$0xff]   ;;  %v7923_v50 = vld [vmem:[#allocation6 + $0x3e8] ss:$16 sps:$4 sm:$0xff]  }
 0x39d   :  { %5422 = vmatpush1.bf16.msra.mxu0 %v7836_v51  ;;  %5508 = vmatpush1.bf16.msra.mxu1 %v7839_v52  ;;  %v7926_v51 = vld [vmem:[#allocation9 + $0x40] sm:$0xff]  }
 0x39e   :  { %5423 = vmatprep.subr.bf16.mxu0 %v7844_v53  ;;  %5509 = vmatprep.subr.bf16.mxu1 %v7847_v54  ;;  %v7927_v52 = vld [vmem:[#allocation9 + $0xc0] sm:$0xff]  }
 0x39f   :  { %v7928_v53 = vld [vmem:[#allocation9] sm:$0xff]  }
 0x3a0   :  { %v7929_v54 = vld [vmem:[#allocation9 + $0x80] sm:$0xff]  }
 0x3a1   :  { %5424 = vmatpush1.bf16.msra.mxu0 %v7842_v55  ;;  %5510 = vmatpush1.bf16.msra.mxu1 %v7845_v56  ;;  %v7930_v55 = vld [vmem:[#allocation9 + $0x48] sm:$0xff]  }
 0x3a2   :  { %5425 = vmatprep.subr.bf16.mxu0 %v7850_v57  ;;  %5511 = vmatprep.subr.bf16.mxu1 %v7853_v58  ;;  %v7931_v56 = vld [vmem:[#allocation9 + $0xc8] sm:$0xff]  }
 0x3a3   :  { %v7932_v57 = vld [vmem:[#allocation9 + $0x8] sm:$0xff]  }
 0x3a4   :  { %v7933_v58 = vld [vmem:[#allocation9 + $0x88] sm:$0xff]  }
 0x3a5   :  { %5426 = vmatpush1.bf16.msra.mxu0 %v7848_v59  ;;  %5512 = vmatpush1.bf16.msra.mxu1 %v7851_v60  ;;  %v7934_v59 = vld [vmem:[#allocation9 + $0x50] sm:$0xff]  }
 0x3a6   :  { %5427 = vmatprep.subr.bf16.mxu0 %v7856_v61  ;;  %5513 = vmatprep.subr.bf16.mxu1 %v7859_v62  ;;  %v7935_v60 = vld [vmem:[#allocation9 + $0xd0] sm:$0xff]  }
 0x3a7   :  { %v7936_v61 = vld [vmem:[#allocation9 + $0x10] sm:$0xff]  }
 0x3a8   :  { %v7937_v62 = vld [vmem:[#allocation9 + $0x90] sm:$0xff]  }
 0x3a9   :  { %5428 = vmatpush1.bf16.msra.mxu0 %v7854_v63  ;;  %5514 = vmatpush1.bf16.msra.mxu1 %v7857_v0  ;;  %v7938_v63 = vld [vmem:[#allocation9 + $0x58] sm:$0xff]  }
 0x3aa   :  { %5429 = vmatprep.subr.bf16.mxu0 %v7862_v1  ;;  %5515 = vmatprep.subr.bf16.mxu1 %v7865_v2  ;;  %v7939_v0 = vld [vmem:[#allocation9 + $0xd8] sm:$0xff]   ;;  %v7942_v2 = vld [vmem:[#allocation9 + $0x60] sm:$0xff]  }
 0x3ab   :  { %v7940_v1 = vld [vmem:[#allocation9 + $0x18] sm:$0xff]  }
 0x3ad   :  { %5430 = vmatpush1.bf16.msra.mxu0 %v7860_v3  ;;  %5516 = vmatpush1.bf16.msra.mxu1 %v7863_v4  ;;  %v7943_v3 = vld [vmem:[#allocation9 + $0xe0] sm:$0xff]  }
 0x3ae   :  { %5431 = vmatprep.subr.bf16.mxu0 %v7868_v5  ;;  %5517 = vmatprep.subr.bf16.mxu1 %v7871_v6  ;;  %v7944_v4 = vld [vmem:[#allocation9 + $0x20] sm:$0xff]   ;;  %v7946_v6 = vld [vmem:[#allocation9 + $0x68] sm:$0xff]  }
 0x3af   :  { %v7945_v5 = vld [vmem:[#allocation9 + $0xa0] sm:$0xff]  }
 0x3b1   :  { %5432 = vmatpush1.bf16.msra.mxu0 %v7866_v7  ;;  %5518 = vmatpush1.bf16.msra.mxu1 %v7869_v8  ;;  %v7947_v7 = vld [vmem:[#allocation9 + $0xe8] sm:$0xff]  }
 0x3b2   :  { %5433 = vmatprep.subr.bf16.mxu0 %v7874_v12  ;;  %5519 = vmatprep.subr.bf16.mxu1 %v7877_v15  ;;  %v7948_v8 = vld [vmem:[#allocation9 + $0x28] sm:$0xff]   ;;  %v7950_v15 = vld [vmem:[#allocation9 + $0x70] sm:$0xff]  }
 0x3b3   :  { %v7949_v12 = vld [vmem:[#allocation9 + $0xa8] sm:$0xff]  }
 0x3b5   :  { %5434 = vmatpush1.bf16.msra.mxu0 %v7872_v16  ;;  %5520 = vmatpush1.bf16.msra.mxu1 %v7875_v17  ;;  %v7951_v16 = vld [vmem:[#allocation9 + $0xf0] sm:$0xff]  }
 0x3b6   :  { %5435 = vmatprep.subr.bf16.mxu0 %v7880_v18  ;;  %5521 = vmatprep.subr.bf16.mxu1 %v7883_v19  ;;  %v7952_v17 = vld [vmem:[#allocation9 + $0x30] sm:$0xff]   ;;  %v7954_v19 = vld [vmem:[#allocation9 + $0x78] sm:$0xff]  }
 0x3b7   :  { %v7953_v18 = vld [vmem:[#allocation9 + $0xb0] sm:$0xff]  }
 0x3b9   :  { %5436 = vmatpush1.bf16.msra.mxu0 %v7878_v20  ;;  %5522 = vmatpush1.bf16.msra.mxu1 %v7881_v21  ;;  %v7955_v20 = vld [vmem:[#allocation9 + $0xf8] sm:$0xff]  }
 0x3ba   :  { %5437 = vmatprep.subr.bf16.mxu0 %v7886_v22  ;;  %5523 = vmatprep.subr.bf16.mxu1 %v7889_v23  ;;  %v7956_v21 = vld [vmem:[#allocation9 + $0x38] sm:$0xff]  }
 0x3bb   :  { %v7957_v22 = vld [vmem:[#allocation9 + $0xb8] sm:$0xff]  }
 0x3bc   :  { %v4714_v23 = vld [vmem:[#allocation7] sm:$0xf] }
 0x3bd   :  { %5438 = vmatpush1.bf16.msra.mxu0 %v7884_v24  ;;  %5524 = vmatpush1.bf16.msra.mxu1 %v7887_v25  ;;  %v4719_v24 = vrot.slane %v4714_v23, %v752_v10  ;;  %v4727_v25 = vrot.slane %v4714_v23, %v760_v11 }
 0x3be   :  { %5439 = vmatprep.subr.bf16.mxu0 %v7892_v26  ;;  %5525 = vmatprep.subr.bf16.mxu1 %v7895_v27  ;;  %v4723_v26 = vrot.slane %v4714_v23, %v756_v13  ;;  %v4731_v27 = vrot.slane %v4714_v23, %v764_v14 }
 0x3c1   :  { %5440 = vmatpush1.bf16.msra.mxu0 %v7890_v28  ;;  %5526 = vmatpush1.bf16.msra.mxu1 %v7893_v29 }
 0x3c2   :  { %5441 = vmatprep.subr.bf16.mxu0 %v7898_v30  ;;  %5527 = vmatprep.subr.bf16.mxu1 %v7901_v31 }
 0x3c5   :  { %5442 = vmatpush1.bf16.msra.mxu0 %v7896_v32  ;;  %5528 = vmatpush1.bf16.msra.mxu1 %v7899_v33 }
 0x3c6   :  { %5443 = vmatprep.subr.bf16.mxu0 %v7904_v34  ;;  %5529 = vmatprep.subr.bf16.mxu1 %v7907_v35 }
 0x3c9   :  { %5444 = vmatpush1.bf16.msra.mxu0 %v7902_v36  ;;  %5530 = vmatpush1.bf16.msra.mxu1 %v7905_v37 }
 0x3ca   :  { %5445 = vmatprep.subr.bf16.mxu0 %v7910_v38  ;;  %5531 = vmatprep.subr.bf16.mxu1 %v7913_v39 }
 0x3cd   :  { %5446 = vmatpush1.bf16.msra.mxu0 %v7908_v40  ;;  %5532 = vmatpush1.bf16.msra.mxu1 %v7911_v41 }
 0x3ce   :  { %5447 = vmatprep.subr.bf16.mxu0 %v7916_v42  ;;  %5533 = vmatprep.subr.bf16.mxu1 %v7919_v43 }
 0x3d1   :  { %5448 = vmatpush1.bf16.msra.mxu0 %v7914_v45  ;;  %5534 = vmatpush1.bf16.msra.mxu1 %v7917_v46 }
 0x3d2   :  { %5449 = vmatprep.subr.bf16.mxu0 %v7922_v47  ;;  %5535 = vmatprep.subr.bf16.mxu1 %v7925_v48 }
 0x3d5   :  { %5450 = vmatpush1.bf16.msra.mxu0 %v7920_v49  ;;  %5536 = vmatpush1.bf16.msra.mxu1 %v7923_v50 }
 0x3d6   :  { %6701 = vmatprep.subr.bf16.mxu0 %v7926_v51  ;;  %6723 = vmatprep.subr.bf16.mxu1 %v7927_v52 }
 0x3d8   :  { %5452 = vmatmul.mubr.bf16.vlgmr.msra.gmra.mrb[4].mxu0 %v8357_v44  ;;  %5538 = vmatmul.mubr.bf16.vlgmr.msra.gmra.mrb[4].mxu1 %v8357_v44  ;;  %v7941_v44 = vld [vmem:[#allocation9 + $0x98] sm:$0xff]  }
 0x3d9   :  { %6702 = vmatpush3.bf16.msra.mxu0 %v7928_v53  ;;  %6724 = vmatpush3.bf16.msra.mxu1 %v7929_v54  ;;  %v6659_v54 = vld [vmem:[#allocation10] ss:$0 sm:$0xff] }
 0x3da   :  { %6703 = vmatprep.subr.bf16.mxu0 %v7930_v55  ;;  %6725 = vmatprep.subr.bf16.mxu1 %v7931_v56 }
 0x3dd   :  { %6704 = vmatpush3.bf16.msra.mxu0 %v7932_v57  ;;  %6726 = vmatpush3.bf16.msra.mxu1 %v7933_v58 }
 0x3de   :  { %6705 = vmatprep.subr.bf16.mxu0 %v7934_v59  ;;  %6727 = vmatprep.subr.bf16.mxu1 %v7935_v60 }
 0x3e1   :  { %6706 = vmatpush3.bf16.msra.mxu0 %v7936_v61  ;;  %6728 = vmatpush3.bf16.msra.mxu1 %v7937_v62 }
 0x3e2   :  { %6707 = vmatprep.subr.bf16.mxu0 %v7938_v63  ;;  %6729 = vmatprep.subr.bf16.mxu1 %v7939_v0 }
 0x3e5   :  { %6708 = vmatpush3.bf16.msra.mxu0 %v7940_v1  ;;  %6730 = vmatpush3.bf16.msra.mxu1 %v7941_v44 }
 0x3e6   :  { %6709 = vmatprep.subr.bf16.mxu0 %v7942_v2  ;;  %6731 = vmatprep.subr.bf16.mxu1 %v7943_v3 }
 0x3e9   :  { %6710 = vmatpush3.bf16.msra.mxu0 %v7944_v4  ;;  %6732 = vmatpush3.bf16.msra.mxu1 %v7945_v5 }
 0x3ea   :  { %6711 = vmatprep.subr.bf16.mxu0 %v7946_v6  ;;  %6733 = vmatprep.subr.bf16.mxu1 %v7947_v7 }
 0x3ed   :  { %6712 = vmatpush3.bf16.msra.mxu0 %v7948_v8  ;;  %6734 = vmatpush3.bf16.msra.mxu1 %v7949_v12 }
 0x3ee   :  { %6713 = vmatprep.subr.bf16.mxu0 %v7950_v15  ;;  %6735 = vmatprep.subr.bf16.mxu1 %v7951_v16 }
 0x3f1   :  { %6714 = vmatpush3.bf16.msra.mxu0 %v7952_v17  ;;  %6736 = vmatpush3.bf16.msra.mxu1 %v7953_v18 }
 0x3f2   :  { %6715 = vmatprep.subr.bf16.mxu0 %v7954_v19  ;;  %6737 = vmatprep.subr.bf16.mxu1 %v7955_v20 }
 0x3f5   :  { %6716 = vmatpush3.bf16.msra.mxu0 %v7956_v21  ;;  %6738 = vmatpush3.bf16.msra.mxu1 %v7957_v22 }
 0x4ab   :  { %v5453_v28 = vpop.f32.mrb[4].mxu0  ;;  %v5539_v29 = vpop.f32.mrb[4].mxu1 }
 0x4ac   :  { %v6753_v30 = vadd.f32 %v5453_v28, %v4719_v24  ;;  %v6757_v31 = vadd.f32 %v5539_v29, %v4727_v25  ;;  %v5455_v32 = vpop.f32.mrb[5].mxu0  ;;  %v5541_v33 = vpop.f32.mrb[5].mxu1 }
 0x4ad   :  { %v6754_v34 = vadd.f32 %v5455_v32, %v4723_v26  ;;  %v6758_v35 = vadd.f32 %v5541_v33, %v4731_v27  ;;  %v5457_v36 = vpop.f32.mrb[6].mxu0  ;;  %v5543_v37 = vpop.f32.mrb[6].mxu1 }
 0x4ae   :  { %v6755_v10 = vadd.f32 %v5457_v36, %v4719_v24  ;;  %v6759_v38 = vadd.f32 %v5543_v37, %v4727_v25  ;;  %v5459_v39 = vpop.f32.mrb[7].mxu0  ;;  %v5545_v11 = vpop.f32.mrb[7].mxu1  ;;  %v5548_v13 = vmax.f32 %v6753_v30, 0.0  ;;  %v5550_v42 = vmax.f32 %v6757_v31, 0.0 }
 0x4af   :  { %v6756_v40 = vadd.f32 %v5459_v39, %v4723_v26  ;;  %v6760_v41 = vadd.f32 %v5545_v11, %v4731_v27  ;;  %v5549_v43 = vmax.f32 %v6754_v34, 0.0  ;;  %v5551_v45 = vmax.f32 %v6758_v35, 0.0 }
 0x4b0   :  { %v5552_v9 = vmax.f32 %v6755_v10, 0.0  ;;  %v5554_v14 = vmax.f32 %v6759_v38, 0.0 }
 0x4b1   :  { %v5553_v46 = vmax.f32 %v6756_v40, 0.0  ;;  %v5555_v47 = vmax.f32 %v6760_v41, 0.0 }
 0x4b2   :  { %v5556_v48 = vpack.c.bf16 %v5552_v9, %v5548_v13  ;;  %v5558_v49 = vpack.c.bf16 %v5554_v14, %v5550_v42 }
 0x4b3   :  { %v5557_v50 = vpack.c.bf16 %v5553_v46, %v5549_v43  ;;  %v5559_v51 = vpack.c.bf16 %v5555_v47, %v5551_v45 }
 0x4b5   :  { %5855 = vmatprep.mubr.bf16.mxu0 %v5557_v50  ;;  %5896 = vmatprep.mubr.bf16.mxu1 %v5559_v51 }
 0x4b6   :  { %5856 = vmatmul.mubr.bf16.vlgmr.msra.gmra.mrb[8].mxu0 %v5556_v48  ;;  %5897 = vmatmul.mubr.bf16.vlgmr.msra.gmra.mrb[8].mxu1 %v5558_v49 }
 0x589   :  { %v6717_v52 = vpop.f32.mrb[8].mxu0  ;;  %v6739_v53 = vpop.f32.mrb[8].mxu1 }
 0x58a   :  { %v6718_v55 = vpop.f32.mrb[9].mxu0  ;;  %v6740_v56 = vpop.f32.mrb[9].mxu1 }
 0x58b   :  { %v6719_v57 = vadd.f32 %v6718_v55, %v6717_v52  ;;  %v6741_v58 = vadd.f32 %v6740_v56, %v6739_v53  ;;  %v6720_v59 = vpop.f32.mrb[10].mxu0  ;;  %v6742_v60 = vpop.f32.mrb[10].mxu1 }
 0x58c   :  { %v6721_v61 = vpop.f32.mrb[11].mxu0  ;;  %v6743_v62 = vpop.f32.mrb[11].mxu1 }
 0x58d   :  { %v5858_v63 = vadd.f32 %v6719_v57, %v6659_v54  ;;  %v6722_v0 = vadd.f32 %v6721_v61, %v6720_v59  ;;  %v6744_v1 = vadd.f32 %v6743_v62, %v6742_v60 }
 0x58f   :  { %v5861_v44 = vadd.f32 %v6722_v0, %v6659_v54  ;;  %v5899_v2 = vadd.f32 %v6741_v58, %v5858_v63 }
 0x591   :  { %5905 = vmax.xlane.f32.xlu0 %v5899_v2  ;;  %v5902_v3 = vadd.f32 %v6744_v1, %v5861_v44 }
 0x595   :  { %5907 = vmax.xlane.f32.xlu0 %v5902_v3 }
 0x61e   :  { %v5906_v4 = vpop.xlane.xlu0 %5905 }
 0x61f   :  { %v5909_v5 = vsub.f32 %v5899_v2, %v5906_v4 }
 0x621   :  { %v5911_v6 = vmul.f32 1.442695, %v5909_v5 }
 0x622   :  { %v5908_v7 = vpop.xlane.xlu0 %5907 }
 0x623   :  { %7958 = vpow2.f32 %v5911_v6  ;;  %v5910_v8 = vsub.f32 %v5902_v3, %v5908_v7 }
 0x625   :  { %v5913_v12 = vmul.f32 1.442695, %v5910_v8 }
 0x627   :  { %7960 = vpow2.f32 %v5913_v12 }
 0x62d   :  { %v7959_v15 = vpop.eup %7958 }
 0x62e   :  { %5915 = vadd.xlane.f32.xlu1 %v7959_v15 }
 0x631   :  { %v7961_v16 = vpop.eup %7960 }
 0x632   :  { %5917 = vadd.xlane.f32.xlu1 %v7961_v16 }
 0x6bb   :  { %v5916_v17 = vpop.xlane.xlu1 %5915 }
 0x6bc   :  { %7962 = vrcp.f32 %v5916_v17 }
 0x6bf   :  { %v5918_v18 = vpop.xlane.xlu1 %5917 }
 0x6c0   :  { %7964 = vrcp.f32 %v5918_v18 }
 0x6c6   :  { %v7963_v19 = vpop.eup %7962 }
 0x6c7   :  { %v5921_v21 = vmul.f32 %v7963_v19, %v7959_v15 }
 0x6ca   :  { %v7965_v20 = vpop.eup %7964 }
 0x6cb   :  { %v5922_v22 = vmul.f32 %v7965_v20, %v7961_v16 }
 0x6cd   :  { %v6699_v23 = vpack.c.bf16 %v5922_v22, %v5921_v21 }
 0x6cf   :  { %6700 = vst [vmem:[%s8379_s7] sm:$0xff] %v6699_v23  }
 0x6d0   :  { %5937 = vsyncpa [#allocation3], 1 }
 0x6d1   :  { %5938 = vsyncpa [#allocation5], 1 }
 0x6d2   :  { %5939 = vsyncpa [#allocation8], 1 }
 0x6d3   :  { %5940 = vsyncpa [#allocation11], 1 }

</bundles_post_ra>
